<compile_context>
chip_gen: v6e
topology: v6e:2x2x1
jax: 0.10.0
libtpu: 0.0.40
codegen_flags: <defaults>
</compile_context>

<pallas_src>
import functools

import numpy as np
import jax
import jax.numpy as jnp
from jax.experimental import pallas as pl
from jax.experimental.pallas import tpu as pltpu

# ---------------- config ----------------
EMSIZE = 32
NHEADS = 4
HEAD_DIM = EMSIZE // NHEADS
NHID = 64
NLAYERS = 2                      # layer 0: dense TransformerEncoderLayer, layer 1: Switch MoE
N_EXPERT = 4                     # n_expert // world_size, world_size = 1
NTOKENS = 64
SEQLEN = 16
BATCH = 2
NTOK = BATCH * SEQLEN            # 32 flattened tokens
EPS = 1e-5
NEG_INF = -1e30                  # additive mask value (exp underflows to exactly 0, like -inf)

LAYER_KINDS = tuple("dense" if i % 2 == 0 else "moe" for i in range(NLAYERS))

_ATTN_KEYS = ("wq", "bq", "wk", "bk", "wv", "bv", "wo", "bo", "ln1_g", "ln1_b")
DENSE_KEYS = _ATTN_KEYS + ("ffn_w1", "ffn_b1", "ffn_w2", "ffn_b2", "ln2_g", "ln2_b")
MOE_KEYS = _ATTN_KEYS + ("gate_w", "gate_b", "moe_w1", "moe_b1", "moe_w2", "moe_b2",
                         "ln2_g", "ln2_b")


# ---------------- in-kernel math helpers (operate on jnp values / refs) ----------------
def _erf(x):
    # TODO(synk): torch.nn.GELU uses exact erf; to avoid relying on an erf lowering in Mosaic
    # we evaluate Abramowitz & Stegun 7.1.26 (|error| <= 1.5e-7, ~f32 epsilon) with exp/VPU ops.
    p = 0.3275911
    a1, a2, a3, a4, a5 = 0.254829592, -0.284496736, 1.421413741, -1.453152027, 1.061405429
    ax = jnp.abs(x)
    t = 1.0 / (1.0 + p * ax)
    poly = ((((a5 * t + a4) * t + a3) * t + a2) * t + a1) * t
    y = 1.0 - poly * jnp.exp(-(ax * ax))
    return jnp.where(x < 0.0, -y, y)


def _gelu(x):
    return 0.5 * x * (1.0 + _erf(x * 0.7071067811865476))


def _layernorm(h, g, b):
    mu = jnp.mean(h, axis=-1, keepdims=True)
    var = jnp.mean(jnp.square(h - mu), axis=-1, keepdims=True)
    return (h - mu) * jax.lax.rsqrt(var + EPS) * g + b


def _mha(x, mask, wq, bq, wk, bk, wv, bv, wo, bo):
    """Multi-head self-attention over all B*S tokens at once.  Cross-batch interaction is
    killed by the block-diagonal causal mask; per-head Q/K/V are selected by lane-masking
    the full [N, E] projections (no sub-128-lane slicing / concatenation needed)."""
    q = jnp.dot(x, wq, preferred_element_type=jnp.float32) + bq
    k = jnp.dot(x, wk, preferred_element_type=jnp.float32) + bk
    v = jnp.dot(x, wv, preferred_element_type=jnp.float32) + bv
    col = jax.lax.broadcasted_iota(jnp.int32, (NTOK, EMSIZE), 1)
    scale = 1.0 / (HEAD_DIM ** 0.5)
    attn = jnp.zeros((NTOK, EMSIZE), jnp.float32)
    for h in range(NHEADS):  # unrolled (4 tiny MXU matmul pairs)
        head = (col >= h * HEAD_DIM) & (col < (h + 1) * HEAD_DIM)
        qh = jnp.where(head, q, 0.0)
        kh = jnp.where(head, k, 0.0)
        vh = jnp.where(head, v, 0.0)
        s = jnp.einsum("nd,md->nm", qh, kh,
                       preferred_element_type=jnp.float32) * scale + mask
        s = s - jnp.max(s, axis=-1, keepdims=True)
        p = jnp.exp(s)
        p = p / jnp.sum(p, axis=-1, keepdims=True)
        attn = attn + jnp.dot(p, vh, preferred_element_type=jnp.float32)
    return jnp.dot(attn, wo, preferred_element_type=jnp.float32) + bo


def _ffn(x, w1, b1, w2, b2):
    h = jnp.dot(x, w1, preferred_element_type=jnp.float32) + b1
    h = jnp.maximum(h, 0.0)  # torch TransformerEncoderLayer default activation: ReLU
    return jnp.dot(h, w2, preferred_element_type=jnp.float32) + b2


def _switch_moe(x, gate_w, gate_b, w1_ref, b1_ref, w2_ref, b2_ref):
    """FMoETransformerMLP with NaiveGate, top_k=1 (Switch): softmax over a single selected
    logit is 1, so output == argmax-expert MLP.  Dense unrolled formulation with one-hot
    selection is mathematically identical to routed dispatch."""
    gl = jnp.dot(x, gate_w, preferred_element_type=jnp.float32) + gate_b    # [N, n_expert]
    mx = jnp.max(gl, axis=-1, keepdims=True)
    eidx = jax.lax.broadcasted_iota(jnp.int32, (NTOK, N_EXPERT), 1).astype(jnp.float32)
    # first index attaining the max (matches torch.topk tie-break), no scatter / argmax op
    sel = jnp.min(jnp.where(gl >= mx, eidx, float(N_EXPERT)), axis=-1, keepdims=True)
    out = jnp.zeros((NTOK, EMSIZE), jnp.float32)
    for e in range(N_EXPERT):  # unrolled expert loop, GELU fused between the two matmuls
        h = jnp.dot(x, w1_ref[e], preferred_element_type=jnp.float32) + b1_ref[e]
        h = _gelu(h)
        y = jnp.dot(h, w2_ref[e], preferred_element_type=jnp.float32) + b2_ref[e]
        out = out + jnp.where(sel == float(e), y, 0.0)
    return out


# ---------------- the single fused kernel ----------------
def _rswitch_kernel(*args, layer_kinds):
    o_ref = args[-1]
    refs = args[:-1]
    pos = 0

    def take(n):
        nonlocal pos
        r = refs[pos:pos + n]
        pos += n
        return r

    x_ids_ref, y_ids_ref, emb_ref, pe_ref, mask_ref = take(5)
    mask = mask_ref[...]

    # token embedding as one-hot matmul (no gather), scaled by sqrt(emsize), plus PE
    vcol = jax.lax.broadcasted_iota(jnp.int32, (NTOK, NTOKENS), 1)
    x_oh = (vcol == x_ids_ref[...]).astype(jnp.float32)
    h = (jnp.dot(x_oh, emb_ref[...], preferred_element_type=jnp.float32) * (EMSIZE ** 0.5)
         + pe_ref[...])

    for kind in layer_kinds:
        if kind == "dense":
            (wq, bq, wk, bk, wv, bv, wo, bo, g1, b1,
             fw1, fb1, fw2, fb2, g2, b2) = take(16)
            sa = _mha(h, mask, wq[...], bq[...], wk[...], bk[...], wv[...], bv[...],
                      wo[...], bo[...])
            h = _layernorm(h + sa, g1[...], b1[...])
            ff = _ffn(h, fw1[...], fb1[...], fw2[...], fb2[...])
            h = _layernorm(h + ff, g2[...], b2[...])
        else:
            (wq, bq, wk, bk, wv, bv, wo, bo, g1, b1,
             gw, gb, mw1, mb1, mw2, mb2, g2, b2) = take(18)
            sa = _mha(h, mask, wq[...], bq[...], wk[...], bk[...], wv[...], bv[...],
                      wo[...], bo[...])
            h = _layernorm(h + sa, g1[...], b1[...])
            ff = _switch_moe(h, gw[...], gb[...], mw1, mb1, mw2, mb2)
            h = _layernorm(h + ff, g2[...], b2[...])

    # decoder + log_softmax + NLLLoss(reduction='sum') epilogue
    dec_w, dec_b = take(2)
    logits = jnp.dot(h, dec_w[...], preferred_element_type=jnp.float32) + dec_b[...]
    mx = jnp.max(logits, axis=-1, keepdims=True)
    lse = mx + jnp.log(jnp.sum(jnp.exp(logits - mx), axis=-1, keepdims=True))
    lsm = logits - lse
    y_oh = (vcol == y_ids_ref[...]).astype(jnp.float32)
    o_ref[...] = -jnp.sum(y_oh * lsm, keepdims=True)


# ---------------- wrapper ----------------
def _full_spec(shape):
    nd = len(shape)
    return pl.BlockSpec(shape, lambda i: (0,) * nd)


def rswitch_forward(params, x_tokens, y_tokens):
    b, s = x_tokens.shape
    n = b * s
    x_ids = x_tokens.reshape(n, 1).astype(jnp.int32)
    y_ids = y_tokens.reshape(n, 1).astype(jnp.int32)

    flat = [x_ids, y_ids, params["emb"], params["pe_full"], params["mask"]]
    for lyr, kind in zip(params["layers"], LAYER_KINDS):
        keys = DENSE_KEYS if kind == "dense" else MOE_KEYS
        flat.extend(lyr[k] for k in keys)
    flat.extend([params["dec_w"], params["dec_b"]])

    loss = pl.pallas_call(
        functools.partial(_rswitch_kernel, layer_kinds=LAYER_KINDS),
        grid=(1,),
        in_specs=[_full_spec(t.shape) for t in flat],
        out_specs=_full_spec((1, 1)),
        out_shape=jax.ShapeDtypeStruct((1, 1), jnp.float32),
        compiler_params=pltpu.CompilerParams(dimension_semantics=("arbitrary",)),
    )(*flat)
    return loss[0, 0]


# ---------------- constants / params (JAX glue, no data movement at runtime) ----------------
def positional_encoding(seq_len, d_model):
    pos = np.arange(seq_len, dtype=np.float32)[:, None]
    i = np.arange(d_model, dtype=np.float32)[None, :]
    angle = pos / np.power(10000.0, (2.0 * np.floor(i / 2.0)) / d_model)
    pe = np.zeros((seq_len, d_model), dtype=np.float32)
    pe[:, 0::2] = np.sin(angle[:, 0::2])
    pe[:, 1::2] = np.cos(angle[:, 1::2])
    return pe


def _block_causal_mask(batch, seqlen):
    # src_mask = triu(-inf, diagonal=1) applied per sequence; batches made independent by
    # masking cross-batch entries of the joint [N, N] score matrix.
    n = batch * seqlen
    r = np.arange(n)[:, None]
    c = np.arange(n)[None, :]
    allow = ((r // seqlen) == (c // seqlen)) & (c <= r)
    return np.where(allow, 0.0, NEG_INF).astype(np.float32)


def init_params(key):
    keys = iter(jax.random.split(key, 128))

    def nrm(shape, scale=0.02):
        return (scale * jax.random.normal(next(keys), shape)).astype(jnp.float32)

    params = {
        "emb": nrm((NTOKENS, EMSIZE)),
        "pe_full": jnp.asarray(np.tile(positional_encoding(SEQLEN, EMSIZE), (BATCH, 1))),
        "mask": jnp.asarray(_block_causal_mask(BATCH, SEQLEN)),
        "dec_w": nrm((EMSIZE, NTOKENS)),
        "dec_b": nrm((1, NTOKENS)),
    }
    layers = []
    for kind in LAYER_KINDS:
        lyr = {
            "wq": nrm((EMSIZE, EMSIZE)), "bq": nrm((1, EMSIZE)),
            "wk": nrm((EMSIZE, EMSIZE)), "bk": nrm((1, EMSIZE)),
            "wv": nrm((EMSIZE, EMSIZE)), "bv": nrm((1, EMSIZE)),
            "wo": nrm((EMSIZE, EMSIZE)), "bo": nrm((1, EMSIZE)),
            "ln1_g": jnp.ones((1, EMSIZE), jnp.float32),
            "ln1_b": jnp.zeros((1, EMSIZE), jnp.float32),
            "ln2_g": jnp.ones((1, EMSIZE), jnp.float32),
            "ln2_b": jnp.zeros((1, EMSIZE), jnp.float32),
        }
        if kind == "dense":
            lyr.update(
                ffn_w1=nrm((EMSIZE, NHID)), ffn_b1=nrm((1, NHID)),
                ffn_w2=nrm((NHID, EMSIZE)), ffn_b2=nrm((1, EMSIZE)),
            )
        else:
            lyr.update(
                gate_w=nrm((EMSIZE, N_EXPERT)), gate_b=nrm((1, N_EXPERT)),
                moe_w1=nrm((N_EXPERT, EMSIZE, NHID)), moe_b1=nrm((N_EXPERT, 1, NHID)),
                moe_w2=nrm((N_EXPERT, NHID, EMSIZE)), moe_b2=nrm((N_EXPERT, 1, EMSIZE)),
            )
        layers.append(lyr)
    params["layers"] = layers
    return params


if __name__ == "__main__":
    key = jax.random.PRNGKey(0)
    kp, kx, ky = jax.random.split(key, 3)
    params = init_params(kp)
    x = jax.random.randint(kx, (BATCH, SEQLEN), 0, NTOKENS)   # token ids
    y = jax.random.randint(ky, (BATCH, SEQLEN), 0, NTOKENS)   # per-position targets

    loss = jax.jit(rswitch_forward)(params, x, y)
    jax.block_until_ready(loss)
    print("KERNEL_OK")
</pallas_src>

<mosaic_0001>
module attributes {stable_mosaic.version = 11 : i64} {
  func.func @_rswitch_kernel(%arg0: i32, %arg1: memref<32x1xi32, #tpu.memory_space<vmem>>, %arg2: memref<32x1xi32, #tpu.memory_space<vmem>>, %arg3: memref<64x32xf32, #tpu.memory_space<vmem>>, %arg4: memref<32x32xf32, #tpu.memory_space<vmem>>, %arg5: memref<32x32xf32, #tpu.memory_space<vmem>>, %arg6: memref<32x32xf32, #tpu.memory_space<vmem>>, %arg7: memref<1x32xf32, #tpu.memory_space<vmem>>, %arg8: memref<32x32xf32, #tpu.memory_space<vmem>>, %arg9: memref<1x32xf32, #tpu.memory_space<vmem>>, %arg10: memref<32x32xf32, #tpu.memory_space<vmem>>, %arg11: memref<1x32xf32, #tpu.memory_space<vmem>>, %arg12: memref<32x32xf32, #tpu.memory_space<vmem>>, %arg13: memref<1x32xf32, #tpu.memory_space<vmem>>, %arg14: memref<1x32xf32, #tpu.memory_space<vmem>>, %arg15: memref<1x32xf32, #tpu.memory_space<vmem>>, %arg16: memref<32x64xf32, #tpu.memory_space<vmem>>, %arg17: memref<1x64xf32, #tpu.memory_space<vmem>>, %arg18: memref<64x32xf32, #tpu.memory_space<vmem>>, %arg19: memref<1x32xf32, #tpu.memory_space<vmem>>, %arg20: memref<1x32xf32, #tpu.memory_space<vmem>>, %arg21: memref<1x32xf32, #tpu.memory_space<vmem>>, %arg22: memref<32x32xf32, #tpu.memory_space<vmem>>, %arg23: memref<1x32xf32, #tpu.memory_space<vmem>>, %arg24: memref<32x32xf32, #tpu.memory_space<vmem>>, %arg25: memref<1x32xf32, #tpu.memory_space<vmem>>, %arg26: memref<32x32xf32, #tpu.memory_space<vmem>>, %arg27: memref<1x32xf32, #tpu.memory_space<vmem>>, %arg28: memref<32x32xf32, #tpu.memory_space<vmem>>, %arg29: memref<1x32xf32, #tpu.memory_space<vmem>>, %arg30: memref<1x32xf32, #tpu.memory_space<vmem>>, %arg31: memref<1x32xf32, #tpu.memory_space<vmem>>, %arg32: memref<32x4xf32, #tpu.memory_space<vmem>>, %arg33: memref<1x4xf32, #tpu.memory_space<vmem>>, %arg34: memref<4x32x64xf32, #tpu.memory_space<vmem>>, %arg35: memref<4x1x64xf32, #tpu.memory_space<vmem>>, %arg36: memref<4x64x32xf32, #tpu.memory_space<vmem>>, %arg37: memref<4x1x32xf32, #tpu.memory_space<vmem>>, %arg38: memref<1x32xf32, #tpu.memory_space<vmem>>, %arg39: memref<1x32xf32, #tpu.memory_space<vmem>>, %arg40: memref<32x64xf32, #tpu.memory_space<vmem>>, %arg41: memref<1x64xf32, #tpu.memory_space<vmem>>, %arg42: memref<1x1xf32, #tpu.memory_space<vmem>>) attributes {dimension_semantics = [#tpu.dimension_semantics<arbitrary>], iteration_bounds = array<i64: 1>, scalar_prefetch = 0 : i64, scratch_operands = 0 : i64, tpu.core_type = #tpu.core_type<tc>, window_params = [{pipeline_mode = #tpu.pipeline_mode<synchronous>, transform_indices = @transform_0, window_bounds = array<i64: 32, 1>}, {pipeline_mode = #tpu.pipeline_mode<synchronous>, transform_indices = @transform_1, window_bounds = array<i64: 32, 1>}, {pipeline_mode = #tpu.pipeline_mode<synchronous>, transform_indices = @transform_2, window_bounds = array<i64: 64, 32>}, {pipeline_mode = #tpu.pipeline_mode<synchronous>, transform_indices = @transform_3, window_bounds = array<i64: 32, 32>}, {pipeline_mode = #tpu.pipeline_mode<synchronous>, transform_indices = @transform_4, window_bounds = array<i64: 32, 32>}, {pipeline_mode = #tpu.pipeline_mode<synchronous>, transform_indices = @transform_5, window_bounds = array<i64: 32, 32>}, {pipeline_mode = #tpu.pipeline_mode<synchronous>, transform_indices = @transform_6, window_bounds = array<i64: 1, 32>}, {pipeline_mode = #tpu.pipeline_mode<synchronous>, transform_indices = @transform_7, window_bounds = array<i64: 32, 32>}, {pipeline_mode = #tpu.pipeline_mode<synchronous>, transform_indices = @transform_8, window_bounds = array<i64: 1, 32>}, {pipeline_mode = #tpu.pipeline_mode<synchronous>, transform_indices = @transform_9, window_bounds = array<i64: 32, 32>}, {pipeline_mode = #tpu.pipeline_mode<synchronous>, transform_indices = @transform_10, window_bounds = array<i64: 1, 32>}, {pipeline_mode = #tpu.pipeline_mode<synchronous>, transform_indices = @transform_11, window_bounds = array<i64: 32, 32>}, {pipeline_mode = #tpu.pipeline_mode<synchronous>, transform_indices = @transform_12, window_bounds = array<i64: 1, 32>}, {pipeline_mode = #tpu.pipeline_mode<synchronous>, transform_indices = @transform_13, window_bounds = array<i64: 1, 32>}, {pipeline_mode = #tpu.pipeline_mode<synchronous>, transform_indices = @transform_14, window_bounds = array<i64: 1, 32>}, {pipeline_mode = #tpu.pipeline_mode<synchronous>, transform_indices = @transform_15, window_bounds = array<i64: 32, 64>}, {pipeline_mode = #tpu.pipeline_mode<synchronous>, transform_indices = @transform_16, window_bounds = array<i64: 1, 64>}, {pipeline_mode = #tpu.pipeline_mode<synchronous>, transform_indices = @transform_17, window_bounds = array<i64: 64, 32>}, {pipeline_mode = #tpu.pipeline_mode<synchronous>, transform_indices = @transform_18, window_bounds = array<i64: 1, 32>}, {pipeline_mode = #tpu.pipeline_mode<synchronous>, transform_indices = @transform_19, window_bounds = array<i64: 1, 32>}, {pipeline_mode = #tpu.pipeline_mode<synchronous>, transform_indices = @transform_20, window_bounds = array<i64: 1, 32>}, {pipeline_mode = #tpu.pipeline_mode<synchronous>, transform_indices = @transform_21, window_bounds = array<i64: 32, 32>}, {pipeline_mode = #tpu.pipeline_mode<synchronous>, transform_indices = @transform_22, window_bounds = array<i64: 1, 32>}, {pipeline_mode = #tpu.pipeline_mode<synchronous>, transform_indices = @transform_23, window_bounds = array<i64: 32, 32>}, {pipeline_mode = #tpu.pipeline_mode<synchronous>, transform_indices = @transform_24, window_bounds = array<i64: 1, 32>}, {pipeline_mode = #tpu.pipeline_mode<synchronous>, transform_indices = @transform_25, window_bounds = array<i64: 32, 32>}, {pipeline_mode = #tpu.pipeline_mode<synchronous>, transform_indices = @transform_26, window_bounds = array<i64: 1, 32>}, {pipeline_mode = #tpu.pipeline_mode<synchronous>, transform_indices = @transform_27, window_bounds = array<i64: 32, 32>}, {pipeline_mode = #tpu.pipeline_mode<synchronous>, transform_indices = @transform_28, window_bounds = array<i64: 1, 32>}, {pipeline_mode = #tpu.pipeline_mode<synchronous>, transform_indices = @transform_29, window_bounds = array<i64: 1, 32>}, {pipeline_mode = #tpu.pipeline_mode<synchronous>, transform_indices = @transform_30, window_bounds = array<i64: 1, 32>}, {pipeline_mode = #tpu.pipeline_mode<synchronous>, transform_indices = @transform_31, window_bounds = array<i64: 32, 4>}, {pipeline_mode = #tpu.pipeline_mode<synchronous>, transform_indices = @transform_32, window_bounds = array<i64: 1, 4>}, {pipeline_mode = #tpu.pipeline_mode<synchronous>, transform_indices = @transform_33, window_bounds = array<i64: 4, 32, 64>}, {pipeline_mode = #tpu.pipeline_mode<synchronous>, transform_indices = @transform_34, window_bounds = array<i64: 4, 1, 64>}, {pipeline_mode = #tpu.pipeline_mode<synchronous>, transform_indices = @transform_35, window_bounds = array<i64: 4, 64, 32>}, {pipeline_mode = #tpu.pipeline_mode<synchronous>, transform_indices = @transform_36, window_bounds = array<i64: 4, 1, 32>}, {pipeline_mode = #tpu.pipeline_mode<synchronous>, transform_indices = @transform_37, window_bounds = array<i64: 1, 32>}, {pipeline_mode = #tpu.pipeline_mode<synchronous>, transform_indices = @transform_38, window_bounds = array<i64: 1, 32>}, {pipeline_mode = #tpu.pipeline_mode<synchronous>, transform_indices = @transform_39, window_bounds = array<i64: 32, 64>}, {pipeline_mode = #tpu.pipeline_mode<synchronous>, transform_indices = @transform_40, window_bounds = array<i64: 1, 64>}, {pipeline_mode = #tpu.pipeline_mode<synchronous>, transform_indices = @transform_41, window_bounds = array<i64: 1, 1>}]} {
    %c0 = arith.constant 0 : index
    %c0_0 = arith.constant 0 : index
    %0 = vector.load %arg5[%c0, %c0_0] : memref<32x32xf32, #tpu.memory_space<vmem>>, vector<32x32xf32>
    %1 = tpu.iota {dimensions = array<i32: 1>} : vector<32x64xi32>
    %c0_1 = arith.constant 0 : index
    %c0_2 = arith.constant 0 : index
    %2 = vector.load %arg1[%c0_1, %c0_2] : memref<32x1xi32, #tpu.memory_space<vmem>>, vector<32x1xi32>
    %3 = vector.broadcast %2 : vector<32x1xi32> to vector<32x64xi32>
    %4 = arith.cmpi eq, %1, %3 : vector<32x64xi32>
    %5 = arith.extui %4 : vector<32x64xi1> to vector<32x64xi32>
    %6 = arith.sitofp %5 : vector<32x64xi32> to vector<32x64xf32>
    %c0_3 = arith.constant 0 : index
    %c0_4 = arith.constant 0 : index
    %7 = vector.load %arg3[%c0_3, %c0_4] : memref<64x32xf32, #tpu.memory_space<vmem>>, vector<64x32xf32>
    %cst = arith.constant dense<0.000000e+00> : vector<32x32xf32>
    %8 = tpu.matmul %6, %7, %cst {dimension_numbers = #tpu.dot_dimension_numbers<[1], [0], [0], [1], [0, 0, 1, 1], [], []>} : vector<32x64xf32>, vector<64x32xf32>, vector<32x32xf32> -> vector<32x32xf32>
    %cst_5 = arith.constant 5.65685415 : f32
    %9 = vector.broadcast %cst_5 : f32 to vector<32x32xf32>
    %10 = arith.mulf %8, %9 : vector<32x32xf32>
    %c0_6 = arith.constant 0 : index
    %c0_7 = arith.constant 0 : index
    %11 = vector.load %arg4[%c0_6, %c0_7] : memref<32x32xf32, #tpu.memory_space<vmem>>, vector<32x32xf32>
    %12 = arith.addf %10, %11 : vector<32x32xf32>
    %c0_8 = arith.constant 0 : index
    %c0_9 = arith.constant 0 : index
    %13 = vector.load %arg6[%c0_8, %c0_9] : memref<32x32xf32, #tpu.memory_space<vmem>>, vector<32x32xf32>
    %c0_10 = arith.constant 0 : index
    %c0_11 = arith.constant 0 : index
    %14 = vector.load %arg7[%c0_10, %c0_11] : memref<1x32xf32, #tpu.memory_space<vmem>>, vector<1x32xf32>
    %c0_12 = arith.constant 0 : index
    %c0_13 = arith.constant 0 : index
    %15 = vector.load %arg8[%c0_12, %c0_13] : memref<32x32xf32, #tpu.memory_space<vmem>>, vector<32x32xf32>
    %c0_14 = arith.constant 0 : index
    %c0_15 = arith.constant 0 : index
    %16 = vector.load %arg9[%c0_14, %c0_15] : memref<1x32xf32, #tpu.memory_space<vmem>>, vector<1x32xf32>
    %c0_16 = arith.constant 0 : index
    %c0_17 = arith.constant 0 : index
    %17 = vector.load %arg10[%c0_16, %c0_17] : memref<32x32xf32, #tpu.memory_space<vmem>>, vector<32x32xf32>
    %c0_18 = arith.constant 0 : index
    %c0_19 = arith.constant 0 : index
    %18 = vector.load %arg11[%c0_18, %c0_19] : memref<1x32xf32, #tpu.memory_space<vmem>>, vector<1x32xf32>
    %c0_20 = arith.constant 0 : index
    %c0_21 = arith.constant 0 : index
    %19 = vector.load %arg12[%c0_20, %c0_21] : memref<32x32xf32, #tpu.memory_space<vmem>>, vector<32x32xf32>
    %c0_22 = arith.constant 0 : index
    %c0_23 = arith.constant 0 : index
    %20 = vector.load %arg13[%c0_22, %c0_23] : memref<1x32xf32, #tpu.memory_space<vmem>>, vector<1x32xf32>
    %cst_24 = arith.constant dense<0.000000e+00> : vector<32x32xf32>
    %21 = tpu.matmul %12, %13, %cst_24 {dimension_numbers = #tpu.dot_dimension_numbers<[1], [0], [0], [1], [0, 0, 1, 1], [], []>} : vector<32x32xf32>, vector<32x32xf32>, vector<32x32xf32> -> vector<32x32xf32>
    %22 = vector.broadcast %14 : vector<1x32xf32> to vector<32x32xf32>
    %23 = arith.addf %21, %22 : vector<32x32xf32>
    %cst_25 = arith.constant dense<0.000000e+00> : vector<32x32xf32>
    %24 = tpu.matmul %12, %15, %cst_25 {dimension_numbers = #tpu.dot_dimension_numbers<[1], [0], [0], [1], [0, 0, 1, 1], [], []>} : vector<32x32xf32>, vector<32x32xf32>, vector<32x32xf32> -> vector<32x32xf32>
    %25 = vector.broadcast %16 : vector<1x32xf32> to vector<32x32xf32>
    %26 = arith.addf %24, %25 : vector<32x32xf32>
    %cst_26 = arith.constant dense<0.000000e+00> : vector<32x32xf32>
    %27 = tpu.matmul %12, %17, %cst_26 {dimension_numbers = #tpu.dot_dimension_numbers<[1], [0], [0], [1], [0, 0, 1, 1], [], []>} : vector<32x32xf32>, vector<32x32xf32>, vector<32x32xf32> -> vector<32x32xf32>
    %28 = vector.broadcast %18 : vector<1x32xf32> to vector<32x32xf32>
    %29 = arith.addf %27, %28 : vector<32x32xf32>
    %30 = tpu.iota {dimensions = array<i32: 1>} : vector<32x32xi32>
    %cst_27 = arith.constant 0.000000e+00 : f32
    %31 = vector.broadcast %cst_27 : f32 to vector<32x32xf32>
    %c0_i32 = arith.constant 0 : i32
    %32 = vector.broadcast %c0_i32 : i32 to vector<32x32xi32>
    %33 = arith.cmpi sge, %30, %32 : vector<32x32xi32>
    %c8_i32 = arith.constant 8 : i32
    %34 = vector.broadcast %c8_i32 : i32 to vector<32x32xi32>
    %35 = arith.cmpi slt, %30, %34 : vector<32x32xi32>
    %36 = arith.andi %33, %35 : vector<32x32xi1>
    %cst_28 = arith.constant 0.000000e+00 : f32
    %37 = vector.broadcast %cst_28 : f32 to vector<32x32xf32>
    %38 = arith.select %36, %23, %37 : vector<32x32xi1>, vector<32x32xf32>
    %cst_29 = arith.constant 0.000000e+00 : f32
    %39 = vector.broadcast %cst_29 : f32 to vector<32x32xf32>
    %40 = arith.select %36, %26, %39 : vector<32x32xi1>, vector<32x32xf32>
    %cst_30 = arith.constant 0.000000e+00 : f32
    %41 = vector.broadcast %cst_30 : f32 to vector<32x32xf32>
    %42 = arith.select %36, %29, %41 : vector<32x32xi1>, vector<32x32xf32>
    "tpu.trace_start"() <{level = 10 : i32, message = "nd,md->nm"}> : () -> ()
    %cst_31 = arith.constant dense<0.000000e+00> : vector<32x32xf32>
    %43 = tpu.matmul %38, %40, %cst_31 {dimension_numbers = #tpu.dot_dimension_numbers<[1], [1], [0], [0], [0, 0, 1, 0], [], []>} : vector<32x32xf32>, vector<32x32xf32>, vector<32x32xf32> -> vector<32x32xf32>
    "tpu.trace_stop"() : () -> ()
    %cst_32 = arith.constant 0.353553385 : f32
    %44 = vector.broadcast %cst_32 : f32 to vector<32x32xf32>
    %45 = arith.mulf %43, %44 : vector<32x32xf32>
    %46 = arith.addf %45, %0 : vector<32x32xf32>
    %cst_33 = arith.constant dense<0xFF800000> : vector<32xf32>
    %47 = vector.multi_reduction <maximumf>, %46, %cst_33 [1] : vector<32x32xf32> to vector<32xf32>
    %48 = vector.shape_cast %47 : vector<32xf32> to vector<32x1xf32>
    %49 = vector.broadcast %48 : vector<32x1xf32> to vector<32x32xf32>
    %50 = arith.subf %46, %49 : vector<32x32xf32>
    %51 = math.exp %50 : vector<32x32xf32>
    %cst_34 = arith.constant dense<0.000000e+00> : vector<32xf32>
    %52 = vector.multi_reduction <add>, %51, %cst_34 [1] : vector<32x32xf32> to vector<32xf32>
    %53 = vector.shape_cast %52 : vector<32xf32> to vector<32x1xf32>
    %54 = vector.broadcast %53 : vector<32x1xf32> to vector<32x32xf32>
    %55 = arith.divf %51, %54 : vector<32x32xf32>
    %cst_35 = arith.constant dense<0.000000e+00> : vector<32x32xf32>
    %56 = tpu.matmul %55, %42, %cst_35 {dimension_numbers = #tpu.dot_dimension_numbers<[1], [0], [0], [1], [0, 0, 1, 1], [], []>} : vector<32x32xf32>, vector<32x32xf32>, vector<32x32xf32> -> vector<32x32xf32>
    %57 = arith.addf %31, %56 : vector<32x32xf32>
    %c8_i32_36 = arith.constant 8 : i32
    %58 = vector.broadcast %c8_i32_36 : i32 to vector<32x32xi32>
    %59 = arith.cmpi sge, %30, %58 : vector<32x32xi32>
    %c16_i32 = arith.constant 16 : i32
    %60 = vector.broadcast %c16_i32 : i32 to vector<32x32xi32>
    %61 = arith.cmpi slt, %30, %60 : vector<32x32xi32>
    %62 = arith.andi %59, %61 : vector<32x32xi1>
    %cst_37 = arith.constant 0.000000e+00 : f32
    %63 = vector.broadcast %cst_37 : f32 to vector<32x32xf32>
    %64 = arith.select %62, %23, %63 : vector<32x32xi1>, vector<32x32xf32>
    %cst_38 = arith.constant 0.000000e+00 : f32
    %65 = vector.broadcast %cst_38 : f32 to vector<32x32xf32>
    %66 = arith.select %62, %26, %65 : vector<32x32xi1>, vector<32x32xf32>
    %cst_39 = arith.constant 0.000000e+00 : f32
    %67 = vector.broadcast %cst_39 : f32 to vector<32x32xf32>
    %68 = arith.select %62, %29, %67 : vector<32x32xi1>, vector<32x32xf32>
    "tpu.trace_start"() <{level = 10 : i32, message = "nd,md->nm"}> : () -> ()
    %cst_40 = arith.constant dense<0.000000e+00> : vector<32x32xf32>
    %69 = tpu.matmul %64, %66, %cst_40 {dimension_numbers = #tpu.dot_dimension_numbers<[1], [1], [0], [0], [0, 0, 1, 0], [], []>} : vector<32x32xf32>, vector<32x32xf32>, vector<32x32xf32> -> vector<32x32xf32>
    "tpu.trace_stop"() : () -> ()
    %cst_41 = arith.constant 0.353553385 : f32
    %70 = vector.broadcast %cst_41 : f32 to vector<32x32xf32>
    %71 = arith.mulf %69, %70 : vector<32x32xf32>
    %72 = arith.addf %71, %0 : vector<32x32xf32>
    %cst_42 = arith.constant dense<0xFF800000> : vector<32xf32>
    %73 = vector.multi_reduction <maximumf>, %72, %cst_42 [1] : vector<32x32xf32> to vector<32xf32>
    %74 = vector.shape_cast %73 : vector<32xf32> to vector<32x1xf32>
    %75 = vector.broadcast %74 : vector<32x1xf32> to vector<32x32xf32>
    %76 = arith.subf %72, %75 : vector<32x32xf32>
    %77 = math.exp %76 : vector<32x32xf32>
    %cst_43 = arith.constant dense<0.000000e+00> : vector<32xf32>
    %78 = vector.multi_reduction <add>, %77, %cst_43 [1] : vector<32x32xf32> to vector<32xf32>
    %79 = vector.shape_cast %78 : vector<32xf32> to vector<32x1xf32>
    %80 = vector.broadcast %79 : vector<32x1xf32> to vector<32x32xf32>
    %81 = arith.divf %77, %80 : vector<32x32xf32>
    %cst_44 = arith.constant dense<0.000000e+00> : vector<32x32xf32>
    %82 = tpu.matmul %81, %68, %cst_44 {dimension_numbers = #tpu.dot_dimension_numbers<[1], [0], [0], [1], [0, 0, 1, 1], [], []>} : vector<32x32xf32>, vector<32x32xf32>, vector<32x32xf32> -> vector<32x32xf32>
    %83 = arith.addf %57, %82 : vector<32x32xf32>
    %c16_i32_45 = arith.constant 16 : i32
    %84 = vector.broadcast %c16_i32_45 : i32 to vector<32x32xi32>
    %85 = arith.cmpi sge, %30, %84 : vector<32x32xi32>
    %c24_i32 = arith.constant 24 : i32
    %86 = vector.broadcast %c24_i32 : i32 to vector<32x32xi32>
    %87 = arith.cmpi slt, %30, %86 : vector<32x32xi32>
    %88 = arith.andi %85, %87 : vector<32x32xi1>
    %cst_46 = arith.constant 0.000000e+00 : f32
    %89 = vector.broadcast %cst_46 : f32 to vector<32x32xf32>
    %90 = arith.select %88, %23, %89 : vector<32x32xi1>, vector<32x32xf32>
    %cst_47 = arith.constant 0.000000e+00 : f32
    %91 = vector.broadcast %cst_47 : f32 to vector<32x32xf32>
    %92 = arith.select %88, %26, %91 : vector<32x32xi1>, vector<32x32xf32>
    %cst_48 = arith.constant 0.000000e+00 : f32
    %93 = vector.broadcast %cst_48 : f32 to vector<32x32xf32>
    %94 = arith.select %88, %29, %93 : vector<32x32xi1>, vector<32x32xf32>
    "tpu.trace_start"() <{level = 10 : i32, message = "nd,md->nm"}> : () -> ()
    %cst_49 = arith.constant dense<0.000000e+00> : vector<32x32xf32>
    %95 = tpu.matmul %90, %92, %cst_49 {dimension_numbers = #tpu.dot_dimension_numbers<[1], [1], [0], [0], [0, 0, 1, 0], [], []>} : vector<32x32xf32>, vector<32x32xf32>, vector<32x32xf32> -> vector<32x32xf32>
    "tpu.trace_stop"() : () -> ()
    %cst_50 = arith.constant 0.353553385 : f32
    %96 = vector.broadcast %cst_50 : f32 to vector<32x32xf32>
    %97 = arith.mulf %95, %96 : vector<32x32xf32>
    %98 = arith.addf %97, %0 : vector<32x32xf32>
    %cst_51 = arith.constant dense<0xFF800000> : vector<32xf32>
    %99 = vector.multi_reduction <maximumf>, %98, %cst_51 [1] : vector<32x32xf32> to vector<32xf32>
    %100 = vector.shape_cast %99 : vector<32xf32> to vector<32x1xf32>
    %101 = vector.broadcast %100 : vector<32x1xf32> to vector<32x32xf32>
    %102 = arith.subf %98, %101 : vector<32x32xf32>
    %103 = math.exp %102 : vector<32x32xf32>
    %cst_52 = arith.constant dense<0.000000e+00> : vector<32xf32>
    %104 = vector.multi_reduction <add>, %103, %cst_52 [1] : vector<32x32xf32> to vector<32xf32>
    %105 = vector.shape_cast %104 : vector<32xf32> to vector<32x1xf32>
    %106 = vector.broadcast %105 : vector<32x1xf32> to vector<32x32xf32>
    %107 = arith.divf %103, %106 : vector<32x32xf32>
    %cst_53 = arith.constant dense<0.000000e+00> : vector<32x32xf32>
    %108 = tpu.matmul %107, %94, %cst_53 {dimension_numbers = #tpu.dot_dimension_numbers<[1], [0], [0], [1], [0, 0, 1, 1], [], []>} : vector<32x32xf32>, vector<32x32xf32>, vector<32x32xf32> -> vector<32x32xf32>
    %109 = arith.addf %83, %108 : vector<32x32xf32>
    %c24_i32_54 = arith.constant 24 : i32
    %110 = vector.broadcast %c24_i32_54 : i32 to vector<32x32xi32>
    %111 = arith.cmpi sge, %30, %110 : vector<32x32xi32>
    %c32_i32 = arith.constant 32 : i32
    %112 = vector.broadcast %c32_i32 : i32 to vector<32x32xi32>
    %113 = arith.cmpi slt, %30, %112 : vector<32x32xi32>
    %114 = arith.andi %111, %113 : vector<32x32xi1>
    %cst_55 = arith.constant 0.000000e+00 : f32
    %115 = vector.broadcast %cst_55 : f32 to vector<32x32xf32>
    %116 = arith.select %114, %23, %115 : vector<32x32xi1>, vector<32x32xf32>
    %cst_56 = arith.constant 0.000000e+00 : f32
    %117 = vector.broadcast %cst_56 : f32 to vector<32x32xf32>
    %118 = arith.select %114, %26, %117 : vector<32x32xi1>, vector<32x32xf32>
    %cst_57 = arith.constant 0.000000e+00 : f32
    %119 = vector.broadcast %cst_57 : f32 to vector<32x32xf32>
    %120 = arith.select %114, %29, %119 : vector<32x32xi1>, vector<32x32xf32>
    "tpu.trace_start"() <{level = 10 : i32, message = "nd,md->nm"}> : () -> ()
    %cst_58 = arith.constant dense<0.000000e+00> : vector<32x32xf32>
    %121 = tpu.matmul %116, %118, %cst_58 {dimension_numbers = #tpu.dot_dimension_numbers<[1], [1], [0], [0], [0, 0, 1, 0], [], []>} : vector<32x32xf32>, vector<32x32xf32>, vector<32x32xf32> -> vector<32x32xf32>
    "tpu.trace_stop"() : () -> ()
    %cst_59 = arith.constant 0.353553385 : f32
    %122 = vector.broadcast %cst_59 : f32 to vector<32x32xf32>
    %123 = arith.mulf %121, %122 : vector<32x32xf32>
    %124 = arith.addf %123, %0 : vector<32x32xf32>
    %cst_60 = arith.constant dense<0xFF800000> : vector<32xf32>
    %125 = vector.multi_reduction <maximumf>, %124, %cst_60 [1] : vector<32x32xf32> to vector<32xf32>
    %126 = vector.shape_cast %125 : vector<32xf32> to vector<32x1xf32>
    %127 = vector.broadcast %126 : vector<32x1xf32> to vector<32x32xf32>
    %128 = arith.subf %124, %127 : vector<32x32xf32>
    %129 = math.exp %128 : vector<32x32xf32>
    %cst_61 = arith.constant dense<0.000000e+00> : vector<32xf32>
    %130 = vector.multi_reduction <add>, %129, %cst_61 [1] : vector<32x32xf32> to vector<32xf32>
    %131 = vector.shape_cast %130 : vector<32xf32> to vector<32x1xf32>
    %132 = vector.broadcast %131 : vector<32x1xf32> to vector<32x32xf32>
    %133 = arith.divf %129, %132 : vector<32x32xf32>
    %cst_62 = arith.constant dense<0.000000e+00> : vector<32x32xf32>
    %134 = tpu.matmul %133, %120, %cst_62 {dimension_numbers = #tpu.dot_dimension_numbers<[1], [0], [0], [1], [0, 0, 1, 1], [], []>} : vector<32x32xf32>, vector<32x32xf32>, vector<32x32xf32> -> vector<32x32xf32>
    %135 = arith.addf %109, %134 : vector<32x32xf32>
    %cst_63 = arith.constant dense<0.000000e+00> : vector<32x32xf32>
    %136 = tpu.matmul %135, %19, %cst_63 {dimension_numbers = #tpu.dot_dimension_numbers<[1], [0], [0], [1], [0, 0, 1, 1], [], []>} : vector<32x32xf32>, vector<32x32xf32>, vector<32x32xf32> -> vector<32x32xf32>
    %137 = vector.broadcast %20 : vector<1x32xf32> to vector<32x32xf32>
    %138 = arith.addf %136, %137 : vector<32x32xf32>
    %139 = arith.addf %12, %138 : vector<32x32xf32>
    %c0_64 = arith.constant 0 : index
    %c0_65 = arith.constant 0 : index
    %140 = vector.load %arg14[%c0_64, %c0_65] : memref<1x32xf32, #tpu.memory_space<vmem>>, vector<1x32xf32>
    %c0_66 = arith.constant 0 : index
    %c0_67 = arith.constant 0 : index
    %141 = vector.load %arg15[%c0_66, %c0_67] : memref<1x32xf32, #tpu.memory_space<vmem>>, vector<1x32xf32>
    %cst_68 = arith.constant dense<0.000000e+00> : vector<32xf32>
    %142 = vector.multi_reduction <add>, %139, %cst_68 [1] : vector<32x32xf32> to vector<32xf32>
    %143 = vector.shape_cast %142 : vector<32xf32> to vector<32x1xf32>
    %cst_69 = arith.constant 3.200000e+01 : f32
    %144 = vector.broadcast %cst_69 : f32 to vector<32x1xf32>
    %145 = arith.divf %143, %144 : vector<32x1xf32>
    %146 = vector.broadcast %145 : vector<32x1xf32> to vector<32x32xf32>
    %147 = arith.subf %139, %146 : vector<32x32xf32>
    %148 = arith.mulf %147, %147 : vector<32x32xf32>
    %cst_70 = arith.constant dense<0.000000e+00> : vector<32xf32>
    %149 = vector.multi_reduction <add>, %148, %cst_70 [1] : vector<32x32xf32> to vector<32xf32>
    %150 = vector.shape_cast %149 : vector<32xf32> to vector<32x1xf32>
    %cst_71 = arith.constant 3.200000e+01 : f32
    %151 = vector.broadcast %cst_71 : f32 to vector<32x1xf32>
    %152 = arith.divf %150, %151 : vector<32x1xf32>
    %153 = vector.broadcast %145 : vector<32x1xf32> to vector<32x32xf32>
    %154 = arith.subf %139, %153 : vector<32x32xf32>
    %cst_72 = arith.constant 9.99999974E-6 : f32
    %155 = vector.broadcast %cst_72 : f32 to vector<32x1xf32>
    %156 = arith.addf %152, %155 : vector<32x1xf32>
    %157 = math.rsqrt %156 : vector<32x1xf32>
    %158 = vector.broadcast %157 : vector<32x1xf32> to vector<32x32xf32>
    %159 = arith.mulf %154, %158 : vector<32x32xf32>
    %160 = vector.broadcast %140 : vector<1x32xf32> to vector<32x32xf32>
    %161 = arith.mulf %159, %160 : vector<32x32xf32>
    %162 = vector.broadcast %141 : vector<1x32xf32> to vector<32x32xf32>
    %163 = arith.addf %161, %162 : vector<32x32xf32>
    %c0_73 = arith.constant 0 : index
    %c0_74 = arith.constant 0 : index
    %164 = vector.load %arg16[%c0_73, %c0_74] : memref<32x64xf32, #tpu.memory_space<vmem>>, vector<32x64xf32>
    %c0_75 = arith.constant 0 : index
    %c0_76 = arith.constant 0 : index
    %165 = vector.load %arg17[%c0_75, %c0_76] : memref<1x64xf32, #tpu.memory_space<vmem>>, vector<1x64xf32>
    %c0_77 = arith.constant 0 : index
    %c0_78 = arith.constant 0 : index
    %166 = vector.load %arg18[%c0_77, %c0_78] : memref<64x32xf32, #tpu.memory_space<vmem>>, vector<64x32xf32>
    %c0_79 = arith.constant 0 : index
    %c0_80 = arith.constant 0 : index
    %167 = vector.load %arg19[%c0_79, %c0_80] : memref<1x32xf32, #tpu.memory_space<vmem>>, vector<1x32xf32>
    %cst_81 = arith.constant dense<0.000000e+00> : vector<32x64xf32>
    %168 = tpu.matmul %163, %164, %cst_81 {dimension_numbers = #tpu.dot_dimension_numbers<[1], [0], [0], [1], [0, 0, 1, 1], [], []>} : vector<32x32xf32>, vector<32x64xf32>, vector<32x64xf32> -> vector<32x64xf32>
    %169 = vector.broadcast %165 : vector<1x64xf32> to vector<32x64xf32>
    %170 = arith.addf %168, %169 : vector<32x64xf32>
    %cst_82 = arith.constant 0.000000e+00 : f32
    %171 = vector.broadcast %cst_82 : f32 to vector<32x64xf32>
    %172 = arith.maximumf %170, %171 : vector<32x64xf32>
    %cst_83 = arith.constant dense<0.000000e+00> : vector<32x32xf32>
    %173 = tpu.matmul %172, %166, %cst_83 {dimension_numbers = #tpu.dot_dimension_numbers<[1], [0], [0], [1], [0, 0, 1, 1], [], []>} : vector<32x64xf32>, vector<64x32xf32>, vector<32x32xf32> -> vector<32x32xf32>
    %174 = vector.broadcast %167 : vector<1x32xf32> to vector<32x32xf32>
    %175 = arith.addf %173, %174 : vector<32x32xf32>
    %176 = arith.addf %163, %175 : vector<32x32xf32>
    %c0_84 = arith.constant 0 : index
    %c0_85 = arith.constant 0 : index
    %177 = vector.load %arg20[%c0_84, %c0_85] : memref<1x32xf32, #tpu.memory_space<vmem>>, vector<1x32xf32>
    %c0_86 = arith.constant 0 : index
    %c0_87 = arith.constant 0 : index
    %178 = vector.load %arg21[%c0_86, %c0_87] : memref<1x32xf32, #tpu.memory_space<vmem>>, vector<1x32xf32>
    %cst_88 = arith.constant dense<0.000000e+00> : vector<32xf32>
    %179 = vector.multi_reduction <add>, %176, %cst_88 [1] : vector<32x32xf32> to vector<32xf32>
    %180 = vector.shape_cast %179 : vector<32xf32> to vector<32x1xf32>
    %cst_89 = arith.constant 3.200000e+01 : f32
    %181 = vector.broadcast %cst_89 : f32 to vector<32x1xf32>
    %182 = arith.divf %180, %181 : vector<32x1xf32>
    %183 = vector.broadcast %182 : vector<32x1xf32> to vector<32x32xf32>
    %184 = arith.subf %176, %183 : vector<32x32xf32>
    %185 = arith.mulf %184, %184 : vector<32x32xf32>
    %cst_90 = arith.constant dense<0.000000e+00> : vector<32xf32>
    %186 = vector.multi_reduction <add>, %185, %cst_90 [1] : vector<32x32xf32> to vector<32xf32>
    %187 = vector.shape_cast %186 : vector<32xf32> to vector<32x1xf32>
    %cst_91 = arith.constant 3.200000e+01 : f32
    %188 = vector.broadcast %cst_91 : f32 to vector<32x1xf32>
    %189 = arith.divf %187, %188 : vector<32x1xf32>
    %190 = vector.broadcast %182 : vector<32x1xf32> to vector<32x32xf32>
    %191 = arith.subf %176, %190 : vector<32x32xf32>
    %cst_92 = arith.constant 9.99999974E-6 : f32
    %192 = vector.broadcast %cst_92 : f32 to vector<32x1xf32>
    %193 = arith.addf %189, %192 : vector<32x1xf32>
    %194 = math.rsqrt %193 : vector<32x1xf32>
    %195 = vector.broadcast %194 : vector<32x1xf32> to vector<32x32xf32>
    %196 = arith.mulf %191, %195 : vector<32x32xf32>
    %197 = vector.broadcast %177 : vector<1x32xf32> to vector<32x32xf32>
    %198 = arith.mulf %196, %197 : vector<32x32xf32>
    %199 = vector.broadcast %178 : vector<1x32xf32> to vector<32x32xf32>
    %200 = arith.addf %198, %199 : vector<32x32xf32>
    %c0_93 = arith.constant 0 : index
    %c0_94 = arith.constant 0 : index
    %201 = vector.load %arg22[%c0_93, %c0_94] : memref<32x32xf32, #tpu.memory_space<vmem>>, vector<32x32xf32>
    %c0_95 = arith.constant 0 : index
    %c0_96 = arith.constant 0 : index
    %202 = vector.load %arg23[%c0_95, %c0_96] : memref<1x32xf32, #tpu.memory_space<vmem>>, vector<1x32xf32>
    %c0_97 = arith.constant 0 : index
    %c0_98 = arith.constant 0 : index
    %203 = vector.load %arg24[%c0_97, %c0_98] : memref<32x32xf32, #tpu.memory_space<vmem>>, vector<32x32xf32>
    %c0_99 = arith.constant 0 : index
    %c0_100 = arith.constant 0 : index
    %204 = vector.load %arg25[%c0_99, %c0_100] : memref<1x32xf32, #tpu.memory_space<vmem>>, vector<1x32xf32>
    %c0_101 = arith.constant 0 : index
    %c0_102 = arith.constant 0 : index
    %205 = vector.load %arg26[%c0_101, %c0_102] : memref<32x32xf32, #tpu.memory_space<vmem>>, vector<32x32xf32>
    %c0_103 = arith.constant 0 : index
    %c0_104 = arith.constant 0 : index
    %206 = vector.load %arg27[%c0_103, %c0_104] : memref<1x32xf32, #tpu.memory_space<vmem>>, vector<1x32xf32>
    %c0_105 = arith.constant 0 : index
    %c0_106 = arith.constant 0 : index
    %207 = vector.load %arg28[%c0_105, %c0_106] : memref<32x32xf32, #tpu.memory_space<vmem>>, vector<32x32xf32>
    %c0_107 = arith.constant 0 : index
    %c0_108 = arith.constant 0 : index
    %208 = vector.load %arg29[%c0_107, %c0_108] : memref<1x32xf32, #tpu.memory_space<vmem>>, vector<1x32xf32>
    %cst_109 = arith.constant dense<0.000000e+00> : vector<32x32xf32>
    %209 = tpu.matmul %200, %201, %cst_109 {dimension_numbers = #tpu.dot_dimension_numbers<[1], [0], [0], [1], [0, 0, 1, 1], [], []>} : vector<32x32xf32>, vector<32x32xf32>, vector<32x32xf32> -> vector<32x32xf32>
    %210 = vector.broadcast %202 : vector<1x32xf32> to vector<32x32xf32>
    %211 = arith.addf %209, %210 : vector<32x32xf32>
    %cst_110 = arith.constant dense<0.000000e+00> : vector<32x32xf32>
    %212 = tpu.matmul %200, %203, %cst_110 {dimension_numbers = #tpu.dot_dimension_numbers<[1], [0], [0], [1], [0, 0, 1, 1], [], []>} : vector<32x32xf32>, vector<32x32xf32>, vector<32x32xf32> -> vector<32x32xf32>
    %213 = vector.broadcast %204 : vector<1x32xf32> to vector<32x32xf32>
    %214 = arith.addf %212, %213 : vector<32x32xf32>
    %cst_111 = arith.constant dense<0.000000e+00> : vector<32x32xf32>
    %215 = tpu.matmul %200, %205, %cst_111 {dimension_numbers = #tpu.dot_dimension_numbers<[1], [0], [0], [1], [0, 0, 1, 1], [], []>} : vector<32x32xf32>, vector<32x32xf32>, vector<32x32xf32> -> vector<32x32xf32>
    %216 = vector.broadcast %206 : vector<1x32xf32> to vector<32x32xf32>
    %217 = arith.addf %215, %216 : vector<32x32xf32>
    %218 = tpu.iota {dimensions = array<i32: 1>} : vector<32x32xi32>
    %cst_112 = arith.constant 0.000000e+00 : f32
    %219 = vector.broadcast %cst_112 : f32 to vector<32x32xf32>
    %c0_i32_113 = arith.constant 0 : i32
    %220 = vector.broadcast %c0_i32_113 : i32 to vector<32x32xi32>
    %221 = arith.cmpi sge, %218, %220 : vector<32x32xi32>
    %c8_i32_114 = arith.constant 8 : i32
    %222 = vector.broadcast %c8_i32_114 : i32 to vector<32x32xi32>
    %223 = arith.cmpi slt, %218, %222 : vector<32x32xi32>
    %224 = arith.andi %221, %223 : vector<32x32xi1>
    %cst_115 = arith.constant 0.000000e+00 : f32
    %225 = vector.broadcast %cst_115 : f32 to vector<32x32xf32>
    %226 = arith.select %224, %211, %225 : vector<32x32xi1>, vector<32x32xf32>
    %cst_116 = arith.constant 0.000000e+00 : f32
    %227 = vector.broadcast %cst_116 : f32 to vector<32x32xf32>
    %228 = arith.select %224, %214, %227 : vector<32x32xi1>, vector<32x32xf32>
    %cst_117 = arith.constant 0.000000e+00 : f32
    %229 = vector.broadcast %cst_117 : f32 to vector<32x32xf32>
    %230 = arith.select %224, %217, %229 : vector<32x32xi1>, vector<32x32xf32>
    "tpu.trace_start"() <{level = 10 : i32, message = "nd,md->nm"}> : () -> ()
    %cst_118 = arith.constant dense<0.000000e+00> : vector<32x32xf32>
    %231 = tpu.matmul %226, %228, %cst_118 {dimension_numbers = #tpu.dot_dimension_numbers<[1], [1], [0], [0], [0, 0, 1, 0], [], []>} : vector<32x32xf32>, vector<32x32xf32>, vector<32x32xf32> -> vector<32x32xf32>
    "tpu.trace_stop"() : () -> ()
    %cst_119 = arith.constant 0.353553385 : f32
    %232 = vector.broadcast %cst_119 : f32 to vector<32x32xf32>
    %233 = arith.mulf %231, %232 : vector<32x32xf32>
    %234 = arith.addf %233, %0 : vector<32x32xf32>
    %cst_120 = arith.constant dense<0xFF800000> : vector<32xf32>
    %235 = vector.multi_reduction <maximumf>, %234, %cst_120 [1] : vector<32x32xf32> to vector<32xf32>
    %236 = vector.shape_cast %235 : vector<32xf32> to vector<32x1xf32>
    %237 = vector.broadcast %236 : vector<32x1xf32> to vector<32x32xf32>
    %238 = arith.subf %234, %237 : vector<32x32xf32>
    %239 = math.exp %238 : vector<32x32xf32>
    %cst_121 = arith.constant dense<0.000000e+00> : vector<32xf32>
    %240 = vector.multi_reduction <add>, %239, %cst_121 [1] : vector<32x32xf32> to vector<32xf32>
    %241 = vector.shape_cast %240 : vector<32xf32> to vector<32x1xf32>
    %242 = vector.broadcast %241 : vector<32x1xf32> to vector<32x32xf32>
    %243 = arith.divf %239, %242 : vector<32x32xf32>
    %cst_122 = arith.constant dense<0.000000e+00> : vector<32x32xf32>
    %244 = tpu.matmul %243, %230, %cst_122 {dimension_numbers = #tpu.dot_dimension_numbers<[1], [0], [0], [1], [0, 0, 1, 1], [], []>} : vector<32x32xf32>, vector<32x32xf32>, vector<32x32xf32> -> vector<32x32xf32>
    %245 = arith.addf %219, %244 : vector<32x32xf32>
    %c8_i32_123 = arith.constant 8 : i32
    %246 = vector.broadcast %c8_i32_123 : i32 to vector<32x32xi32>
    %247 = arith.cmpi sge, %218, %246 : vector<32x32xi32>
    %c16_i32_124 = arith.constant 16 : i32
    %248 = vector.broadcast %c16_i32_124 : i32 to vector<32x32xi32>
    %249 = arith.cmpi slt, %218, %248 : vector<32x32xi32>
    %250 = arith.andi %247, %249 : vector<32x32xi1>
    %cst_125 = arith.constant 0.000000e+00 : f32
    %251 = vector.broadcast %cst_125 : f32 to vector<32x32xf32>
    %252 = arith.select %250, %211, %251 : vector<32x32xi1>, vector<32x32xf32>
    %cst_126 = arith.constant 0.000000e+00 : f32
    %253 = vector.broadcast %cst_126 : f32 to vector<32x32xf32>
    %254 = arith.select %250, %214, %253 : vector<32x32xi1>, vector<32x32xf32>
    %cst_127 = arith.constant 0.000000e+00 : f32
    %255 = vector.broadcast %cst_127 : f32 to vector<32x32xf32>
    %256 = arith.select %250, %217, %255 : vector<32x32xi1>, vector<32x32xf32>
    "tpu.trace_start"() <{level = 10 : i32, message = "nd,md->nm"}> : () -> ()
    %cst_128 = arith.constant dense<0.000000e+00> : vector<32x32xf32>
    %257 = tpu.matmul %252, %254, %cst_128 {dimension_numbers = #tpu.dot_dimension_numbers<[1], [1], [0], [0], [0, 0, 1, 0], [], []>} : vector<32x32xf32>, vector<32x32xf32>, vector<32x32xf32> -> vector<32x32xf32>
    "tpu.trace_stop"() : () -> ()
    %cst_129 = arith.constant 0.353553385 : f32
    %258 = vector.broadcast %cst_129 : f32 to vector<32x32xf32>
    %259 = arith.mulf %257, %258 : vector<32x32xf32>
    %260 = arith.addf %259, %0 : vector<32x32xf32>
    %cst_130 = arith.constant dense<0xFF800000> : vector<32xf32>
    %261 = vector.multi_reduction <maximumf>, %260, %cst_130 [1] : vector<32x32xf32> to vector<32xf32>
    %262 = vector.shape_cast %261 : vector<32xf32> to vector<32x1xf32>
    %263 = vector.broadcast %262 : vector<32x1xf32> to vector<32x32xf32>
    %264 = arith.subf %260, %263 : vector<32x32xf32>
    %265 = math.exp %264 : vector<32x32xf32>
    %cst_131 = arith.constant dense<0.000000e+00> : vector<32xf32>
    %266 = vector.multi_reduction <add>, %265, %cst_131 [1] : vector<32x32xf32> to vector<32xf32>
    %267 = vector.shape_cast %266 : vector<32xf32> to vector<32x1xf32>
    %268 = vector.broadcast %267 : vector<32x1xf32> to vector<32x32xf32>
    %269 = arith.divf %265, %268 : vector<32x32xf32>
    %cst_132 = arith.constant dense<0.000000e+00> : vector<32x32xf32>
    %270 = tpu.matmul %269, %256, %cst_132 {dimension_numbers = #tpu.dot_dimension_numbers<[1], [0], [0], [1], [0, 0, 1, 1], [], []>} : vector<32x32xf32>, vector<32x32xf32>, vector<32x32xf32> -> vector<32x32xf32>
    %271 = arith.addf %245, %270 : vector<32x32xf32>
    %c16_i32_133 = arith.constant 16 : i32
    %272 = vector.broadcast %c16_i32_133 : i32 to vector<32x32xi32>
    %273 = arith.cmpi sge, %218, %272 : vector<32x32xi32>
    %c24_i32_134 = arith.constant 24 : i32
    %274 = vector.broadcast %c24_i32_134 : i32 to vector<32x32xi32>
    %275 = arith.cmpi slt, %218, %274 : vector<32x32xi32>
    %276 = arith.andi %273, %275 : vector<32x32xi1>
    %cst_135 = arith.constant 0.000000e+00 : f32
    %277 = vector.broadcast %cst_135 : f32 to vector<32x32xf32>
    %278 = arith.select %276, %211, %277 : vector<32x32xi1>, vector<32x32xf32>
    %cst_136 = arith.constant 0.000000e+00 : f32
    %279 = vector.broadcast %cst_136 : f32 to vector<32x32xf32>
    %280 = arith.select %276, %214, %279 : vector<32x32xi1>, vector<32x32xf32>
    %cst_137 = arith.constant 0.000000e+00 : f32
    %281 = vector.broadcast %cst_137 : f32 to vector<32x32xf32>
    %282 = arith.select %276, %217, %281 : vector<32x32xi1>, vector<32x32xf32>
    "tpu.trace_start"() <{level = 10 : i32, message = "nd,md->nm"}> : () -> ()
    %cst_138 = arith.constant dense<0.000000e+00> : vector<32x32xf32>
    %283 = tpu.matmul %278, %280, %cst_138 {dimension_numbers = #tpu.dot_dimension_numbers<[1], [1], [0], [0], [0, 0, 1, 0], [], []>} : vector<32x32xf32>, vector<32x32xf32>, vector<32x32xf32> -> vector<32x32xf32>
    "tpu.trace_stop"() : () -> ()
    %cst_139 = arith.constant 0.353553385 : f32
    %284 = vector.broadcast %cst_139 : f32 to vector<32x32xf32>
    %285 = arith.mulf %283, %284 : vector<32x32xf32>
    %286 = arith.addf %285, %0 : vector<32x32xf32>
    %cst_140 = arith.constant dense<0xFF800000> : vector<32xf32>
    %287 = vector.multi_reduction <maximumf>, %286, %cst_140 [1] : vector<32x32xf32> to vector<32xf32>
    %288 = vector.shape_cast %287 : vector<32xf32> to vector<32x1xf32>
    %289 = vector.broadcast %288 : vector<32x1xf32> to vector<32x32xf32>
    %290 = arith.subf %286, %289 : vector<32x32xf32>
    %291 = math.exp %290 : vector<32x32xf32>
    %cst_141 = arith.constant dense<0.000000e+00> : vector<32xf32>
    %292 = vector.multi_reduction <add>, %291, %cst_141 [1] : vector<32x32xf32> to vector<32xf32>
    %293 = vector.shape_cast %292 : vector<32xf32> to vector<32x1xf32>
    %294 = vector.broadcast %293 : vector<32x1xf32> to vector<32x32xf32>
    %295 = arith.divf %291, %294 : vector<32x32xf32>
    %cst_142 = arith.constant dense<0.000000e+00> : vector<32x32xf32>
    %296 = tpu.matmul %295, %282, %cst_142 {dimension_numbers = #tpu.dot_dimension_numbers<[1], [0], [0], [1], [0, 0, 1, 1], [], []>} : vector<32x32xf32>, vector<32x32xf32>, vector<32x32xf32> -> vector<32x32xf32>
    %297 = arith.addf %271, %296 : vector<32x32xf32>
    %c24_i32_143 = arith.constant 24 : i32
    %298 = vector.broadcast %c24_i32_143 : i32 to vector<32x32xi32>
    %299 = arith.cmpi sge, %218, %298 : vector<32x32xi32>
    %c32_i32_144 = arith.constant 32 : i32
    %300 = vector.broadcast %c32_i32_144 : i32 to vector<32x32xi32>
    %301 = arith.cmpi slt, %218, %300 : vector<32x32xi32>
    %302 = arith.andi %299, %301 : vector<32x32xi1>
    %cst_145 = arith.constant 0.000000e+00 : f32
    %303 = vector.broadcast %cst_145 : f32 to vector<32x32xf32>
    %304 = arith.select %302, %211, %303 : vector<32x32xi1>, vector<32x32xf32>
    %cst_146 = arith.constant 0.000000e+00 : f32
    %305 = vector.broadcast %cst_146 : f32 to vector<32x32xf32>
    %306 = arith.select %302, %214, %305 : vector<32x32xi1>, vector<32x32xf32>
    %cst_147 = arith.constant 0.000000e+00 : f32
    %307 = vector.broadcast %cst_147 : f32 to vector<32x32xf32>
    %308 = arith.select %302, %217, %307 : vector<32x32xi1>, vector<32x32xf32>
    "tpu.trace_start"() <{level = 10 : i32, message = "nd,md->nm"}> : () -> ()
    %cst_148 = arith.constant dense<0.000000e+00> : vector<32x32xf32>
    %309 = tpu.matmul %304, %306, %cst_148 {dimension_numbers = #tpu.dot_dimension_numbers<[1], [1], [0], [0], [0, 0, 1, 0], [], []>} : vector<32x32xf32>, vector<32x32xf32>, vector<32x32xf32> -> vector<32x32xf32>
    "tpu.trace_stop"() : () -> ()
    %cst_149 = arith.constant 0.353553385 : f32
    %310 = vector.broadcast %cst_149 : f32 to vector<32x32xf32>
    %311 = arith.mulf %309, %310 : vector<32x32xf32>
    %312 = arith.addf %311, %0 : vector<32x32xf32>
    %cst_150 = arith.constant dense<0xFF800000> : vector<32xf32>
    %313 = vector.multi_reduction <maximumf>, %312, %cst_150 [1] : vector<32x32xf32> to vector<32xf32>
    %314 = vector.shape_cast %313 : vector<32xf32> to vector<32x1xf32>
    %315 = vector.broadcast %314 : vector<32x1xf32> to vector<32x32xf32>
    %316 = arith.subf %312, %315 : vector<32x32xf32>
    %317 = math.exp %316 : vector<32x32xf32>
    %cst_151 = arith.constant dense<0.000000e+00> : vector<32xf32>
    %318 = vector.multi_reduction <add>, %317, %cst_151 [1] : vector<32x32xf32> to vector<32xf32>
    %319 = vector.shape_cast %318 : vector<32xf32> to vector<32x1xf32>
    %320 = vector.broadcast %319 : vector<32x1xf32> to vector<32x32xf32>
    %321 = arith.divf %317, %320 : vector<32x32xf32>
    %cst_152 = arith.constant dense<0.000000e+00> : vector<32x32xf32>
    %322 = tpu.matmul %321, %308, %cst_152 {dimension_numbers = #tpu.dot_dimension_numbers<[1], [0], [0], [1], [0, 0, 1, 1], [], []>} : vector<32x32xf32>, vector<32x32xf32>, vector<32x32xf32> -> vector<32x32xf32>
    %323 = arith.addf %297, %322 : vector<32x32xf32>
    %cst_153 = arith.constant dense<0.000000e+00> : vector<32x32xf32>
    %324 = tpu.matmul %323, %207, %cst_153 {dimension_numbers = #tpu.dot_dimension_numbers<[1], [0], [0], [1], [0, 0, 1, 1], [], []>} : vector<32x32xf32>, vector<32x32xf32>, vector<32x32xf32> -> vector<32x32xf32>
    %325 = vector.broadcast %208 : vector<1x32xf32> to vector<32x32xf32>
    %326 = arith.addf %324, %325 : vector<32x32xf32>
    %327 = arith.addf %200, %326 : vector<32x32xf32>
    %c0_154 = arith.constant 0 : index
    %c0_155 = arith.constant 0 : index
    %328 = vector.load %arg30[%c0_154, %c0_155] : memref<1x32xf32, #tpu.memory_space<vmem>>, vector<1x32xf32>
    %c0_156 = arith.constant 0 : index
    %c0_157 = arith.constant 0 : index
    %329 = vector.load %arg31[%c0_156, %c0_157] : memref<1x32xf32, #tpu.memory_space<vmem>>, vector<1x32xf32>
    %cst_158 = arith.constant dense<0.000000e+00> : vector<32xf32>
    %330 = vector.multi_reduction <add>, %327, %cst_158 [1] : vector<32x32xf32> to vector<32xf32>
    %331 = vector.shape_cast %330 : vector<32xf32> to vector<32x1xf32>
    %cst_159 = arith.constant 3.200000e+01 : f32
    %332 = vector.broadcast %cst_159 : f32 to vector<32x1xf32>
    %333 = arith.divf %331, %332 : vector<32x1xf32>
    %334 = vector.broadcast %333 : vector<32x1xf32> to vector<32x32xf32>
    %335 = arith.subf %327, %334 : vector<32x32xf32>
    %336 = arith.mulf %335, %335 : vector<32x32xf32>
    %cst_160 = arith.constant dense<0.000000e+00> : vector<32xf32>
    %337 = vector.multi_reduction <add>, %336, %cst_160 [1] : vector<32x32xf32> to vector<32xf32>
    %338 = vector.shape_cast %337 : vector<32xf32> to vector<32x1xf32>
    %cst_161 = arith.constant 3.200000e+01 : f32
    %339 = vector.broadcast %cst_161 : f32 to vector<32x1xf32>
    %340 = arith.divf %338, %339 : vector<32x1xf32>
    %341 = vector.broadcast %333 : vector<32x1xf32> to vector<32x32xf32>
    %342 = arith.subf %327, %341 : vector<32x32xf32>
    %cst_162 = arith.constant 9.99999974E-6 : f32
    %343 = vector.broadcast %cst_162 : f32 to vector<32x1xf32>
    %344 = arith.addf %340, %343 : vector<32x1xf32>
    %345 = math.rsqrt %344 : vector<32x1xf32>
    %346 = vector.broadcast %345 : vector<32x1xf32> to vector<32x32xf32>
    %347 = arith.mulf %342, %346 : vector<32x32xf32>
    %348 = vector.broadcast %328 : vector<1x32xf32> to vector<32x32xf32>
    %349 = arith.mulf %347, %348 : vector<32x32xf32>
    %350 = vector.broadcast %329 : vector<1x32xf32> to vector<32x32xf32>
    %351 = arith.addf %349, %350 : vector<32x32xf32>
    %c0_163 = arith.constant 0 : index
    %c0_164 = arith.constant 0 : index
    %352 = vector.load %arg32[%c0_163, %c0_164] : memref<32x4xf32, #tpu.memory_space<vmem>>, vector<32x4xf32>
    %c0_165 = arith.constant 0 : index
    %c0_166 = arith.constant 0 : index
    %353 = vector.load %arg33[%c0_165, %c0_166] : memref<1x4xf32, #tpu.memory_space<vmem>>, vector<1x4xf32>
    %cst_167 = arith.constant dense<0.000000e+00> : vector<32x4xf32>
    %354 = tpu.matmul %351, %352, %cst_167 {dimension_numbers = #tpu.dot_dimension_numbers<[1], [0], [0], [1], [0, 0, 1, 1], [], []>} : vector<32x32xf32>, vector<32x4xf32>, vector<32x4xf32> -> vector<32x4xf32>
    %355 = vector.broadcast %353 : vector<1x4xf32> to vector<32x4xf32>
    %356 = arith.addf %354, %355 : vector<32x4xf32>
    %cst_168 = arith.constant dense<0xFF800000> : vector<32xf32>
    %357 = vector.multi_reduction <maximumf>, %356, %cst_168 [1] : vector<32x4xf32> to vector<32xf32>
    %358 = vector.shape_cast %357 : vector<32xf32> to vector<32x1xf32>
    %359 = tpu.iota {dimensions = array<i32: 1>} : vector<32x4xi32>
    %360 = arith.sitofp %359 : vector<32x4xi32> to vector<32x4xf32>
    %361 = vector.broadcast %358 : vector<32x1xf32> to vector<32x4xf32>
    %362 = arith.cmpf oge, %356, %361 : vector<32x4xf32>
    %cst_169 = arith.constant 4.000000e+00 : f32
    %363 = vector.broadcast %cst_169 : f32 to vector<32x4xf32>
    %364 = arith.select %362, %360, %363 : vector<32x4xi1>, vector<32x4xf32>
    %cst_170 = arith.constant dense<0x7F800000> : vector<32xf32>
    %365 = vector.multi_reduction <minimumf>, %364, %cst_170 [1] : vector<32x4xf32> to vector<32xf32>
    %366 = vector.shape_cast %365 : vector<32xf32> to vector<32x1xf32>
    %cst_171 = arith.constant 0.000000e+00 : f32
    %367 = vector.broadcast %cst_171 : f32 to vector<32x32xf32>
    %c0_172 = arith.constant 0 : index
    %c0_173 = arith.constant 0 : index
    %c0_174 = arith.constant 0 : index
    %368 = vector.load %arg34[%c0_172, %c0_173, %c0_174] : memref<4x32x64xf32, #tpu.memory_space<vmem>>, vector<1x32x64xf32>
    %369 = vector.shape_cast %368 : vector<1x32x64xf32> to vector<32x64xf32>
    %cst_175 = arith.constant dense<0.000000e+00> : vector<32x64xf32>
    %370 = tpu.matmul %351, %369, %cst_175 {dimension_numbers = #tpu.dot_dimension_numbers<[1], [0], [0], [1], [0, 0, 1, 1], [], []>} : vector<32x32xf32>, vector<32x64xf32>, vector<32x64xf32> -> vector<32x64xf32>
    %c0_176 = arith.constant 0 : index
    %c0_177 = arith.constant 0 : index
    %c0_178 = arith.constant 0 : index
    %371 = vector.load %arg35[%c0_176, %c0_177, %c0_178] : memref<4x1x64xf32, #tpu.memory_space<vmem>>, vector<1x1x64xf32>
    %372 = vector.shape_cast %371 : vector<1x1x64xf32> to vector<1x64xf32>
    %373 = vector.broadcast %372 : vector<1x64xf32> to vector<32x64xf32>
    %374 = arith.addf %370, %373 : vector<32x64xf32>
    %cst_179 = arith.constant 5.000000e-01 : f32
    %375 = vector.broadcast %cst_179 : f32 to vector<32x64xf32>
    %376 = arith.mulf %375, %374 : vector<32x64xf32>
    %cst_180 = arith.constant 0.707106769 : f32
    %377 = vector.broadcast %cst_180 : f32 to vector<32x64xf32>
    %378 = arith.mulf %374, %377 : vector<32x64xf32>
    %379 = math.absf %378 : vector<32x64xf32>
    %cst_181 = arith.constant 0.327591091 : f32
    %380 = vector.broadcast %cst_181 : f32 to vector<32x64xf32>
    %381 = arith.mulf %380, %379 : vector<32x64xf32>
    %cst_182 = arith.constant 1.000000e+00 : f32
    %382 = vector.broadcast %cst_182 : f32 to vector<32x64xf32>
    %383 = arith.addf %382, %381 : vector<32x64xf32>
    %cst_183 = arith.constant 1.000000e+00 : f32
    %384 = vector.broadcast %cst_183 : f32 to vector<32x64xf32>
    %385 = arith.divf %384, %383 : vector<32x64xf32>
    %cst_184 = arith.constant 1.06140542 : f32
    %386 = vector.broadcast %cst_184 : f32 to vector<32x64xf32>
    %387 = arith.mulf %386, %385 : vector<32x64xf32>
    %cst_185 = arith.constant -1.45315206 : f32
    %388 = vector.broadcast %cst_185 : f32 to vector<32x64xf32>
    %389 = arith.addf %387, %388 : vector<32x64xf32>
    %390 = arith.mulf %389, %385 : vector<32x64xf32>
    %cst_186 = arith.constant 1.42141378 : f32
    %391 = vector.broadcast %cst_186 : f32 to vector<32x64xf32>
    %392 = arith.addf %390, %391 : vector<32x64xf32>
    %393 = arith.mulf %392, %385 : vector<32x64xf32>
    %cst_187 = arith.constant -0.284496725 : f32
    %394 = vector.broadcast %cst_187 : f32 to vector<32x64xf32>
    %395 = arith.addf %393, %394 : vector<32x64xf32>
    %396 = arith.mulf %395, %385 : vector<32x64xf32>
    %cst_188 = arith.constant 0.254829586 : f32
    %397 = vector.broadcast %cst_188 : f32 to vector<32x64xf32>
    %398 = arith.addf %396, %397 : vector<32x64xf32>
    %399 = arith.mulf %398, %385 : vector<32x64xf32>
    %400 = arith.mulf %379, %379 : vector<32x64xf32>
    %cst_189 = arith.constant 0.000000e+00 : f32
    %401 = vector.broadcast %cst_189 : f32 to vector<32x64xf32>
    %402 = arith.subf %401, %400 : vector<32x64xf32>
    %403 = math.exp %402 : vector<32x64xf32>
    %404 = arith.mulf %399, %403 : vector<32x64xf32>
    %cst_190 = arith.constant 1.000000e+00 : f32
    %405 = vector.broadcast %cst_190 : f32 to vector<32x64xf32>
    %406 = arith.subf %405, %404 : vector<32x64xf32>
    %cst_191 = arith.constant 0.000000e+00 : f32
    %407 = vector.broadcast %cst_191 : f32 to vector<32x64xf32>
    %408 = arith.cmpf olt, %378, %407 : vector<32x64xf32>
    %cst_192 = arith.constant 0.000000e+00 : f32
    %409 = vector.broadcast %cst_192 : f32 to vector<32x64xf32>
    %410 = arith.subf %409, %406 : vector<32x64xf32>
    %411 = arith.select %408, %410, %406 : vector<32x64xi1>, vector<32x64xf32>
    %cst_193 = arith.constant 1.000000e+00 : f32
    %412 = vector.broadcast %cst_193 : f32 to vector<32x64xf32>
    %413 = arith.addf %412, %411 : vector<32x64xf32>
    %414 = arith.mulf %376, %413 : vector<32x64xf32>
    %c0_194 = arith.constant 0 : index
    %c0_195 = arith.constant 0 : index
    %c0_196 = arith.constant 0 : index
    %415 = vector.load %arg36[%c0_194, %c0_195, %c0_196] : memref<4x64x32xf32, #tpu.memory_space<vmem>>, vector<1x64x32xf32>
    %416 = vector.shape_cast %415 : vector<1x64x32xf32> to vector<64x32xf32>
    %cst_197 = arith.constant dense<0.000000e+00> : vector<32x32xf32>
    %417 = tpu.matmul %414, %416, %cst_197 {dimension_numbers = #tpu.dot_dimension_numbers<[1], [0], [0], [1], [0, 0, 1, 1], [], []>} : vector<32x64xf32>, vector<64x32xf32>, vector<32x32xf32> -> vector<32x32xf32>
    %c0_198 = arith.constant 0 : index
    %c0_199 = arith.constant 0 : index
    %c0_200 = arith.constant 0 : index
    %418 = vector.load %arg37[%c0_198, %c0_199, %c0_200] : memref<4x1x32xf32, #tpu.memory_space<vmem>>, vector<1x1x32xf32>
    %419 = vector.shape_cast %418 : vector<1x1x32xf32> to vector<1x32xf32>
    %420 = vector.broadcast %419 : vector<1x32xf32> to vector<32x32xf32>
    %421 = arith.addf %417, %420 : vector<32x32xf32>
    %cst_201 = arith.constant 0.000000e+00 : f32
    %422 = vector.broadcast %cst_201 : f32 to vector<32x1xf32>
    %423 = arith.cmpf oeq, %366, %422 : vector<32x1xf32>
    %cst_202 = arith.constant 0.000000e+00 : f32
    %424 = vector.shape_cast %423 : vector<32x1xi1> to vector<32x1xi1>
    %425 = vector.broadcast %424 : vector<32x1xi1> to vector<32x32xi1>
    %426 = vector.broadcast %cst_202 : f32 to vector<32x32xf32>
    %427 = arith.select %425, %421, %426 : vector<32x32xi1>, vector<32x32xf32>
    %428 = arith.addf %367, %427 : vector<32x32xf32>
    %c1 = arith.constant 1 : index
    %c0_203 = arith.constant 0 : index
    %c0_204 = arith.constant 0 : index
    %429 = vector.load %arg34[%c1, %c0_203, %c0_204] : memref<4x32x64xf32, #tpu.memory_space<vmem>>, vector<1x32x64xf32>
    %430 = vector.shape_cast %429 : vector<1x32x64xf32> to vector<32x64xf32>
    %cst_205 = arith.constant dense<0.000000e+00> : vector<32x64xf32>
    %431 = tpu.matmul %351, %430, %cst_205 {dimension_numbers = #tpu.dot_dimension_numbers<[1], [0], [0], [1], [0, 0, 1, 1], [], []>} : vector<32x32xf32>, vector<32x64xf32>, vector<32x64xf32> -> vector<32x64xf32>
    %c1_206 = arith.constant 1 : index
    %c0_207 = arith.constant 0 : index
    %c0_208 = arith.constant 0 : index
    %432 = vector.load %arg35[%c1_206, %c0_207, %c0_208] : memref<4x1x64xf32, #tpu.memory_space<vmem>>, vector<1x1x64xf32>
    %433 = vector.shape_cast %432 : vector<1x1x64xf32> to vector<1x64xf32>
    %434 = vector.broadcast %433 : vector<1x64xf32> to vector<32x64xf32>
    %435 = arith.addf %431, %434 : vector<32x64xf32>
    %cst_209 = arith.constant 5.000000e-01 : f32
    %436 = vector.broadcast %cst_209 : f32 to vector<32x64xf32>
    %437 = arith.mulf %436, %435 : vector<32x64xf32>
    %cst_210 = arith.constant 0.707106769 : f32
    %438 = vector.broadcast %cst_210 : f32 to vector<32x64xf32>
    %439 = arith.mulf %435, %438 : vector<32x64xf32>
    %440 = math.absf %439 : vector<32x64xf32>
    %cst_211 = arith.constant 0.327591091 : f32
    %441 = vector.broadcast %cst_211 : f32 to vector<32x64xf32>
    %442 = arith.mulf %441, %440 : vector<32x64xf32>
    %cst_212 = arith.constant 1.000000e+00 : f32
    %443 = vector.broadcast %cst_212 : f32 to vector<32x64xf32>
    %444 = arith.addf %443, %442 : vector<32x64xf32>
    %cst_213 = arith.constant 1.000000e+00 : f32
    %445 = vector.broadcast %cst_213 : f32 to vector<32x64xf32>
    %446 = arith.divf %445, %444 : vector<32x64xf32>
    %cst_214 = arith.constant 1.06140542 : f32
    %447 = vector.broadcast %cst_214 : f32 to vector<32x64xf32>
    %448 = arith.mulf %447, %446 : vector<32x64xf32>
    %cst_215 = arith.constant -1.45315206 : f32
    %449 = vector.broadcast %cst_215 : f32 to vector<32x64xf32>
    %450 = arith.addf %448, %449 : vector<32x64xf32>
    %451 = arith.mulf %450, %446 : vector<32x64xf32>
    %cst_216 = arith.constant 1.42141378 : f32
    %452 = vector.broadcast %cst_216 : f32 to vector<32x64xf32>
    %453 = arith.addf %451, %452 : vector<32x64xf32>
    %454 = arith.mulf %453, %446 : vector<32x64xf32>
    %cst_217 = arith.constant -0.284496725 : f32
    %455 = vector.broadcast %cst_217 : f32 to vector<32x64xf32>
    %456 = arith.addf %454, %455 : vector<32x64xf32>
    %457 = arith.mulf %456, %446 : vector<32x64xf32>
    %cst_218 = arith.constant 0.254829586 : f32
    %458 = vector.broadcast %cst_218 : f32 to vector<32x64xf32>
    %459 = arith.addf %457, %458 : vector<32x64xf32>
    %460 = arith.mulf %459, %446 : vector<32x64xf32>
    %461 = arith.mulf %440, %440 : vector<32x64xf32>
    %cst_219 = arith.constant 0.000000e+00 : f32
    %462 = vector.broadcast %cst_219 : f32 to vector<32x64xf32>
    %463 = arith.subf %462, %461 : vector<32x64xf32>
    %464 = math.exp %463 : vector<32x64xf32>
    %465 = arith.mulf %460, %464 : vector<32x64xf32>
    %cst_220 = arith.constant 1.000000e+00 : f32
    %466 = vector.broadcast %cst_220 : f32 to vector<32x64xf32>
    %467 = arith.subf %466, %465 : vector<32x64xf32>
    %cst_221 = arith.constant 0.000000e+00 : f32
    %468 = vector.broadcast %cst_221 : f32 to vector<32x64xf32>
    %469 = arith.cmpf olt, %439, %468 : vector<32x64xf32>
    %cst_222 = arith.constant 0.000000e+00 : f32
    %470 = vector.broadcast %cst_222 : f32 to vector<32x64xf32>
    %471 = arith.subf %470, %467 : vector<32x64xf32>
    %472 = arith.select %469, %471, %467 : vector<32x64xi1>, vector<32x64xf32>
    %cst_223 = arith.constant 1.000000e+00 : f32
    %473 = vector.broadcast %cst_223 : f32 to vector<32x64xf32>
    %474 = arith.addf %473, %472 : vector<32x64xf32>
    %475 = arith.mulf %437, %474 : vector<32x64xf32>
    %c1_224 = arith.constant 1 : index
    %c0_225 = arith.constant 0 : index
    %c0_226 = arith.constant 0 : index
    %476 = vector.load %arg36[%c1_224, %c0_225, %c0_226] : memref<4x64x32xf32, #tpu.memory_space<vmem>>, vector<1x64x32xf32>
    %477 = vector.shape_cast %476 : vector<1x64x32xf32> to vector<64x32xf32>
    %cst_227 = arith.constant dense<0.000000e+00> : vector<32x32xf32>
    %478 = tpu.matmul %475, %477, %cst_227 {dimension_numbers = #tpu.dot_dimension_numbers<[1], [0], [0], [1], [0, 0, 1, 1], [], []>} : vector<32x64xf32>, vector<64x32xf32>, vector<32x32xf32> -> vector<32x32xf32>
    %c1_228 = arith.constant 1 : index
    %c0_229 = arith.constant 0 : index
    %c0_230 = arith.constant 0 : index
    %479 = vector.load %arg37[%c1_228, %c0_229, %c0_230] : memref<4x1x32xf32, #tpu.memory_space<vmem>>, vector<1x1x32xf32>
    %480 = vector.shape_cast %479 : vector<1x1x32xf32> to vector<1x32xf32>
    %481 = vector.broadcast %480 : vector<1x32xf32> to vector<32x32xf32>
    %482 = arith.addf %478, %481 : vector<32x32xf32>
    %cst_231 = arith.constant 1.000000e+00 : f32
    %483 = vector.broadcast %cst_231 : f32 to vector<32x1xf32>
    %484 = arith.cmpf oeq, %366, %483 : vector<32x1xf32>
    %cst_232 = arith.constant 0.000000e+00 : f32
    %485 = vector.shape_cast %484 : vector<32x1xi1> to vector<32x1xi1>
    %486 = vector.broadcast %485 : vector<32x1xi1> to vector<32x32xi1>
    %487 = vector.broadcast %cst_232 : f32 to vector<32x32xf32>
    %488 = arith.select %486, %482, %487 : vector<32x32xi1>, vector<32x32xf32>
    %489 = arith.addf %428, %488 : vector<32x32xf32>
    %c2 = arith.constant 2 : index
    %c0_233 = arith.constant 0 : index
    %c0_234 = arith.constant 0 : index
    %490 = vector.load %arg34[%c2, %c0_233, %c0_234] : memref<4x32x64xf32, #tpu.memory_space<vmem>>, vector<1x32x64xf32>
    %491 = vector.shape_cast %490 : vector<1x32x64xf32> to vector<32x64xf32>
    %cst_235 = arith.constant dense<0.000000e+00> : vector<32x64xf32>
    %492 = tpu.matmul %351, %491, %cst_235 {dimension_numbers = #tpu.dot_dimension_numbers<[1], [0], [0], [1], [0, 0, 1, 1], [], []>} : vector<32x32xf32>, vector<32x64xf32>, vector<32x64xf32> -> vector<32x64xf32>
    %c2_236 = arith.constant 2 : index
    %c0_237 = arith.constant 0 : index
    %c0_238 = arith.constant 0 : index
    %493 = vector.load %arg35[%c2_236, %c0_237, %c0_238] : memref<4x1x64xf32, #tpu.memory_space<vmem>>, vector<1x1x64xf32>
    %494 = vector.shape_cast %493 : vector<1x1x64xf32> to vector<1x64xf32>
    %495 = vector.broadcast %494 : vector<1x64xf32> to vector<32x64xf32>
    %496 = arith.addf %492, %495 : vector<32x64xf32>
    %cst_239 = arith.constant 5.000000e-01 : f32
    %497 = vector.broadcast %cst_239 : f32 to vector<32x64xf32>
    %498 = arith.mulf %497, %496 : vector<32x64xf32>
    %cst_240 = arith.constant 0.707106769 : f32
    %499 = vector.broadcast %cst_240 : f32 to vector<32x64xf32>
    %500 = arith.mulf %496, %499 : vector<32x64xf32>
    %501 = math.absf %500 : vector<32x64xf32>
    %cst_241 = arith.constant 0.327591091 : f32
    %502 = vector.broadcast %cst_241 : f32 to vector<32x64xf32>
    %503 = arith.mulf %502, %501 : vector<32x64xf32>
    %cst_242 = arith.constant 1.000000e+00 : f32
    %504 = vector.broadcast %cst_242 : f32 to vector<32x64xf32>
    %505 = arith.addf %504, %503 : vector<32x64xf32>
    %cst_243 = arith.constant 1.000000e+00 : f32
    %506 = vector.broadcast %cst_243 : f32 to vector<32x64xf32>
    %507 = arith.divf %506, %505 : vector<32x64xf32>
    %cst_244 = arith.constant 1.06140542 : f32
    %508 = vector.broadcast %cst_244 : f32 to vector<32x64xf32>
    %509 = arith.mulf %508, %507 : vector<32x64xf32>
    %cst_245 = arith.constant -1.45315206 : f32
    %510 = vector.broadcast %cst_245 : f32 to vector<32x64xf32>
    %511 = arith.addf %509, %510 : vector<32x64xf32>
    %512 = arith.mulf %511, %507 : vector<32x64xf32>
    %cst_246 = arith.constant 1.42141378 : f32
    %513 = vector.broadcast %cst_246 : f32 to vector<32x64xf32>
    %514 = arith.addf %512, %513 : vector<32x64xf32>
    %515 = arith.mulf %514, %507 : vector<32x64xf32>
    %cst_247 = arith.constant -0.284496725 : f32
    %516 = vector.broadcast %cst_247 : f32 to vector<32x64xf32>
    %517 = arith.addf %515, %516 : vector<32x64xf32>
    %518 = arith.mulf %517, %507 : vector<32x64xf32>
    %cst_248 = arith.constant 0.254829586 : f32
    %519 = vector.broadcast %cst_248 : f32 to vector<32x64xf32>
    %520 = arith.addf %518, %519 : vector<32x64xf32>
    %521 = arith.mulf %520, %507 : vector<32x64xf32>
    %522 = arith.mulf %501, %501 : vector<32x64xf32>
    %cst_249 = arith.constant 0.000000e+00 : f32
    %523 = vector.broadcast %cst_249 : f32 to vector<32x64xf32>
    %524 = arith.subf %523, %522 : vector<32x64xf32>
    %525 = math.exp %524 : vector<32x64xf32>
    %526 = arith.mulf %521, %525 : vector<32x64xf32>
    %cst_250 = arith.constant 1.000000e+00 : f32
    %527 = vector.broadcast %cst_250 : f32 to vector<32x64xf32>
    %528 = arith.subf %527, %526 : vector<32x64xf32>
    %cst_251 = arith.constant 0.000000e+00 : f32
    %529 = vector.broadcast %cst_251 : f32 to vector<32x64xf32>
    %530 = arith.cmpf olt, %500, %529 : vector<32x64xf32>
    %cst_252 = arith.constant 0.000000e+00 : f32
    %531 = vector.broadcast %cst_252 : f32 to vector<32x64xf32>
    %532 = arith.subf %531, %528 : vector<32x64xf32>
    %533 = arith.select %530, %532, %528 : vector<32x64xi1>, vector<32x64xf32>
    %cst_253 = arith.constant 1.000000e+00 : f32
    %534 = vector.broadcast %cst_253 : f32 to vector<32x64xf32>
    %535 = arith.addf %534, %533 : vector<32x64xf32>
    %536 = arith.mulf %498, %535 : vector<32x64xf32>
    %c2_254 = arith.constant 2 : index
    %c0_255 = arith.constant 0 : index
    %c0_256 = arith.constant 0 : index
    %537 = vector.load %arg36[%c2_254, %c0_255, %c0_256] : memref<4x64x32xf32, #tpu.memory_space<vmem>>, vector<1x64x32xf32>
    %538 = vector.shape_cast %537 : vector<1x64x32xf32> to vector<64x32xf32>
    %cst_257 = arith.constant dense<0.000000e+00> : vector<32x32xf32>
    %539 = tpu.matmul %536, %538, %cst_257 {dimension_numbers = #tpu.dot_dimension_numbers<[1], [0], [0], [1], [0, 0, 1, 1], [], []>} : vector<32x64xf32>, vector<64x32xf32>, vector<32x32xf32> -> vector<32x32xf32>
    %c2_258 = arith.constant 2 : index
    %c0_259 = arith.constant 0 : index
    %c0_260 = arith.constant 0 : index
    %540 = vector.load %arg37[%c2_258, %c0_259, %c0_260] : memref<4x1x32xf32, #tpu.memory_space<vmem>>, vector<1x1x32xf32>
    %541 = vector.shape_cast %540 : vector<1x1x32xf32> to vector<1x32xf32>
    %542 = vector.broadcast %541 : vector<1x32xf32> to vector<32x32xf32>
    %543 = arith.addf %539, %542 : vector<32x32xf32>
    %cst_261 = arith.constant 2.000000e+00 : f32
    %544 = vector.broadcast %cst_261 : f32 to vector<32x1xf32>
    %545 = arith.cmpf oeq, %366, %544 : vector<32x1xf32>
    %cst_262 = arith.constant 0.000000e+00 : f32
    %546 = vector.shape_cast %545 : vector<32x1xi1> to vector<32x1xi1>
    %547 = vector.broadcast %546 : vector<32x1xi1> to vector<32x32xi1>
    %548 = vector.broadcast %cst_262 : f32 to vector<32x32xf32>
    %549 = arith.select %547, %543, %548 : vector<32x32xi1>, vector<32x32xf32>
    %550 = arith.addf %489, %549 : vector<32x32xf32>
    %c3 = arith.constant 3 : index
    %c0_263 = arith.constant 0 : index
    %c0_264 = arith.constant 0 : index
    %551 = vector.load %arg34[%c3, %c0_263, %c0_264] : memref<4x32x64xf32, #tpu.memory_space<vmem>>, vector<1x32x64xf32>
    %552 = vector.shape_cast %551 : vector<1x32x64xf32> to vector<32x64xf32>
    %cst_265 = arith.constant dense<0.000000e+00> : vector<32x64xf32>
    %553 = tpu.matmul %351, %552, %cst_265 {dimension_numbers = #tpu.dot_dimension_numbers<[1], [0], [0], [1], [0, 0, 1, 1], [], []>} : vector<32x32xf32>, vector<32x64xf32>, vector<32x64xf32> -> vector<32x64xf32>
    %c3_266 = arith.constant 3 : index
    %c0_267 = arith.constant 0 : index
    %c0_268 = arith.constant 0 : index
    %554 = vector.load %arg35[%c3_266, %c0_267, %c0_268] : memref<4x1x64xf32, #tpu.memory_space<vmem>>, vector<1x1x64xf32>
    %555 = vector.shape_cast %554 : vector<1x1x64xf32> to vector<1x64xf32>
    %556 = vector.broadcast %555 : vector<1x64xf32> to vector<32x64xf32>
    %557 = arith.addf %553, %556 : vector<32x64xf32>
    %cst_269 = arith.constant 5.000000e-01 : f32
    %558 = vector.broadcast %cst_269 : f32 to vector<32x64xf32>
    %559 = arith.mulf %558, %557 : vector<32x64xf32>
    %cst_270 = arith.constant 0.707106769 : f32
    %560 = vector.broadcast %cst_270 : f32 to vector<32x64xf32>
    %561 = arith.mulf %557, %560 : vector<32x64xf32>
    %562 = math.absf %561 : vector<32x64xf32>
    %cst_271 = arith.constant 0.327591091 : f32
    %563 = vector.broadcast %cst_271 : f32 to vector<32x64xf32>
    %564 = arith.mulf %563, %562 : vector<32x64xf32>
    %cst_272 = arith.constant 1.000000e+00 : f32
    %565 = vector.broadcast %cst_272 : f32 to vector<32x64xf32>
    %566 = arith.addf %565, %564 : vector<32x64xf32>
    %cst_273 = arith.constant 1.000000e+00 : f32
    %567 = vector.broadcast %cst_273 : f32 to vector<32x64xf32>
    %568 = arith.divf %567, %566 : vector<32x64xf32>
    %cst_274 = arith.constant 1.06140542 : f32
    %569 = vector.broadcast %cst_274 : f32 to vector<32x64xf32>
    %570 = arith.mulf %569, %568 : vector<32x64xf32>
    %cst_275 = arith.constant -1.45315206 : f32
    %571 = vector.broadcast %cst_275 : f32 to vector<32x64xf32>
    %572 = arith.addf %570, %571 : vector<32x64xf32>
    %573 = arith.mulf %572, %568 : vector<32x64xf32>
    %cst_276 = arith.constant 1.42141378 : f32
    %574 = vector.broadcast %cst_276 : f32 to vector<32x64xf32>
    %575 = arith.addf %573, %574 : vector<32x64xf32>
    %576 = arith.mulf %575, %568 : vector<32x64xf32>
    %cst_277 = arith.constant -0.284496725 : f32
    %577 = vector.broadcast %cst_277 : f32 to vector<32x64xf32>
    %578 = arith.addf %576, %577 : vector<32x64xf32>
    %579 = arith.mulf %578, %568 : vector<32x64xf32>
    %cst_278 = arith.constant 0.254829586 : f32
    %580 = vector.broadcast %cst_278 : f32 to vector<32x64xf32>
    %581 = arith.addf %579, %580 : vector<32x64xf32>
    %582 = arith.mulf %581, %568 : vector<32x64xf32>
    %583 = arith.mulf %562, %562 : vector<32x64xf32>
    %cst_279 = arith.constant 0.000000e+00 : f32
    %584 = vector.broadcast %cst_279 : f32 to vector<32x64xf32>
    %585 = arith.subf %584, %583 : vector<32x64xf32>
    %586 = math.exp %585 : vector<32x64xf32>
    %587 = arith.mulf %582, %586 : vector<32x64xf32>
    %cst_280 = arith.constant 1.000000e+00 : f32
    %588 = vector.broadcast %cst_280 : f32 to vector<32x64xf32>
    %589 = arith.subf %588, %587 : vector<32x64xf32>
    %cst_281 = arith.constant 0.000000e+00 : f32
    %590 = vector.broadcast %cst_281 : f32 to vector<32x64xf32>
    %591 = arith.cmpf olt, %561, %590 : vector<32x64xf32>
    %cst_282 = arith.constant 0.000000e+00 : f32
    %592 = vector.broadcast %cst_282 : f32 to vector<32x64xf32>
    %593 = arith.subf %592, %589 : vector<32x64xf32>
    %594 = arith.select %591, %593, %589 : vector<32x64xi1>, vector<32x64xf32>
    %cst_283 = arith.constant 1.000000e+00 : f32
    %595 = vector.broadcast %cst_283 : f32 to vector<32x64xf32>
    %596 = arith.addf %595, %594 : vector<32x64xf32>
    %597 = arith.mulf %559, %596 : vector<32x64xf32>
    %c3_284 = arith.constant 3 : index
    %c0_285 = arith.constant 0 : index
    %c0_286 = arith.constant 0 : index
    %598 = vector.load %arg36[%c3_284, %c0_285, %c0_286] : memref<4x64x32xf32, #tpu.memory_space<vmem>>, vector<1x64x32xf32>
    %599 = vector.shape_cast %598 : vector<1x64x32xf32> to vector<64x32xf32>
    %cst_287 = arith.constant dense<0.000000e+00> : vector<32x32xf32>
    %600 = tpu.matmul %597, %599, %cst_287 {dimension_numbers = #tpu.dot_dimension_numbers<[1], [0], [0], [1], [0, 0, 1, 1], [], []>} : vector<32x64xf32>, vector<64x32xf32>, vector<32x32xf32> -> vector<32x32xf32>
    %c3_288 = arith.constant 3 : index
    %c0_289 = arith.constant 0 : index
    %c0_290 = arith.constant 0 : index
    %601 = vector.load %arg37[%c3_288, %c0_289, %c0_290] : memref<4x1x32xf32, #tpu.memory_space<vmem>>, vector<1x1x32xf32>
    %602 = vector.shape_cast %601 : vector<1x1x32xf32> to vector<1x32xf32>
    %603 = vector.broadcast %602 : vector<1x32xf32> to vector<32x32xf32>
    %604 = arith.addf %600, %603 : vector<32x32xf32>
    %cst_291 = arith.constant 3.000000e+00 : f32
    %605 = vector.broadcast %cst_291 : f32 to vector<32x1xf32>
    %606 = arith.cmpf oeq, %366, %605 : vector<32x1xf32>
    %cst_292 = arith.constant 0.000000e+00 : f32
    %607 = vector.shape_cast %606 : vector<32x1xi1> to vector<32x1xi1>
    %608 = vector.broadcast %607 : vector<32x1xi1> to vector<32x32xi1>
    %609 = vector.broadcast %cst_292 : f32 to vector<32x32xf32>
    %610 = arith.select %608, %604, %609 : vector<32x32xi1>, vector<32x32xf32>
    %611 = arith.addf %550, %610 : vector<32x32xf32>
    %612 = arith.addf %351, %611 : vector<32x32xf32>
    %c0_293 = arith.constant 0 : index
    %c0_294 = arith.constant 0 : index
    %613 = vector.load %arg38[%c0_293, %c0_294] : memref<1x32xf32, #tpu.memory_space<vmem>>, vector<1x32xf32>
    %c0_295 = arith.constant 0 : index
    %c0_296 = arith.constant 0 : index
    %614 = vector.load %arg39[%c0_295, %c0_296] : memref<1x32xf32, #tpu.memory_space<vmem>>, vector<1x32xf32>
    %cst_297 = arith.constant dense<0.000000e+00> : vector<32xf32>
    %615 = vector.multi_reduction <add>, %612, %cst_297 [1] : vector<32x32xf32> to vector<32xf32>
    %616 = vector.shape_cast %615 : vector<32xf32> to vector<32x1xf32>
    %cst_298 = arith.constant 3.200000e+01 : f32
    %617 = vector.broadcast %cst_298 : f32 to vector<32x1xf32>
    %618 = arith.divf %616, %617 : vector<32x1xf32>
    %619 = vector.broadcast %618 : vector<32x1xf32> to vector<32x32xf32>
    %620 = arith.subf %612, %619 : vector<32x32xf32>
    %621 = arith.mulf %620, %620 : vector<32x32xf32>
    %cst_299 = arith.constant dense<0.000000e+00> : vector<32xf32>
    %622 = vector.multi_reduction <add>, %621, %cst_299 [1] : vector<32x32xf32> to vector<32xf32>
    %623 = vector.shape_cast %622 : vector<32xf32> to vector<32x1xf32>
    %cst_300 = arith.constant 3.200000e+01 : f32
    %624 = vector.broadcast %cst_300 : f32 to vector<32x1xf32>
    %625 = arith.divf %623, %624 : vector<32x1xf32>
    %626 = vector.broadcast %618 : vector<32x1xf32> to vector<32x32xf32>
    %627 = arith.subf %612, %626 : vector<32x32xf32>
    %cst_301 = arith.constant 9.99999974E-6 : f32
    %628 = vector.broadcast %cst_301 : f32 to vector<32x1xf32>
    %629 = arith.addf %625, %628 : vector<32x1xf32>
    %630 = math.rsqrt %629 : vector<32x1xf32>
    %631 = vector.broadcast %630 : vector<32x1xf32> to vector<32x32xf32>
    %632 = arith.mulf %627, %631 : vector<32x32xf32>
    %633 = vector.broadcast %613 : vector<1x32xf32> to vector<32x32xf32>
    %634 = arith.mulf %632, %633 : vector<32x32xf32>
    %635 = vector.broadcast %614 : vector<1x32xf32> to vector<32x32xf32>
    %636 = arith.addf %634, %635 : vector<32x32xf32>
    %c0_302 = arith.constant 0 : index
    %c0_303 = arith.constant 0 : index
    %637 = vector.load %arg40[%c0_302, %c0_303] : memref<32x64xf32, #tpu.memory_space<vmem>>, vector<32x64xf32>
    %cst_304 = arith.constant dense<0.000000e+00> : vector<32x64xf32>
    %638 = tpu.matmul %636, %637, %cst_304 {dimension_numbers = #tpu.dot_dimension_numbers<[1], [0], [0], [1], [0, 0, 1, 1], [], []>} : vector<32x32xf32>, vector<32x64xf32>, vector<32x64xf32> -> vector<32x64xf32>
    %c0_305 = arith.constant 0 : index
    %c0_306 = arith.constant 0 : index
    %639 = vector.load %arg41[%c0_305, %c0_306] : memref<1x64xf32, #tpu.memory_space<vmem>>, vector<1x64xf32>
    %640 = vector.broadcast %639 : vector<1x64xf32> to vector<32x64xf32>
    %641 = arith.addf %638, %640 : vector<32x64xf32>
    %cst_307 = arith.constant dense<0xFF800000> : vector<32xf32>
    %642 = vector.multi_reduction <maximumf>, %641, %cst_307 [1] : vector<32x64xf32> to vector<32xf32>
    %643 = vector.shape_cast %642 : vector<32xf32> to vector<32x1xf32>
    %644 = vector.broadcast %643 : vector<32x1xf32> to vector<32x64xf32>
    %645 = arith.subf %641, %644 : vector<32x64xf32>
    %646 = math.exp %645 : vector<32x64xf32>
    %cst_308 = arith.constant dense<0.000000e+00> : vector<32xf32>
    %647 = vector.multi_reduction <add>, %646, %cst_308 [1] : vector<32x64xf32> to vector<32xf32>
    %648 = vector.shape_cast %647 : vector<32xf32> to vector<32x1xf32>
    %649 = math.log %648 : vector<32x1xf32>
    %650 = arith.addf %643, %649 : vector<32x1xf32>
    %651 = vector.broadcast %650 : vector<32x1xf32> to vector<32x64xf32>
    %652 = arith.subf %641, %651 : vector<32x64xf32>
    %c0_309 = arith.constant 0 : index
    %c0_310 = arith.constant 0 : index
    %653 = vector.load %arg2[%c0_309, %c0_310] : memref<32x1xi32, #tpu.memory_space<vmem>>, vector<32x1xi32>
    %654 = vector.broadcast %653 : vector<32x1xi32> to vector<32x64xi32>
    %655 = arith.cmpi eq, %1, %654 : vector<32x64xi32>
    %656 = arith.extui %655 : vector<32x64xi1> to vector<32x64xi32>
    %657 = arith.sitofp %656 : vector<32x64xi32> to vector<32x64xf32>
    %658 = arith.mulf %657, %652 : vector<32x64xf32>
    %659 = vector.shape_cast %658 : vector<32x64xf32> to vector<1x32x64xf32>
    %cst_311 = arith.constant dense<0.000000e+00> : vector<1xf32>
    %660 = vector.multi_reduction <add>, %659, %cst_311 [1, 2] : vector<1x32x64xf32> to vector<1xf32>
    %661 = vector.shape_cast %660 : vector<1xf32> to vector<1x1x1xf32>
    %662 = vector.extract %661[0, 0, 0] : f32 from vector<1x1x1xf32>
    %663 = vector.broadcast %662 : f32 to vector<1x1xf32>
    %cst_312 = arith.constant 0.000000e+00 : f32
    %664 = vector.broadcast %cst_312 : f32 to vector<1x1xf32>
    %665 = arith.subf %664, %663 : vector<1x1xf32>
    %c0_313 = arith.constant 0 : index
    %c0_314 = arith.constant 0 : index
    %666 = vector.load %arg42[%c0_313, %c0_314] : memref<1x1xf32, #tpu.memory_space<vmem>>, vector<1x1xf32>
    tpu.vector_store %arg42[%c0_313, %c0_314], %665 {strides = array<i32>} : memref<1x1xf32, #tpu.memory_space<vmem>>, vector<1x1xf32>,
    return
  }
  func.func @transform_0(%arg0: i32) -> (i32, i32) {
    %c0_i32 = arith.constant 0 : i32
    %c0_i32_0 = arith.constant 0 : i32
    %c0_i32_1 = arith.constant 0 : i32
    return %c0_i32, %c0_i32_0 : i32, i32
  }
  func.func @transform_1(%arg0: i32) -> (i32, i32) {
    %c0_i32 = arith.constant 0 : i32
    %c0_i32_0 = arith.constant 0 : i32
    %c0_i32_1 = arith.constant 0 : i32
    return %c0_i32, %c0_i32_0 : i32, i32
  }
  func.func @transform_2(%arg0: i32) -> (i32, i32) {
    %c0_i32 = arith.constant 0 : i32
    %c0_i32_0 = arith.constant 0 : i32
    %c0_i32_1 = arith.constant 0 : i32
    return %c0_i32, %c0_i32_0 : i32, i32
  }
  func.func @transform_3(%arg0: i32) -> (i32, i32) {
    %c0_i32 = arith.constant 0 : i32
    %c0_i32_0 = arith.constant 0 : i32
    %c0_i32_1 = arith.constant 0 : i32
    return %c0_i32, %c0_i32_0 : i32, i32
  }
  func.func @transform_4(%arg0: i32) -> (i32, i32) {
    %c0_i32 = arith.constant 0 : i32
    %c0_i32_0 = arith.constant 0 : i32
    %c0_i32_1 = arith.constant 0 : i32
    return %c0_i32, %c0_i32_0 : i32, i32
  }
  func.func @transform_5(%arg0: i32) -> (i32, i32) {
    %c0_i32 = arith.constant 0 : i32
    %c0_i32_0 = arith.constant 0 : i32
    %c0_i32_1 = arith.constant 0 : i32
    return %c0_i32, %c0_i32_0 : i32, i32
  }
  func.func @transform_6(%arg0: i32) -> (i32, i32) {
    %c0_i32 = arith.constant 0 : i32
    %c0_i32_0 = arith.constant 0 : i32
    %c0_i32_1 = arith.constant 0 : i32
    return %c0_i32, %c0_i32_0 : i32, i32
  }
  func.func @transform_7(%arg0: i32) -> (i32, i32) {
    %c0_i32 = arith.constant 0 : i32
    %c0_i32_0 = arith.constant 0 : i32
    %c0_i32_1 = arith.constant 0 : i32
    return %c0_i32, %c0_i32_0 : i32, i32
  }
  func.func @transform_8(%arg0: i32) -> (i32, i32) {
    %c0_i32 = arith.constant 0 : i32
    %c0_i32_0 = arith.constant 0 : i32
    %c0_i32_1 = arith.constant 0 : i32
    return %c0_i32, %c0_i32_0 : i32, i32
  }
  func.func @transform_9(%arg0: i32) -> (i32, i32) {
    %c0_i32 = arith.constant 0 : i32
    %c0_i32_0 = arith.constant 0 : i32
    %c0_i32_1 = arith.constant 0 : i32
    return %c0_i32, %c0_i32_0 : i32, i32
  }
  func.func @transform_10(%arg0: i32) -> (i32, i32) {
    %c0_i32 = arith.constant 0 : i32
    %c0_i32_0 = arith.constant 0 : i32
    %c0_i32_1 = arith.constant 0 : i32
    return %c0_i32, %c0_i32_0 : i32, i32
  }
  func.func @transform_11(%arg0: i32) -> (i32, i32) {
    %c0_i32 = arith.constant 0 : i32
    %c0_i32_0 = arith.constant 0 : i32
    %c0_i32_1 = arith.constant 0 : i32
    return %c0_i32, %c0_i32_0 : i32, i32
  }
  func.func @transform_12(%arg0: i32) -> (i32, i32) {
    %c0_i32 = arith.constant 0 : i32
    %c0_i32_0 = arith.constant 0 : i32
    %c0_i32_1 = arith.constant 0 : i32
    return %c0_i32, %c0_i32_0 : i32, i32
  }
  func.func @transform_13(%arg0: i32) -> (i32, i32) {
    %c0_i32 = arith.constant 0 : i32
    %c0_i32_0 = arith.constant 0 : i32
    %c0_i32_1 = arith.constant 0 : i32
    return %c0_i32, %c0_i32_0 : i32, i32
  }
  func.func @transform_14(%arg0: i32) -> (i32, i32) {
    %c0_i32 = arith.constant 0 : i32
    %c0_i32_0 = arith.constant 0 : i32
    %c0_i32_1 = arith.constant 0 : i32
    return %c0_i32, %c0_i32_0 : i32, i32
  }
  func.func @transform_15(%arg0: i32) -> (i32, i32) {
    %c0_i32 = arith.constant 0 : i32
    %c0_i32_0 = arith.constant 0 : i32
    %c0_i32_1 = arith.constant 0 : i32
    return %c0_i32, %c0_i32_0 : i32, i32
  }
  func.func @transform_16(%arg0: i32) -> (i32, i32) {
    %c0_i32 = arith.constant 0 : i32
    %c0_i32_0 = arith.constant 0 : i32
    %c0_i32_1 = arith.constant 0 : i32
    return %c0_i32, %c0_i32_0 : i32, i32
  }
  func.func @transform_17(%arg0: i32) -> (i32, i32) {
    %c0_i32 = arith.constant 0 : i32
    %c0_i32_0 = arith.constant 0 : i32
    %c0_i32_1 = arith.constant 0 : i32
    return %c0_i32, %c0_i32_0 : i32, i32
  }
  func.func @transform_18(%arg0: i32) -> (i32, i32) {
    %c0_i32 = arith.constant 0 : i32
    %c0_i32_0 = arith.constant 0 : i32
    %c0_i32_1 = arith.constant 0 : i32
    return %c0_i32, %c0_i32_0 : i32, i32
  }
  func.func @transform_19(%arg0: i32) -> (i32, i32) {
    %c0_i32 = arith.constant 0 : i32
    %c0_i32_0 = arith.constant 0 : i32
    %c0_i32_1 = arith.constant 0 : i32
    return %c0_i32, %c0_i32_0 : i32, i32
  }
  func.func @transform_20(%arg0: i32) -> (i32, i32) {
    %c0_i32 = arith.constant 0 : i32
    %c0_i32_0 = arith.constant 0 : i32
    %c0_i32_1 = arith.constant 0 : i32
    return %c0_i32, %c0_i32_0 : i32, i32
  }
  func.func @transform_21(%arg0: i32) -> (i32, i32) {
    %c0_i32 = arith.constant 0 : i32
    %c0_i32_0 = arith.constant 0 : i32
    %c0_i32_1 = arith.constant 0 : i32
    return %c0_i32, %c0_i32_0 : i32, i32
  }
  func.func @transform_22(%arg0: i32) -> (i32, i32) {
    %c0_i32 = arith.constant 0 : i32
    %c0_i32_0 = arith.constant 0 : i32
    %c0_i32_1 = arith.constant 0 : i32
    return %c0_i32, %c0_i32_0 : i32, i32
  }
  func.func @transform_23(%arg0: i32) -> (i32, i32) {
    %c0_i32 = arith.constant 0 : i32
    %c0_i32_0 = arith.constant 0 : i32
    %c0_i32_1 = arith.constant 0 : i32
    return %c0_i32, %c0_i32_0 : i32, i32
  }
  func.func @transform_24(%arg0: i32) -> (i32, i32) {
    %c0_i32 = arith.constant 0 : i32
    %c0_i32_0 = arith.constant 0 : i32
    %c0_i32_1 = arith.constant 0 : i32
    return %c0_i32, %c0_i32_0 : i32, i32
  }
  func.func @transform_25(%arg0: i32) -> (i32, i32) {
    %c0_i32 = arith.constant 0 : i32
    %c0_i32_0 = arith.constant 0 : i32
    %c0_i32_1 = arith.constant 0 : i32
    return %c0_i32, %c0_i32_0 : i32, i32
  }
  func.func @transform_26(%arg0: i32) -> (i32, i32) {
    %c0_i32 = arith.constant 0 : i32
    %c0_i32_0 = arith.constant 0 : i32
    %c0_i32_1 = arith.constant 0 : i32
    return %c0_i32, %c0_i32_0 : i32, i32
  }
  func.func @transform_27(%arg0: i32) -> (i32, i32) {
    %c0_i32 = arith.constant 0 : i32
    %c0_i32_0 = arith.constant 0 : i32
    %c0_i32_1 = arith.constant 0 : i32
    return %c0_i32, %c0_i32_0 : i32, i32
  }
  func.func @transform_28(%arg0: i32) -> (i32, i32) {
    %c0_i32 = arith.constant 0 : i32
    %c0_i32_0 = arith.constant 0 : i32
    %c0_i32_1 = arith.constant 0 : i32
    return %c0_i32, %c0_i32_0 : i32, i32
  }
  func.func @transform_29(%arg0: i32) -> (i32, i32) {
    %c0_i32 = arith.constant 0 : i32
    %c0_i32_0 = arith.constant 0 : i32
    %c0_i32_1 = arith.constant 0 : i32
    return %c0_i32, %c0_i32_0 : i32, i32
  }
  func.func @transform_30(%arg0: i32) -> (i32, i32) {
    %c0_i32 = arith.constant 0 : i32
    %c0_i32_0 = arith.constant 0 : i32
    %c0_i32_1 = arith.constant 0 : i32
    return %c0_i32, %c0_i32_0 : i32, i32
  }
  func.func @transform_31(%arg0: i32) -> (i32, i32) {
    %c0_i32 = arith.constant 0 : i32
    %c0_i32_0 = arith.constant 0 : i32
    %c0_i32_1 = arith.constant 0 : i32
    return %c0_i32, %c0_i32_0 : i32, i32
  }
  func.func @transform_32(%arg0: i32) -> (i32, i32) {
    %c0_i32 = arith.constant 0 : i32
    %c0_i32_0 = arith.constant 0 : i32
    %c0_i32_1 = arith.constant 0 : i32
    return %c0_i32, %c0_i32_0 : i32, i32
  }
  func.func @transform_33(%arg0: i32) -> (i32, i32, i32) {
    %c0_i32 = arith.constant 0 : i32
    %c0_i32_0 = arith.constant 0 : i32
    %c0_i32_1 = arith.constant 0 : i32
    %c0_i32_2 = arith.constant 0 : i32
    return %c0_i32, %c0_i32_0, %c0_i32_1 : i32, i32, i32
  }
  func.func @transform_34(%arg0: i32) -> (i32, i32, i32) {
    %c0_i32 = arith.constant 0 : i32
    %c0_i32_0 = arith.constant 0 : i32
    %c0_i32_1 = arith.constant 0 : i32
    %c0_i32_2 = arith.constant 0 : i32
    return %c0_i32, %c0_i32_0, %c0_i32_1 : i32, i32, i32
  }
  func.func @transform_35(%arg0: i32) -> (i32, i32, i32) {
    %c0_i32 = arith.constant 0 : i32
    %c0_i32_0 = arith.constant 0 : i32
    %c0_i32_1 = arith.constant 0 : i32
    %c0_i32_2 = arith.constant 0 : i32
    return %c0_i32, %c0_i32_0, %c0_i32_1 : i32, i32, i32
  }
  func.func @transform_36(%arg0: i32) -> (i32, i32, i32) {
    %c0_i32 = arith.constant 0 : i32
    %c0_i32_0 = arith.constant 0 : i32
    %c0_i32_1 = arith.constant 0 : i32
    %c0_i32_2 = arith.constant 0 : i32
    return %c0_i32, %c0_i32_0, %c0_i32_1 : i32, i32, i32
  }
  func.func @transform_37(%arg0: i32) -> (i32, i32) {
    %c0_i32 = arith.constant 0 : i32
    %c0_i32_0 = arith.constant 0 : i32
    %c0_i32_1 = arith.constant 0 : i32
    return %c0_i32, %c0_i32_0 : i32, i32
  }
  func.func @transform_38(%arg0: i32) -> (i32, i32) {
    %c0_i32 = arith.constant 0 : i32
    %c0_i32_0 = arith.constant 0 : i32
    %c0_i32_1 = arith.constant 0 : i32
    return %c0_i32, %c0_i32_0 : i32, i32
  }
  func.func @transform_39(%arg0: i32) -> (i32, i32) {
    %c0_i32 = arith.constant 0 : i32
    %c0_i32_0 = arith.constant 0 : i32
    %c0_i32_1 = arith.constant 0 : i32
    return %c0_i32, %c0_i32_0 : i32, i32
  }
  func.func @transform_40(%arg0: i32) -> (i32, i32) {
    %c0_i32 = arith.constant 0 : i32
    %c0_i32_0 = arith.constant 0 : i32
    %c0_i32_1 = arith.constant 0 : i32
    return %c0_i32, %c0_i32_0 : i32, i32
  }
  func.func @transform_41(%arg0: i32) -> (i32, i32) {
    %c0_i32 = arith.constant 0 : i32
    %c0_i32_0 = arith.constant 0 : i32
    %c0_i32_1 = arith.constant 0 : i32
    return %c0_i32, %c0_i32_0 : i32, i32
  }
}

</mosaic_0001>

<bundles_post_ra>
// kernel: rswitch_forward.1
= control target key start
LH: loop header
LB: loop body
LE: loop exit
PB: predicated region body
PF: predicated region fallthrough
CT: control target
= control target key end

     0   :  { %s7332_s6 = smov 1   ;;  %s7333_s10 = smov 2   ;;  %s9205_s0 = inlined_call_operand.smem [shape: u32[42], index: -1, kind: input, shape index: {}] }
   0x1   :  { %s7392_s5 = sld [smem:[%s9205_s0]]   ;;  %s7334_s14 = smov 3  }
   0x2   :  { %s7397_s9 = sld [smem:[%s9205_s0 + %s7332_s6]]   ;;  %s7335_s18 = smov 4  }
   0x3   :  { %s7402_s13 = sld [smem:[%s9205_s0 + %s7333_s10]]   ;;  %s7336_s22 = smov 5  }
   0x4   :  { %s7407_s17 = sld [smem:[%s9205_s0 + %s7334_s14]]   ;;  %s7337_s26 = smov 6  }
   0x5   :  { %s7412_s21 = sld [smem:[%s9205_s0 + %s7335_s18]]   ;;  %s7338_s30 = smov 7  }
   0x6   :  { %s7417_s25 = sld [smem:[%s9205_s0 + %s7336_s22]]   ;;  %s7339_s4 = smov 8  }
   0x7   :  { %s7422_s29 = sld [smem:[%s9205_s0 + %s7337_s26]]   ;;  %s7340_s10 = smov 9  }
   0x8   :  { %9217 = sst [smem:[#allocation19_spill]] %s7397_s9  ;;  %s7341_s15 = smov 10  }
   0x9   :  { %s7427_s3 = sld [smem:[%s9205_s0 + %s7338_s30]]   ;;  %s7342_s20 = smov 11  }
   0xa   :  { %s7432_s8 = sld [smem:[%s9205_s0 + %s7339_s4]]   ;;  %s7343_s26 = smov 12  }
   0xb   :  { %s7437_s14 = sld [smem:[%s9205_s0 + %s7340_s10]]   ;;  %s7344_s1 = smov 13  }
   0xc   :  { %s7442_s19 = sld [smem:[%s9205_s0 + %s7341_s15]]   ;;  %s7345_s7 = smov 14  }
   0xd   :  { %s7447_s24 = sld [smem:[%s9205_s0 + %s7342_s20]]   ;;  %s7346_s15 = smov 15  }
   0xe   :  { %s7452_s30 = sld [smem:[%s9205_s0 + %s7343_s26]]   ;;  %s7347_s22 = smov 16  }
   0xf   :  { %s7457_s6 = sld [smem:[%s9205_s0 + %s7344_s1]]   ;;  %s7348_s28 = smov 17  }
  0x10   :  { %s7462_s12 = sld [smem:[%s9205_s0 + %s7345_s7]]   ;;  %s7349_s7 = smov 18  }
  0x11   :  { %s7467_s20 = sld [smem:[%s9205_s0 + %s7346_s15]]   ;;  %s7350_s15 = smov 19  }
  0x12   :  { %s7472_s27 = sld [smem:[%s9205_s0 + %s7347_s22]]   ;;  %s7351_s22 = smov 20  }
  0x13   :  { %s7477_s4 = sld [smem:[%s9205_s0 + %s7348_s28]]   ;;  %s7352_s28 = smov 21  }
  0x14   :  { %s7482_s9 = sld [smem:[%s9205_s0 + %s7349_s7]]   ;;  %s7353_s7 = smov 22  }
  0x15   :  { %9218 = sst [smem:[#allocation20_spill]] %s7457_s6 }
  0x16   :  { %9219 = sst [smem:[#allocation21_spill]] %s7462_s12 }
  0x17   :  { %s7487_s12 = sld [smem:[%s9205_s0 + %s7350_s15]]   ;;  %s7354_s15 = smov 23  }
  0x18   :  { %s7492_s6 = sld [smem:[%s9205_s0 + %s7351_s22]]   ;;  %s7355_s22 = smov 24  }
  0x19   :  { %9220 = sst [smem:[#allocation22_spill]] %s7477_s4 }
  0x1a   :  { %9221 = sst [smem:[#allocation23_spill]] %s7482_s9 }
  0x1b   :  { %s7497_s4 = sld [smem:[%s9205_s0 + %s7352_s28]]   ;;  %s7356_s28 = smov 25  }
  0x1c   :  { %s7502_s9 = sld [smem:[%s9205_s0 + %s7353_s7]]   ;;  %s7357_s7 = smov 26  }
  0x1d   :  { %9222 = sst [smem:[#allocation24_spill]] %s7487_s12 }
  0x1e   :  { %9223 = sst [smem:[#allocation25_spill]] %s7492_s6 }
  0x1f   :  { %s7507_s12 = sld [smem:[%s9205_s0 + %s7354_s15]]   ;;  %s7358_s15 = smov 27  }
  0x20   :  { %s7512_s6 = sld [smem:[%s9205_s0 + %s7355_s22]]   ;;  %s7359_s22 = smov 28  }
  0x21   :  { %9224 = sst [smem:[#allocation26_spill]] %s7497_s4 }
  0x22   :  { %9225 = sst [smem:[#allocation27_spill]] %s7502_s9 }
  0x23   :  { %s7517_s4 = sld [smem:[%s9205_s0 + %s7356_s28]]   ;;  %s7360_s28 = smov 29  }
  0x24   :  { %s7522_s9 = sld [smem:[%s9205_s0 + %s7357_s7]]   ;;  %s7361_s7 = smov 30  }
  0x25   :  { %9226 = sst [smem:[#allocation28_spill]] %s7507_s12 }
  0x26   :  { %9227 = sst [smem:[#allocation29_spill]] %s7512_s6 }
  0x27   :  { %s7527_s12 = sld [smem:[%s9205_s0 + %s7358_s15]]   ;;  %s7362_s15 = smov 31  }
  0x28   :  { %s7532_s6 = sld [smem:[%s9205_s0 + %s7359_s22]]   ;;  %s7363_s22 = smov 32  }
  0x29   :  { %9228 = sst [smem:[#allocation30_spill]] %s7517_s4 }
  0x2a   :  { %9229 = sst [smem:[#allocation31_spill]] %s7522_s9 }
  0x2b   :  { %s7537_s4 = sld [smem:[%s9205_s0 + %s7360_s28]]   ;;  %s7364_s28 = smov 33  }
  0x2c   :  { %s7542_s9 = sld [smem:[%s9205_s0 + %s7361_s7]]   ;;  %s7365_s7 = smov 34  }
  0x2d   :  { %9230 = sst [smem:[#allocation32_spill]] %s7527_s12 }
  0x2e   :  { %9231 = sst [smem:[#allocation33_spill]] %s7532_s6 }
  0x2f   :  { %s7547_s12 = sld [smem:[%s9205_s0 + %s7362_s15]]   ;;  %s7366_s15 = smov 35  }
  0x30   :  { %s7552_s6 = sld [smem:[%s9205_s0 + %s7363_s22]]   ;;  %s7367_s22 = smov 36  }
  0x31   :  { %9232 = sst [smem:[#allocation34_spill]] %s7537_s4 }
  0x32   :  { %9233 = sst [smem:[#allocation35_spill]] %s7542_s9 }
  0x33   :  { %s7557_s4 = sld [smem:[%s9205_s0 + %s7364_s28]]   ;;  %s7368_s28 = smov 37  }
  0x34   :  { %s7562_s9 = sld [smem:[%s9205_s0 + %s7365_s7]]   ;;  %s7369_s7 = smov 38  }
  0x35   :  { %9234 = sst [smem:[#allocation36_spill]] %s7547_s12 }
  0x36   :  { %9235 = sst [smem:[#allocation37_spill]] %s7552_s6 }
  0x37   :  { %s7567_s12 = sld [smem:[%s9205_s0 + %s7366_s15]]   ;;  %s7370_s15 = smov 39  }
  0x38   :  { %s7572_s6 = sld [smem:[%s9205_s0 + %s7367_s22]]   ;;  %s7371_s22 = smov 40  }
  0x39   :  { %9236 = sst [smem:[#allocation38_spill]] %s7557_s4 }
  0x3a   :  { %9237 = sst [smem:[#allocation39_spill]] %s7562_s9 }
  0x3b   :  { %s7577_s4 = sld [smem:[%s9205_s0 + %s7368_s28]]   ;;  %s7372_s28 = smov 41  }
  0x3c   :  { %s7582_s9 = sld [smem:[%s9205_s0 + %s7369_s7]]  }
  0x3d   :  { %9238 = sst [smem:[#allocation40_spill]] %s7567_s12 }
  0x3e   :  { %9239 = sst [smem:[#allocation41_spill]] %s7572_s6 }
  0x3f   :  { %s7587_s12 = sld [smem:[%s9205_s0 + %s7370_s15]]  }
  0x40   :  { %s7592_s6 = sld [smem:[%s9205_s0 + %s7371_s22]]  }
  0x41   :  { %9240 = sst [smem:[#allocation42_spill]] %s7577_s4 }
  0x42   :  { %s7597_s4 = sld [smem:[%s9205_s0 + %s7372_s28]]  }
  0x43   :  { %88 = vsyncpa [#allocation3], 0 }
  0x44   :  { %89 = vsyncpa [#allocation6], 0 }
  0x45   :  { %90 = vsyncpa [#allocation9], 0 }
  0x46   :  { %91 = vsyncpa [#allocation12], 0 }
  0x47   :  { %92 = vsyncpa [#allocation4], 0  ;;  %s7373_s7 = smov [#allocation5]   ;;  %s7374_s11 = smov [#allocation8]  }
  0x48   :  { %s127_s10 = sshll.u32 %s7373_s7, 4  ;;  %s155_s15 = sshll.u32 %s7374_s11, 4  ;;  %s128_s10 = int_to_ptr.vmem [resolvable:$true] %s127_s10  ;;  %s156_s15 = int_to_ptr.vmem [resolvable:$true] %s155_s15 }
  0x49   :  { %s7190_s16 = scalar_lea.vmem %s128_s10, 16  ;;  %s7194_s18 = scalar_lea.vmem %s128_s10, 32 }
  0x4a   :  { %p7191_p0 = scmp.ne.s32.totalorder %s128_s10, %s7190_s16  ;;  %p7195_p1 = scmp.lt.s32.totalorder %s128_s10, %s128_s10 }
  0x4b   :  { %p7196_p2 = scmp.lt.s32.totalorder %s7194_s18, %s7190_s16 }
  0x4d   :  { %p7197_p3 = por %p7196_p2, %p7195_p1 }
  0x4f   :  { %p7198_p4 = pnand %p7197_p3, %p7191_p0 }
  0x51   :  { %7201 = shalt.err (!%p7198_p4)
}
  0x52   :  { %130 = dma.hbm_to_vmem [thread:$0]  %s7442_s19, 16, %s128_s10, [#allocation6]  }
  0x53   :  { %s7210_s0 = scalar_lea.vmem %s156_s15, 16  ;;  %s7214_s22 = scalar_lea.vmem %s156_s15, 32 }
  0x54   :  { %p7211_p5 = scmp.ne.s32.totalorder %s156_s15, %s7210_s0  ;;  %p7215_p6 = scmp.lt.s32.totalorder %s156_s15, %s156_s15 }
  0x55   :  { %p7216_p7 = scmp.lt.s32.totalorder %s7214_s22, %s7210_s0 }
  0x57   :  { %p7217_p8 = por %p7216_p7, %p7215_p6 }
  0x59   :  { %p7218_p9 = pnand %p7217_p8, %p7211_p5 }
  0x5b   :  { %7221 = shalt.err (!%p7218_p9)
}
  0x5c   :  { %158 = dma.hbm_to_vmem [thread:$0]  %s7472_s27, 16, %s156_s15, [#allocation9]  }
  0x5d   :  { %s7375_s23 = smov [#allocation2]   ;;  %s7376_s28 = smov [#allocation7]  }
  0x5e   :  { %s115_s26 = sshll.u32 %s7375_s23, 4  ;;  %s139_s1 = sshll.u32 %s7376_s28, 4  ;;  %s116_s26 = int_to_ptr.vmem [resolvable:$true] %s115_s26  ;;  %s140_s1 = int_to_ptr.vmem [resolvable:$true] %s139_s1 }
  0x5f   :  { %s7230_s2 = scalar_lea.vmem %s116_s26, 16  ;;  %s7234_s7 = scalar_lea.vmem %s116_s26, 32 }
  0x60   :  { %p7231_p10 = scmp.ne.s32.totalorder %s116_s26, %s7230_s2  ;;  %p7235_p11 = scmp.lt.s32.totalorder %s116_s26, %s116_s26 }
  0x61   :  { %p7236_p12 = scmp.lt.s32.totalorder %s7234_s7, %s7230_s2 }
  0x63   :  { %p7237_p13 = por %p7236_p12, %p7235_p11 }
  0x65   :  { %p7238_p0 = pnand %p7237_p13, %p7231_p10 }
  0x67   :  { %7241 = shalt.err (!%p7238_p0)
}
  0x68   :  { %118 = dma.hbm_to_vmem [thread:$0]  %s7432_s8, 16, %s116_s26, [#allocation3]  }
  0x69   :  { %s7250_s19 = scalar_lea.vmem %s140_s1, 16  ;;  %s7254_s10 = scalar_lea.vmem %s140_s1, 32 }
  0x6a   :  { %p7251_p1 = scmp.ne.s32.totalorder %s140_s1, %s7250_s19  ;;  %p7255_p2 = scmp.lt.s32.totalorder %s140_s1, %s140_s1 }
  0x6b   :  { %p7256_p3 = scmp.lt.s32.totalorder %s7254_s10, %s7250_s19 }
  0x6d   :  { %p7257_p4 = por %p7256_p3, %p7255_p2 }
  0x6f   :  { %p7258_p5 = pnand %p7257_p4, %p7251_p1 }
  0x71   :  { %7261 = shalt.err (!%p7258_p5)
}
  0x72   :  { %142 = dma.hbm_to_vmem [thread:$0]  %s7452_s30, 16, %s140_s1, [#allocation6]  }
  0x73   :  { %s7377_s27 = smov [#allocation10]  }
  0x74   :  { %s208_s11 = sshll.u32 %s7377_s27, 4  ;;  %s209_s11 = int_to_ptr.vmem [resolvable:$true] %s208_s11 }
  0x75   :  { %s7270_s15 = scalar_lea.vmem %s209_s11, 512  ;;  %p7275_p7 = scmp.lt.s32.totalorder %s209_s11, %s209_s11 }
  0x76   :  { %p7271_p6 = scmp.ne.s32.totalorder %s209_s11, %s7270_s15  ;;  %p7276_p8 = scmp.lt.s32.totalorder %s7270_s15, %s7270_s15 }
  0x78   :  { %p7277_p9 = por %p7276_p8, %p7275_p7 }
  0x7a   :  { %p7278_p10 = pnand %p7277_p9, %p7271_p6 }
  0x7c   :  { %7281 = shalt.err (!%p7278_p10)
}
  0x7d   :  { %s7378_s8 = smov 128   ;;  %s7379_s16 = smov 8  }
  0x7e   :  { %214 = dma.hbm_to_vmem [thread:$0]  %s7587_s12, 512, %s209_s11, [#allocation9], %s7378_s8, %s7378_s8, %s7379_s16  }
  0x7f   :  { %s7380_s18 = smov [#allocation11]  }
  0x80   :  { %s221_s0 = sshll.u32 %s7380_s18, 4  ;;  %s222_s0 = int_to_ptr.vmem [resolvable:$true] %s221_s0 }
  0x81   :  { %s7290_s22 = scalar_lea.vmem %s222_s0, 16  ;;  %s7294_s30 = scalar_lea.vmem %s222_s0, 32 }
  0x82   :  { %p7291_p11 = scmp.ne.s32.totalorder %s222_s0, %s7290_s22  ;;  %p7295_p12 = scmp.lt.s32.totalorder %s222_s0, %s222_s0 }
  0x83   :  { %p7296_p13 = scmp.lt.s32.totalorder %s7294_s30, %s7290_s22 }
  0x85   :  { %p7297_p0 = por %p7296_p13, %p7295_p12 }
  0x87   :  { %p7298_p1 = pnand %p7297_p0, %p7291_p11 }
  0x89   :  { %7301 = shalt.err (!%p7298_p1)
}
  0x8a   :  { %224 = dma.hbm_to_vmem [thread:$0]  %s7592_s6, 16, %s222_s0, [#allocation12]  }
  0x8b   :  { %7322 = dma.done.wait [#allocation3], 16  }
  0x8c   :  { %7323 = vsyncadd [#allocation3], 4294967280 }
  0x8d   :  { %7324 = dma.done.wait [#allocation6], 32  }
  0x8e   :  { %7325 = vsyncadd [#allocation6], 4294967264 }
  0x8f   :  { %7326 = dma.done.wait [#allocation9], 528  }
  0x90   :  { %7327 = vsyncadd [#allocation9], 4294966768 }
  0x91   :  { %7328 = dma.done.wait [#allocation12], 16  }
  0x92   :  { %7329 = vsyncadd [#allocation12], 4294967280  ;;  %v7381_v0 = vmov 0   ;;  %v251_v1 = vld [vmem:[%s7392_s5 + $0x10] sm:$0xff]  ;;  %v249_v2 = vld [vmem:[%s7392_s5] sm:$0xff]  ;;  %v247_v14 = vlaneseq  ;;  %vm285_vm0 = vcmask 523264  }
  0x93   :  { %6937 = vset.pattern.permute.xlu1 %v7381_v0  ;;  %6936 = vset.pattern.permute.xlu0 %v7381_v0  ;;  %v284_v3 = vld [vmem:[%s7402_s13 + $0x38] sm:$0xff]  ;;  %v283_v4 = vld [vmem:[%s7402_s13 + $0x30] sm:$0xff]  ;;  %v250_v6 = vld [vmem:[%s7392_s5 + $0x8] sm:$0xff]  ;;  %v7382_v18 = vmov 0.0   ;;  %vm421_vm5 = vcmask 261120   ;;  %s9255_s6 = sld [smem:[#allocation25_spill]] }
  0x94   :  { %260 = vperm.xlu1 %6937, %v251_v1   ;;  %254 = vperm.xlu0 %6936, %v249_v2   ;;  %v252_v5 = vld [vmem:[%s7392_s5 + $0x18] sm:$0xff]  ;;  %v282_v7 = vld [vmem:[%s7402_s13 + $0x28] sm:$0xff]  ;;  %v281_v8 = vld [vmem:[%s7402_s13 + $0x20] sm:$0xff]  ;;  %v7618_v15 = vand.u32 127, %v247_v14  ;;  %s9247_s5 = sld [smem:[#allocation22_spill]]  ;;  %s7383_s8 = smov [#allocation13]  }
  0x95   :  { %6316 = vmatprep.subr.mxu0 %v284_v3  ;;  %v398_v9 = vld [vmem:[%s7417_s25 + $0x18] sm:$0xff]  ;;  %v279_v11 = vld [vmem:[%s7402_s13 + $0x10] sm:$0xff]  ;;  %v278_v12 = vld [vmem:[%s7402_s13 + $0x8] sm:$0xff]  ;;  %s9256_s12 = sld [smem:[#allocation27_spill]]  ;;  %s5653_s16 = sshll.u32 %s7383_s8, 4  ;;  %s5654_s16 = int_to_ptr.vmem [resolvable:$true] %s5653_s16 }
  0x96   :  { %6317 = vmatpush3.msra.mxu0 %v284_v3  ;;  %v280_v10 = vld [vmem:[%s7402_s13 + $0x18] sm:$0xff]  ;;  %6338 = vmatprep.subr.mxu1 %v398_v9  ;;  %v277_v13 = vld [vmem:[%s7402_s13] sm:$0xff]  ;;  %v397_v26 = vld [vmem:[%s7417_s25 + $0x10] sm:$0xff]  ;;  %vm877_vm6 = vcmp.ge.s32.totalorder %v7618_v15, 8  ;;  %vm878_vm7 = vcmp.lt.s32.totalorder %v7618_v15, 16  ;;  %vm702_vm8 = vcmp.lt.s32.totalorder %v7618_v15, 8  ;;  %p7307_p3 = scmp.lt.s32.totalorder %s5654_s16, %s5654_s16 }
  0x97   :  { %6318 = vmatprep.subr.mxu0 %v283_v4  ;;  %6339 = vmatpush3.msra.mxu1 %v398_v9  ;;  %v408_v25 = vld [vmem:[%s7437_s14 + $0x18] sm:$0xff]  ;;  %v407_v27 = vld [vmem:[%s7437_s14 + $0x10] sm:$0xff]  ;;  %v396_v28 = vld [vmem:[%s7417_s25 + $0x8] sm:$0xff]  ;;  %vm1247_vm10 = vcmp.ge.s32.totalorder %v7618_v15, 16  ;;  %vm1248_vm11 = vcmp.lt.s32.totalorder %v7618_v15, 24  ;;  %vm1524_vm13 = vcmp.ge.s32.totalorder %v7618_v15, 24 }
  0x98   :  { %263 = vperm.xlu1 %6937, %v252_v5   ;;  %257 = vperm.xlu0 %6936, %v250_v6   ;;  %v406_v29 = vld [vmem:[%s7437_s14 + $0x8] sm:$0xff]  ;;  %v395_v30 = vld [vmem:[%s7417_s25] sm:$0xff]  ;;  %v403_v32 = vld [vmem:[%s7427_s3 + $0x18] sm:$0xff]  ;;  %vm1525_vm14 = vcmp.lt.s32.totalorder %v7618_v15, 32  ;;  %s9248_s13 = sld [smem:[#allocation20_spill]]  ;;  %s7302_s0 = scalar_lea.vmem %s5654_s16, 16 }
  0x99   :  { %6319 = vmatpush3.msra.mxu0 %v283_v4  ;;  %6340 = vmatprep.subr.mxu1 %v397_v26  ;;  %v405_v31 = vld [vmem:[%s7437_s14] sm:$0xff]  ;;  %v388_v37 = vld [vmem:[%s7407_s17 + $0x8] sm:$0xff]  ;;  %v389_v43 = vld [vmem:[%s7407_s17 + $0x10] sm:$0xff]  ;;  %s9250_s25 = sld [smem:[#allocation23_spill]]  ;;  %p7303_p2 = scmp.ne.s32.totalorder %s5654_s16, %s7302_s0 }
  0x9a   :  { %6320 = vmatprep.subr.mxu0 %v282_v7  ;;  %6341 = vmatpush3.msra.mxu1 %v397_v26  ;;  %v387_v36 = vld [vmem:[%s7407_s17] sm:$0xff]  ;;  %v402_v46 = vld [vmem:[%s7427_s3 + $0x10] sm:$0xff]  ;;  %v390_v47 = vld [vmem:[%s7407_s17 + $0x18] sm:$0xff]  ;;  %s9249_s17 = sld [smem:[#allocation21_spill]]  ;;  %s7306_s22 = scalar_lea.vmem %s5654_s16, 32 }
  0x9b   :  { %6321 = vmatpush3.msra.mxu0 %v282_v7  ;;  %6342 = vmatprep.subr.mxu1 %v396_v28  ;;  %v401_v49 = vld [vmem:[%s7427_s3 + $0x8] sm:$0xff]  ;;  %v400_v51 = vld [vmem:[%s7427_s3] sm:$0xff]  ;;  %vm7685_vm9 = vmand %vm877_vm6, %vm878_vm7  ;;  %s9252_s3 = sld [smem:[#allocation30_spill]]  ;;  %p7308_p4 = scmp.lt.s32.totalorder %s7306_s22, %s7302_s0 }
  0x9c   :  { %6322 = vmatprep.subr.mxu0 %v281_v8  ;;  %6343 = vmatpush3.msra.mxu1 %v396_v28  ;;  %v5714_v53 = vld [vmem:[%s7422_s29] ss:$0 sm:$0xff]  ;;  %vm7821_vm12 = vmand %vm1247_vm10, %vm1248_vm11  ;;  %s9251_s29 = sld [smem:[#allocation26_spill]] }
  0x9d   :  { %6323 = vmatpush3.msra.mxu0 %v281_v8  ;;  %6344 = vmatprep.subr.mxu1 %v395_v30  ;;  %v5719_v63 = vld [vmem:[#allocation2] ss:$0 sm:$0xff]  ;;  %vm7918_vm15 = vmand %vm1524_vm13, %vm1525_vm14  ;;  %s9253_s14 = sld [smem:[#allocation28_spill]]  ;;  %p7309_p5 = por %p7308_p4, %p7307_p3 }
  0x9e   :  { %6324 = vmatprep.subr.mxu0 %v280_v10  ;;  %6345 = vmatpush3.msra.mxu1 %v395_v30  ;;  %s9258_s23 = sld [smem:[#allocation31_spill]] }
  0x9f   :  { %6325 = vmatpush3.msra.mxu0 %v280_v10  ;;  %6352 = vmatprep.subr.mxu1 %v403_v32  ;;  %s9260_s26 = sld [smem:[#allocation33_spill]]  ;;  %p7310_p6 = pnand %p7309_p5, %p7303_p2 }
  0xa0   :  { %6326 = vmatprep.subr.mxu0 %v279_v11  ;;  %s9261_s28 = sld [smem:[#allocation38_spill]] }
  0xa1   :  { %6327 = vmatpush3.msra.mxu0 %v279_v11  ;;  %s9262_s1 = sld [smem:[#allocation36_spill]] }
  0xa2   :  { %6328 = vmatprep.subr.mxu0 %v278_v12  ;;  %s9263_s2 = sld [smem:[#allocation34_spill]] }
  0xa3   :  { %6329 = vmatpush3.msra.mxu0 %v278_v12  ;;  %s9264_s7 = sld [smem:[#allocation35_spill]] }
  0xa4   :  { %6330 = vmatprep.subr.mxu0 %v277_v13  ;;  %s9265_s19 = sld [smem:[#allocation40_spill]] }
  0xa5   :  { %6331 = vmatpush3.msra.mxu0 %v277_v13  ;;  %s9266_s10 = sld [smem:[#allocation37_spill]] }
  0xa6   :  { %6366 = vmatprep.subr.mxu0 %v408_v25  ;;  %s9267_s27 = sld [smem:[#allocation39_spill]] }
  0xa7   :  { %s9268_s11 = sld [smem:[#allocation41_spill]] }
  0xa8   :  { %s9269_s15 = sld [smem:[#allocation42_spill]] }
 0x10f   :  { %v261_v16 = vpop.permute.xlu1 %260  ;;  %v255_v17 = vpop.permute.xlu0 %254 }
 0x110   :  { %vm265_vm1 = vcmp.eq.s32.totalorder %v7618_v15, %v255_v17  ;;  %vm267_vm2 = vcmp.eq.s32.totalorder %v7618_v15, %v261_v16 }
 0x111   :  { %v5706_v19 = vsel %vm265_vm1, 1.0, %v7382_v18  ;;  %v5708_v22 = vsel %vm267_vm2, 1.0, %v7382_v18  ;;  %vm3967_vm1 = vcmask 31744  }
 0x112   :  { %6332 = vmatprep.mubr.msk.f32.mxu0 %vm285_vm0, %v5706_v19 }
 0x113   :  { %v264_v20 = vpop.permute.xlu1 %263  ;;  %v258_v21 = vpop.permute.xlu0 %257 }
 0x114   :  { %vm266_vm3 = vcmp.eq.s32.totalorder %v7618_v15, %v258_v21  ;;  %vm268_vm4 = vcmp.eq.s32.totalorder %v7618_v15, %v264_v20  ;;  %v5724_v20 = vld [vmem:[#allocation5] ss:$0 sm:$0xff] }
 0x115   :  { %v5707_v23 = vsel %vm266_vm3, 1.0, %v7382_v18  ;;  %v5709_v24 = vsel %vm268_vm4, 1.0, %v7382_v18 }
 0x116   :  { %6333 = vmatmul.mubr.msk.f32.vlgmr.msra.gmra.mxu0 %vm285_vm0, %v5707_v23 }
 0x117   :  { %6335 = vmatprep.mubr.msk.f32.mxu0 %vm285_vm0, %v5708_v22  ;;  %6367 = vmatpush3.msra.mxu0 %v408_v25 }
 0x118   :  { %6368 = vmatprep.subr.mxu0 %v407_v27 }
 0x119   :  { %6369 = vmatpush3.msra.mxu0 %v407_v27 }
 0x11a   :  { %6336 = vmatmul.mubr.msk.f32.gmra.mxu0 %vm285_vm0, %v5709_v24  ;;  %6370 = vmatprep.subr.mxu0 %v406_v29 }
 0x11b   :  { %6371 = vmatpush3.msra.mxu0 %v406_v29 }
 0x11c   :  { %6372 = vmatprep.subr.mxu0 %v405_v31 }
 0x11d   :  { %6373 = vmatpush3.msra.mxu0 %v405_v31 }
 0x1d6   :  { %v6334_v33 = vpop.f32.mrf.mxu0 }
 0x1d7   :  { %v384_v34 = vmul.f32 5.656854, %v6334_v33 }
 0x1d8   :  { %v364_v35 = vpop.f32.mrf.mxu0 }
 0x1d9   :  { %v383_v38 = vmul.f32 5.656854, %v364_v35  ;;  %v7644_v41 = vadd.f32 %v388_v37, %v384_v34  ;;  %v7848_v37 = vld [vmem:[%s7412_s21 + $0x8] sm:$0xff] }
 0x1da   :  { %v6337_v39 = vpop.f32.mrf.mxu0 }
 0x1db   :  { %v7642_v40 = vadd.f32 %v387_v36, %v383_v38  ;;  %v386_v44 = vmul.f32 5.656854, %v6337_v39 }
 0x1dc   :  { %v374_v42 = vpop.f32.mrf.mxu0 }
 0x1dd   :  { %v385_v45 = vmul.f32 5.656854, %v374_v42  ;;  %6346 = vmatprep.mubr.msk.f32.mxu1 %vm421_vm5, %v7642_v40  ;;  %6374 = vmatprep.mubr.msk.f32.mxu0 %vm421_vm5, %v7642_v40  ;;  %v7660_v50 = vadd.f32 %v390_v47, %v386_v44  ;;  %v7851_v42 = vld [vmem:[%s7412_s21] sm:$0xff] }
 0x1de   :  { %6347 = vmatmul.mubr.msk.f32.vlgmr.msra.gmra.mxu1 %vm421_vm5, %v7644_v41  ;;  %6375 = vmatmul.mubr.msk.f32.vlgmr.msra.gmra.mxu0 %vm421_vm5, %v7644_v41 }
 0x1df   :  { %v7657_v48 = vadd.f32 %v389_v43, %v385_v45  ;;  %6353 = vmatpush3.msra.mxu1 %v403_v32 }
 0x1e0   :  { %6354 = vmatprep.subr.mxu1 %v402_v46 }
 0x1e1   :  { %6355 = vmatpush3.msra.mxu1 %v402_v46  ;;  %6349 = vmatprep.mubr.msk.f32.mxu1 %vm421_vm5, %v7657_v48 }
 0x1e2   :  { %6356 = vmatprep.subr.mxu1 %v401_v49  ;;  %6377 = vmatprep.mubr.msk.f32.mxu0 %vm421_vm5, %v7657_v48 }
 0x1e3   :  { %6350 = vmatmul.mubr.msk.f32.gmra.mxu1 %vm421_vm5, %v7660_v50  ;;  %6378 = vmatmul.mubr.msk.f32.gmra.mxu0 %vm421_vm5, %v7660_v50 }
 0x1e4   :  { %6357 = vmatpush3.msra.mxu1 %v401_v49  ;;  %6360 = vmatprep.mubr.msk.f32.mxu1 %vm421_vm5, %v7642_v40 }
 0x1e5   :  { %6358 = vmatprep.subr.mxu1 %v400_v51 }
 0x1e6   :  { %6359 = vmatpush3.msra.mxu1 %v400_v51 }
 0x1e7   :  { %6361 = vmatmul.mubr.msk.f32.vlgmr.msra.gmra.mxu1 %vm421_vm5, %v7644_v41 }
 0x1e8   :  { %6363 = vmatprep.mubr.msk.f32.mxu1 %vm421_vm5, %v7657_v48 }
 0x1eb   :  { %6364 = vmatmul.mubr.msk.f32.gmra.mxu1 %vm421_vm5, %v7660_v50 }
 0x29e   :  { %v6348_v52 = vpop.f32.mrf.mxu1  ;;  %v6376_v6 = vpop.f32.mrf.mxu0 }
 0x29f   :  { %v7743_v19 = vadd.f32 %v6348_v52, %v5714_v53  ;;  %v7789_v30 = vadd.f32 %v6376_v6, %v5724_v20  ;;  %v7858_v52 = vld [vmem:[%s7412_s21 + $0x10] sm:$0xff] }
 0x2a0   :  { %v500_v54 = vpop.f32.mrf.mxu1  ;;  %v682_v10 = vpop.f32.mrf.mxu0 }
 0x2a1   :  { %v7682_v55 = vadd.f32 %v5714_v53, %v500_v54  ;;  %v705_v24 = vsel %vm702_vm8, %v7743_v19, 0.0  ;;  %v881_v25 = vsel %vm7685_vm9, %v7743_v19, 0.0  ;;  %v7807_v33 = vadd.f32 %v5724_v20, %v682_v10 }
 0x2a3   :  { %v6351_v57 = vpop.f32.mrf.mxu1  ;;  %v704_v58 = vsel %vm702_vm8, %v7682_v55, 0.0  ;;  %v880_v59 = vsel %vm7685_vm9, %v7682_v55, 0.0  ;;  %v6379_v14 = vpop.f32.mrf.mxu0 }
 0x2a4   :  { %6388 = vmatprep.mubr.msk.f32.mxu1 %vm421_vm5, %v704_v58  ;;  %6402 = vmatprep.mubr.msk.f32.mxu0 %vm421_vm5, %v880_v59  ;;  %v7745_v21 = vadd.f32 %v6379_v14, %v5724_v20  ;;  %v7763_v26 = vadd.f32 %v6351_v57, %v5714_v53  ;;  %v7861_v57 = vld [vmem:[%s7412_s21 + $0x18] sm:$0xff] }
 0x2a5   :  { %v510_v60 = vpop.f32.mrf.mxu1  ;;  %v692_v23 = vpop.f32.mrf.mxu0 }
 0x2a6   :  { %v7747_v22 = vadd.f32 %v5714_v53, %v510_v60  ;;  %v7773_v29 = vadd.f32 %v5724_v20, %v692_v23  ;;  %v707_v31 = vsel %vm702_vm8, %v7763_v26, 0.0  ;;  %v883_v32 = vsel %vm7685_vm9, %v7763_v26, 0.0 }
 0x2a7   :  { %v6362_v61 = vpop.f32.mrf.mxu1 }
 0x2a8   :  { %v7709_v7 = vadd.f32 %v6362_v61, %v5719_v63  ;;  %v706_v27 = vsel %vm702_vm8, %v7747_v22, 0.0  ;;  %v882_v28 = vsel %vm7685_vm9, %v7747_v22, 0.0 }
 0x2a9   :  { %v591_v62 = vpop.f32.mrf.mxu1 }
 0x2aa   :  { %v7721_v11 = vadd.f32 %v5719_v63, %v591_v62  ;;  %v709_v12 = vsel %vm702_vm8, %v7709_v7, 0.0  ;;  %v885_v13 = vsel %vm7685_vm9, %v7709_v7, 0.0 }
 0x2ab   :  { %v6365_v0 = vpop.f32.mrf.mxu1 }
 0x2ac   :  { %v7697_v1 = vadd.f32 %v6365_v0, %v5719_v63  ;;  %v708_v16 = vsel %vm702_vm8, %v7721_v11, 0.0  ;;  %v884_v17 = vsel %vm7685_vm9, %v7721_v11, 0.0 }
 0x2ad   :  { %v601_v2 = vpop.f32.mrf.mxu1 }
 0x2ae   :  { %v7699_v3 = vadd.f32 %v5719_v63, %v601_v2  ;;  %v711_v4 = vsel %vm702_vm8, %v7697_v1, 0.0  ;;  %v887_v5 = vsel %vm7685_vm9, %v7697_v1, 0.0  ;;  %v7840_v35 = vsel %vm7821_vm12, %v7697_v1, 0.0 }
 0x2af   :  { %6380 = vmatprep.subr.msk.mxu1 %vm421_vm5, %v711_v4  ;;  %6394 = vmatprep.subr.msk.mxu0 %vm421_vm5, %v887_v5 }
 0x2b0   :  { %6381 = vmatpush3.xpose.msk.msra.mxu1 %vm421_vm5, %v711_v4  ;;  %6395 = vmatpush3.xpose.msk.msra.mxu0 %vm421_vm5, %v887_v5  ;;  %v710_v8 = vsel %vm702_vm8, %v7699_v3, 0.0  ;;  %v886_v9 = vsel %vm7685_vm9, %v7699_v3, 0.0 }
 0x2b1   :  { %6382 = vmatprep.subr.msk.mxu1 %vm421_vm5, %v710_v8  ;;  %6396 = vmatprep.subr.msk.mxu0 %vm421_vm5, %v886_v9 }
 0x2b4   :  { %6383 = vmatpush3.xpose.msk.msra.mxu1 %vm421_vm5, %v710_v8  ;;  %6397 = vmatpush3.xpose.msk.msra.mxu0 %vm421_vm5, %v886_v9 }
 0x2b5   :  { %6384 = vmatprep.subr.msk.mxu1 %vm421_vm5, %v709_v12  ;;  %6398 = vmatprep.subr.msk.mxu0 %vm421_vm5, %v885_v13 }
 0x2b8   :  { %6385 = vmatpush3.xpose.msk.msra.mxu1 %vm421_vm5, %v709_v12  ;;  %6399 = vmatpush3.xpose.msk.msra.mxu0 %vm421_vm5, %v885_v13 }
 0x2b9   :  { %6386 = vmatprep.subr.msk.mxu1 %vm421_vm5, %v708_v16  ;;  %6400 = vmatprep.subr.msk.mxu0 %vm421_vm5, %v884_v17 }
 0x2bc   :  { %6387 = vmatpush3.xpose.msk.msra.mxu1 %vm421_vm5, %v708_v16  ;;  %6401 = vmatpush3.xpose.msk.msra.mxu0 %vm421_vm5, %v884_v17 }
 0x2bd   :  { %6408 = vmatprep.subr.msk.mxu1 %vm7685_vm9, %v7745_v21  ;;  %6422 = vmatprep.subr.msk.mxu0 %vm702_vm8, %v7745_v21 }
 0x2bf   :  { %6389 = vmatmul.mubr.msk.f32.vlgmr.msra.gmra.mxu1 %vm421_vm5, %v705_v24  ;;  %6403 = vmatmul.mubr.msk.f32.vlgmr.msra.gmra.mxu0 %vm421_vm5, %v881_v25 }
 0x2c0   :  { %6391 = vmatprep.mubr.msk.f32.mxu1 %vm421_vm5, %v706_v27  ;;  %6405 = vmatprep.mubr.msk.f32.mxu0 %vm421_vm5, %v882_v28 }
 0x2c1   :  { %6409 = vmatpush3.msk.msra.mxu1 %vm7685_vm9, %v7745_v21  ;;  %6423 = vmatpush3.msk.msra.mxu0 %vm702_vm8, %v7745_v21 }
 0x2c2   :  { %6410 = vmatprep.subr.msk.mxu1 %vm7685_vm9, %v7773_v29  ;;  %6424 = vmatprep.subr.msk.mxu0 %vm702_vm8, %v7773_v29 }
 0x2c3   :  { %6411 = vmatpush3.msk.msra.mxu1 %vm7685_vm9, %v7773_v29  ;;  %6425 = vmatpush3.msk.msra.mxu0 %vm702_vm8, %v7773_v29 }
 0x2c4   :  { %6392 = vmatmul.mubr.msk.f32.gmra.mxu1 %vm421_vm5, %v707_v31  ;;  %6406 = vmatmul.mubr.msk.f32.gmra.mxu0 %vm421_vm5, %v883_v32 }
 0x2c5   :  { %6412 = vmatprep.subr.msk.mxu1 %vm7685_vm9, %v7789_v30  ;;  %6426 = vmatprep.subr.msk.mxu0 %vm702_vm8, %v7789_v30 }
 0x2c6   :  { %6413 = vmatpush3.msk.msra.mxu1 %vm7685_vm9, %v7789_v30  ;;  %6427 = vmatpush3.msk.msra.mxu0 %vm702_vm8, %v7789_v30 }
 0x2c7   :  { %6414 = vmatprep.subr.msk.mxu1 %vm7685_vm9, %v7807_v33  ;;  %6428 = vmatprep.subr.msk.mxu0 %vm702_vm8, %v7807_v33 }
 0x2c8   :  { %6415 = vmatpush3.msk.msra.mxu1 %vm7685_vm9, %v7807_v33  ;;  %6429 = vmatpush3.msk.msra.mxu0 %vm702_vm8, %v7807_v33 }
 0x2c9   :  { %6436 = vmatprep.subr.msk.mxu1 %vm421_vm5, %v7840_v35  ;;  %6450 = vmatprep.subr.msk.mxu0 %vm7821_vm12, %v7745_v21 }
 0x37f   :  { %v6404_v36 = vpop.f32.mrf.mxu0  ;;  %v6390_v10 = vpop.f32.mrf.mxu1 }
 0x380   :  { %v1002_v38 = vmul.f32 0.35355338, %v6404_v36  ;;  %v826_v32 = vmul.f32 0.35355338, %v6390_v10  ;;  %v1255_v10 = vsel %vm7821_vm12, %v7709_v7, 0.0 }
 0x381   :  { %v982_v39 = vpop.f32.mrf.mxu0  ;;  %v806_v16 = vpop.f32.mrf.mxu1 }
 0x382   :  { %v1001_v43 = vmul.f32 0.35355338, %v982_v39  ;;  %v1006_v44 = vadd.f32 %v1002_v38, %v7848_v37  ;;  %v825_v27 = vmul.f32 0.35355338, %v806_v16  ;;  %v1251_v16 = vsel %vm7821_vm12, %v7743_v19, 0.0 }
 0x384   :  { %v6407_v45 = vpop.f32.mrf.mxu0  ;;  %v1012_v46 = vsel %vm421_vm5, %v1006_v44, -inf  ;;  %v1005_v47 = vadd.f32 %v1001_v43, %v7851_v42  ;;  %v6393_v20 = vpop.f32.mrf.mxu1  ;;  %v7871_v39 = vadd.f32 %v825_v27, %v7851_v42 }
 0x385   :  { %1013 = vmax.xlane.f32.xlu1 %v1012_v46  ;;  %v1004_v53 = vmul.f32 0.35355338, %v6407_v45  ;;  %v828_v45 = vmul.f32 0.35355338, %v6393_v20  ;;  %v1253_v20 = vsel %vm7821_vm12, %v7763_v26, 0.0 }
 0x386   :  { %v992_v49 = vpop.f32.mrf.mxu0  ;;  %v1009_v51 = vsel %vm421_vm5, %v1005_v47, -inf  ;;  %v816_v28 = vpop.f32.mrf.mxu1 }
 0x387   :  { %v1003_v54 = vmul.f32 0.35355338, %v992_v49  ;;  %1010 = vmax.xlane.f32.xlu0 %v1009_v51  ;;  %v1008_v60 = vadd.f32 %v1004_v53, %v7861_v57  ;;  %v827_v36 = vmul.f32 0.35355338, %v816_v28 }
 0x389   :  { %v1007_v58 = vadd.f32 %v1003_v54, %v7858_v52  ;;  %v1018_v61 = vsel %vm421_vm5, %v1008_v60, -inf  ;;  %v7880_v49 = vadd.f32 %v827_v36, %v7858_v52  ;;  %v7887_v54 = vadd.f32 %v828_v45, %v7861_v57 }
 0x38b   :  { %v1015_v59 = vsel %vm421_vm5, %v1007_v58, -inf  ;;  %v839_v53 = vsel %vm421_vm5, %v7880_v49, -inf }
 0x38c   :  { %1016 = vmax.xlane.f32.xlu0 %v1015_v59 }
 0x390   :  { %1019 = vmax.xlane.f32.xlu0 %v1018_v61 }
 0x40e   :  { %v1014_v62 = vpop.xlane.xlu1 %1013 }
 0x40f   :  { %v1022_v63 = vsub.f32 %v1006_v44, %v1014_v62  ;;  %v7874_v44 = vadd.f32 %v826_v32, %v7848_v37 }
 0x410   :  { %v1011_v0 = vpop.xlane.xlu0 %1010 }
 0x411   :  { %v1027_v2 = vmul.f32 1.442695, %v1022_v63  ;;  %v1021_v4 = vsub.f32 %v1005_v47, %v1011_v0  ;;  %v833_v47 = vsel %vm421_vm5, %v7871_v39, -inf  ;;  %v836_v51 = vsel %vm421_vm5, %v7874_v44, -inf }
 0x413   :  { %6938 = vpow2.f32 %v1027_v2  ;;  %v1025_v5 = vmul.f32 1.442695, %v1021_v4 }
 0x415   :  { %6940 = vpow2.f32 %v1025_v5  ;;  %v1017_v6 = vpop.xlane.xlu0 %1016 }
 0x416   :  { %v1023_v8 = vsub.f32 %v1007_v58, %v1017_v6  ;;  %v842_v58 = vsel %vm421_vm5, %v7887_v54, -inf  ;;  %v1256_v6 = vsel %vm7821_vm12, %v7699_v3, 0.0 }
 0x418   :  { %v1029_v9 = vmul.f32 1.442695, %v1023_v8 }
 0x419   :  { %v1020_v12 = vpop.xlane.xlu0 %1019 }
 0x41a   :  { %6942 = vpow2.f32 %v1029_v9  ;;  %v1024_v13 = vsub.f32 %v1008_v60, %v1020_v12 }
 0x41c   :  { %v1031_v14 = vmul.f32 1.442695, %v1024_v13  ;;  %v1254_v13 = vsel %vm7821_vm12, %v7721_v11, 0.0 }
 0x41e   :  { %6944 = vpow2.f32 %v1031_v14 }
 0x420   :  { %v6939_v17 = vpop.eup %6938 }
 0x421   :  { %v1036_v23 = vsel %vm421_vm5, %v6939_v17, 0.0 }
 0x422   :  { %v6941_v24 = vpop.eup %6940  ;;  %1037 = vadd.xlane.f32.xlu0 %v1036_v23 }
 0x423   :  { %v1033_v25 = vsel %vm421_vm5, %v6941_v24, 0.0 }
 0x424   :  { %1034 = vadd.xlane.f32.xlu1 %v1033_v25 }
 0x427   :  { %v6943_v31 = vpop.eup %6942 }
 0x428   :  { %v1039_v38 = vsel %vm421_vm5, %v6943_v31, 0.0 }
 0x429   :  { %1040 = vadd.xlane.f32.xlu1 %v1039_v38 }
 0x42b   :  { %v6945_v43 = vpop.eup %6944 }
 0x42c   :  { %v1042_v46 = vsel %vm421_vm5, %v6945_v43, 0.0 }
 0x42d   :  { %1043 = vadd.xlane.f32.xlu0 %v1042_v46  ;;  %834 = vmax.xlane.f32.xlu1 %v833_v47 }
 0x431   :  { %837 = vmax.xlane.f32.xlu0 %v836_v51  ;;  %840 = vmax.xlane.f32.xlu1 %v839_v53 }
 0x435   :  { %843 = vmax.xlane.f32.xlu0 %v842_v58 }
 0x4ab   :  { %v1038_v59 = vpop.xlane.xlu0 %1037 }
 0x4ac   :  { %6946 = vrcp.f32 %v1038_v59 }
 0x4ad   :  { %v1035_v60 = vpop.xlane.xlu1 %1034 }
 0x4ae   :  { %6948 = vrcp.f32 %v1035_v60 }
 0x4b2   :  { %v1041_v61 = vpop.xlane.xlu1 %1040 }
 0x4b3   :  { %6950 = vrcp.f32 %v1041_v61 }
 0x4b6   :  { %v1044_v62 = vpop.xlane.xlu0 %1043 }
 0x4b7   :  { %6952 = vrcp.f32 %v1044_v62 }
 0x4b9   :  { %v6947_v63 = vpop.eup %6946 }
 0x4ba   :  { %v1048_v4 = vmul.f32 %v6947_v63, %v6939_v17  ;;  %v1252_v17 = vsel %vm7821_vm12, %v7747_v22, 0.0  ;;  %v838_v23 = vpop.xlane.xlu0 %837 }
 0x4bb   :  { %v6949_v0 = vpop.eup %6948  ;;  %v846_v27 = vsub.f32 %v7874_v44, %v838_v23 }
 0x4bc   :  { %v1046_v2 = vmul.f32 %v6949_v0, %v6941_v24  ;;  %v835_v24 = vpop.xlane.xlu1 %834 }
 0x4bd   :  { %v851_v38 = vmul.f32 1.442695, %v846_v27 }
 0x4be   :  { %6416 = vmatprep.mubr.msk.f32.mxu1 %vm421_vm5, %v1046_v2  ;;  %v844_v28 = vpop.xlane.xlu0 %843 }
 0x4bf   :  { %6417 = vmatmul.mubr.msk.f32.vlgmr.msra.gmra.mxu1 %vm421_vm5, %v1048_v4  ;;  %6954 = vpow2.f32 %v851_v38 }
 0x4c0   :  { %v6951_v5 = vpop.eup %6950  ;;  %6437 = vmatpush3.xpose.msk.msra.mxu1 %vm421_vm5, %v7840_v35  ;;  %v1250_v35 = vsel %vm7821_vm12, %v7682_v55, 0.0  ;;  %v841_v32 = vpop.xlane.xlu1 %840 }
 0x4c1   :  { %6438 = vmatprep.subr.msk.mxu1 %vm421_vm5, %v1256_v6  ;;  %v1050_v8 = vmul.f32 %v6951_v5, %v6943_v31  ;;  %v845_v31 = vsub.f32 %v7871_v39, %v835_v24  ;;  %v847_v47 = vsub.f32 %v7880_v49, %v841_v32 }
 0x4c3   :  { %6419 = vmatprep.mubr.msk.f32.mxu1 %vm421_vm5, %v1050_v8  ;;  %v849_v46 = vmul.f32 1.442695, %v845_v31  ;;  %v853_v44 = vmul.f32 1.442695, %v847_v47 }
 0x4c4   :  { %v6953_v9 = vpop.eup %6952  ;;  %6439 = vmatpush3.xpose.msk.msra.mxu1 %vm421_vm5, %v1256_v6 }
 0x4c5   :  { %6440 = vmatprep.subr.msk.mxu1 %vm421_vm5, %v1255_v10  ;;  %v1052_v12 = vmul.f32 %v6953_v9, %v6945_v43  ;;  %v848_v43 = vsub.f32 %v7887_v54, %v844_v28  ;;  %6956 = vpow2.f32 %v849_v46 }
 0x4c7   :  { %6420 = vmatmul.mubr.msk.f32.gmra.mxu1 %vm421_vm5, %v1052_v12  ;;  %v855_v51 = vmul.f32 1.442695, %v848_v43 }
 0x4c8   :  { %6441 = vmatpush3.xpose.msk.msra.mxu1 %vm421_vm5, %v1255_v10  ;;  %6444 = vmatprep.mubr.msk.f32.mxu1 %vm421_vm5, %v1250_v35 }
 0x4c9   :  { %6442 = vmatprep.subr.msk.mxu1 %vm421_vm5, %v1254_v13  ;;  %6958 = vpow2.f32 %v855_v51 }
 0x4ca   :  { %6960 = vpow2.f32 %v853_v44 }
 0x4cc   :  { %6443 = vmatpush3.xpose.msk.msra.mxu1 %vm421_vm5, %v1254_v13  ;;  %v6955_v9 = vpop.eup %6954 }
 0x4cd   :  { %6478 = vmatprep.subr.msk.mxu1 %vm7918_vm15, %v7745_v21  ;;  %v860_v35 = vsel %vm421_vm5, %v6955_v9, 0.0 }
 0x4cf   :  { %6445 = vmatmul.mubr.msk.f32.vlgmr.msra.gmra.mxu1 %vm421_vm5, %v1251_v16 }
 0x4d0   :  { %6447 = vmatprep.mubr.msk.f32.mxu1 %vm421_vm5, %v1252_v17  ;;  %6479 = vmatpush3.msk.msra.mxu1 %vm7918_vm15, %v7745_v21 }
 0x4d1   :  { %6480 = vmatprep.subr.msk.mxu1 %vm7918_vm15, %v7773_v29 }
 0x4d2   :  { %6481 = vmatpush3.msk.msra.mxu1 %vm7918_vm15, %v7773_v29  ;;  %v6957_v12 = vpop.eup %6956 }
 0x4d3   :  { %6448 = vmatmul.mubr.msk.f32.gmra.mxu1 %vm421_vm5, %v1253_v20  ;;  %6482 = vmatprep.subr.msk.mxu1 %vm7918_vm15, %v7789_v30  ;;  %v857_v16 = vsel %vm421_vm5, %v6957_v12, 0.0 }
 0x4d4   :  { %6483 = vmatpush3.msk.msra.mxu1 %vm7918_vm15, %v7789_v30 }
 0x4d5   :  { %6484 = vmatprep.subr.msk.mxu1 %vm7918_vm15, %v7807_v33 }
 0x4d6   :  { %6485 = vmatpush3.msk.msra.mxu1 %vm7918_vm15, %v7807_v33  ;;  %v6959_v13 = vpop.eup %6958 }
 0x4d7   :  { %v6961_v17 = vpop.eup %6960  ;;  %v866_v20 = vsel %vm421_vm5, %v6959_v13, 0.0 }
 0x4d8   :  { %v863_v23 = vsel %vm421_vm5, %v6961_v17, 0.0 }
 0x57f   :  { %v7958_v25 = vpop.f32.mrf.mxu1 }
 0x581   :  { %v7962_v36 = vpop.f32.mrf.mxu1 }
 0x587   :  { %v7965_v45 = vpop.f32.mrf.mxu1 }
 0x589   :  { %v7968_v53 = vpop.f32.mrf.mxu1 }
 0x58f   :  { %v6446_v58 = vpop.f32.mrf.mxu1 }
 0x590   :  { %v1372_v39 = vmul.f32 0.35355338, %v6446_v58 }
 0x591   :  { %v1352_v59 = vpop.f32.mrf.mxu1 }
 0x592   :  { %v1371_v60 = vmul.f32 0.35355338, %v1352_v59  ;;  %v1376_v61 = vadd.f32 %v1372_v39, %v7848_v37 }
 0x593   :  { %v6449_v54 = vpop.f32.mrf.mxu1 }
 0x594   :  { %v1374_v62 = vmul.f32 0.35355338, %v6449_v54  ;;  %v1382_v63 = vsel %vm421_vm5, %v1376_v61, -inf  ;;  %v1375_v49 = vadd.f32 %v1371_v60, %v7851_v42 }
 0x595   :  { %1383 = vmax.xlane.f32.xlu0 %v1382_v63  ;;  %v1362_v0 = vpop.f32.mrf.mxu1 }
 0x596   :  { %v1373_v2 = vmul.f32 0.35355338, %v1362_v0  ;;  %v1379_v4 = vsel %vm421_vm5, %v1375_v49, -inf  ;;  %v1378_v5 = vadd.f32 %v1374_v62, %v7861_v57 }
 0x597   :  { %1380 = vmax.xlane.f32.xlu1 %v1379_v4 }
 0x598   :  { %v1388_v6 = vsel %vm421_vm5, %v1378_v5, -inf  ;;  %v1377_v8 = vadd.f32 %v1373_v2, %v7858_v52 }
 0x599   :  { %1389 = vmax.xlane.f32.xlu0 %v1388_v6 }
 0x59a   :  { %v1385_v10 = vsel %vm421_vm5, %v1377_v8, -inf }
 0x59b   :  { %1386 = vmax.xlane.f32.xlu1 %v1385_v10 }
 0x59d   :  { %861 = vadd.xlane.f32.xlu0 %v860_v35 }
 0x59f   :  { %858 = vadd.xlane.f32.xlu1 %v857_v16 }
 0x5a1   :  { %867 = vadd.xlane.f32.xlu0 %v866_v20 }
 0x5a3   :  { %864 = vadd.xlane.f32.xlu1 %v863_v23 }
 0x61e   :  { %v1384_v24 = vpop.xlane.xlu0 %1383 }
 0x61f   :  { %v1392_v27 = vsub.f32 %v1376_v61, %v1384_v24 }
 0x620   :  { %v1381_v28 = vpop.xlane.xlu1 %1380 }
 0x621   :  { %v1397_v31 = vmul.f32 1.442695, %v1392_v27  ;;  %v1391_v32 = vsub.f32 %v1375_v49, %v1381_v28 }
 0x622   :  { %v1390_v38 = vpop.xlane.xlu0 %1389 }
 0x623   :  { %6962 = vpow2.f32 %v1397_v31  ;;  %v1395_v43 = vmul.f32 1.442695, %v1391_v32  ;;  %v1394_v46 = vsub.f32 %v1378_v5, %v1390_v38 }
 0x624   :  { %v1387_v47 = vpop.xlane.xlu1 %1386 }
 0x625   :  { %6964 = vpow2.f32 %v1395_v43  ;;  %v1401_v51 = vmul.f32 1.442695, %v1394_v46  ;;  %v1393_v44 = vsub.f32 %v1377_v8, %v1387_v47  ;;  %v1527_v43 = vsel %vm7918_vm15, %v7682_v55, 0.0 }
 0x626   :  { %v862_v58 = vpop.xlane.xlu0 %861  ;;  %v1532_v46 = vsel %vm7918_vm15, %v7709_v7, 0.0  ;;  %v1528_v55 = vsel %vm7918_vm15, %v7743_v19, 0.0  ;;  %v1529_v7 = vsel %vm7918_vm15, %v7747_v22, 0.0 }
 0x627   :  { %6966 = vpow2.f32 %v1401_v51  ;;  %v1399_v39 = vmul.f32 1.442695, %v1393_v44 }
 0x628   :  { %6968 = vrcp.f32 %v862_v58  ;;  %v859_v59 = vpop.xlane.xlu1 %858 }
 0x629   :  { %6970 = vpow2.f32 %v1399_v39 }
 0x62a   :  { %6972 = vrcp.f32 %v859_v59  ;;  %v868_v60 = vpop.xlane.xlu0 %867 }
 0x62b   :  { %6974 = vrcp.f32 %v868_v60 }
 0x62c   :  { %v865_v61 = vpop.xlane.xlu1 %864 }
 0x62d   :  { %6976 = vrcp.f32 %v865_v61 }
 0x630   :  { %v6963_v54 = vpop.eup %6962 }
 0x631   :  { %v1406_v62 = vsel %vm421_vm5, %v6963_v54, 0.0 }
 0x632   :  { %v6965_v63 = vpop.eup %6964  ;;  %1407 = vadd.xlane.f32.xlu0 %v1406_v62 }
 0x633   :  { %v1403_v49 = vsel %vm421_vm5, %v6965_v63, 0.0 }
 0x634   :  { %v6967_v0 = vpop.eup %6966  ;;  %1404 = vadd.xlane.f32.xlu1 %v1403_v49 }
 0x635   :  { %v6969_v2 = vpop.eup %6968  ;;  %v1412_v4 = vsel %vm421_vm5, %v6967_v0, 0.0 }
 0x636   :  { %v6971_v5 = vpop.eup %6970  ;;  %1413 = vadd.xlane.f32.xlu0 %v1412_v4  ;;  %v872_v16 = vmul.f32 %v6969_v2, %v6955_v9 }
 0x637   :  { %v6973_v6 = vpop.eup %6972  ;;  %v1409_v8 = vsel %vm421_vm5, %v6971_v5, 0.0 }
 0x638   :  { %1410 = vadd.xlane.f32.xlu1 %v1409_v8  ;;  %v870_v10 = vmul.f32 %v6973_v6, %v6957_v12  ;;  %v6975_v35 = vpop.eup %6974 }
 0x639   :  { %v876_v24 = vmul.f32 %v6975_v35, %v6959_v13 }
 0x63a   :  { %v6977_v20 = vpop.eup %6976  ;;  %6430 = vmatprep.mubr.msk.f32.mxu0 %vm421_vm5, %v870_v10 }
 0x63b   :  { %6431 = vmatmul.mubr.msk.f32.vlgmr.msra.gmra.mxu0 %vm421_vm5, %v872_v16  ;;  %v874_v23 = vmul.f32 %v6977_v20, %v6961_v17 }
 0x63c   :  { %6451 = vmatpush3.msk.msra.mxu0 %vm7821_vm12, %v7745_v21  ;;  %v1534_v21 = vsel %vm7918_vm15, %v7697_v1, 0.0  ;;  %v1533_v1 = vsel %vm7918_vm15, %v7699_v3, 0.0  ;;  %v1531_v3 = vsel %vm7918_vm15, %v7721_v11, 0.0  ;;  %v1530_v11 = vsel %vm7918_vm15, %v7763_v26, 0.0 }
 0x63d   :  { %6452 = vmatprep.subr.msk.mxu0 %vm7821_vm12, %v7773_v29  ;;  %6433 = vmatprep.mubr.msk.f32.mxu0 %vm421_vm5, %v874_v23 }
 0x63e   :  { %6453 = vmatpush3.msk.msra.mxu0 %vm7821_vm12, %v7773_v29 }
 0x63f   :  { %6454 = vmatprep.subr.msk.mxu0 %vm7821_vm12, %v7789_v30  ;;  %6434 = vmatmul.mubr.msk.f32.gmra.mxu0 %vm421_vm5, %v876_v24 }
 0x640   :  { %6455 = vmatpush3.msk.msra.mxu0 %vm7821_vm12, %v7789_v30 }
 0x641   :  { %6456 = vmatprep.subr.msk.mxu0 %vm7821_vm12, %v7807_v33 }
 0x642   :  { %6457 = vmatpush3.msk.msra.mxu0 %vm7821_vm12, %v7807_v33 }
 0x643   :  { %6464 = vmatprep.subr.msk.mxu0 %vm421_vm5, %v1534_v21 }
 0x6bb   :  { %v1408_v29 = vpop.xlane.xlu0 %1407 }
 0x6bc   :  { %6978 = vrcp.f32 %v1408_v29 }
 0x6bd   :  { %v1405_v9 = vpop.xlane.xlu1 %1404 }
 0x6be   :  { %6980 = vrcp.f32 %v1405_v9 }
 0x6bf   :  { %v1414_v12 = vpop.xlane.xlu0 %1413 }
 0x6c0   :  { %6982 = vrcp.f32 %v1414_v12 }
 0x6c1   :  { %v1411_v30 = vpop.xlane.xlu1 %1410 }
 0x6c2   :  { %6984 = vrcp.f32 %v1411_v30 }
 0x6c9   :  { %v6979_v13 = vpop.eup %6978 }
 0x6ca   :  { %v1418_v28 = vmul.f32 %v6979_v13, %v6963_v54 }
 0x6cb   :  { %v6981_v17 = vpop.eup %6980 }
 0x6cc   :  { %v1416_v27 = vmul.f32 %v6981_v17, %v6965_v63 }
 0x6cd   :  { %v6983_v31 = vpop.eup %6982 }
 0x6ce   :  { %6458 = vmatprep.mubr.msk.f32.mxu0 %vm421_vm5, %v1416_v27  ;;  %v1422_v38 = vmul.f32 %v6983_v31, %v6967_v0 }
 0x6cf   :  { %v6985_v33 = vpop.eup %6984  ;;  %6459 = vmatmul.mubr.msk.f32.vlgmr.msra.gmra.mxu0 %vm421_vm5, %v1418_v28 }
 0x6d0   :  { %6465 = vmatpush3.xpose.msk.msra.mxu0 %vm421_vm5, %v1534_v21  ;;  %v1420_v32 = vmul.f32 %v6985_v33, %v6971_v5 }
 0x6d1   :  { %6466 = vmatprep.subr.msk.mxu0 %vm421_vm5, %v1533_v1 }
 0x6d2   :  { %6461 = vmatprep.mubr.msk.f32.mxu0 %vm421_vm5, %v1420_v32 }
 0x6d3   :  { %6462 = vmatmul.mubr.msk.f32.gmra.mxu0 %vm421_vm5, %v1422_v38 }
 0x6d4   :  { %6467 = vmatpush3.xpose.msk.msra.mxu0 %vm421_vm5, %v1533_v1  ;;  %6472 = vmatprep.mubr.msk.f32.mxu0 %vm421_vm5, %v1527_v43 }
 0x6d5   :  { %6468 = vmatprep.subr.msk.mxu0 %vm421_vm5, %v1532_v46 }
 0x6d8   :  { %6469 = vmatpush3.xpose.msk.msra.mxu0 %vm421_vm5, %v1532_v46 }
 0x6d9   :  { %6470 = vmatprep.subr.msk.mxu0 %vm421_vm5, %v1531_v3 }
 0x6dc   :  { %6471 = vmatpush3.xpose.msk.msra.mxu0 %vm421_vm5, %v1531_v3  ;;  %v413_v3 = vld [vmem:[%s7447_s24 + $0x18] sm:$0xff] }
 0x6dd   :  { %6492 = vmatprep.subr.mxu1 %v413_v3 }
 0x6df   :  { %6473 = vmatmul.mubr.msk.f32.vlgmr.msra.gmra.mxu0 %vm421_vm5, %v1528_v55 }
 0x6e0   :  { %6475 = vmatprep.mubr.msk.f32.mxu0 %vm421_vm5, %v1529_v7 }
 0x6e3   :  { %6476 = vmatmul.mubr.msk.f32.gmra.mxu0 %vm421_vm5, %v1530_v11 }
 0x6fb   :  { %v6432_v47 = vpop.f32.mrf.mxu0 }
 0x6fc   :  { %v1234_v19 = vadd.f32 %v6432_v47, %v7958_v25 }
 0x6fd   :  { %v1228_v51 = vpop.f32.mrf.mxu0 }
 0x6fe   :  { %v1229_v59 = vadd.f32 %v1228_v51, %v7962_v36 }
 0x6ff   :  { %v6435_v44 = vpop.f32.mrf.mxu0 }
 0x700   :  { %v1244_v61 = vadd.f32 %v6435_v44, %v7965_v45 }
 0x701   :  { %v8051_v58 = vpop.f32.mrf.mxu0 }
 0x78f   :  { %v6460_v39 = vpop.f32.mrf.mxu0 }
 0x790   :  { %v8055_v60 = vadd.f32 %v6460_v39, %v1234_v19 }
 0x791   :  { %v1501_v22 = vpop.f32.mrf.mxu0 }
 0x792   :  { %v8058_v54 = vadd.f32 %v1501_v22, %v1229_v59  ;;  %v412_v22 = vld [vmem:[%s7447_s24 + $0x10] sm:$0xff] }
 0x793   :  { %v6463_v26 = vpop.f32.mrf.mxu0 }
 0x794   :  { %v8060_v62 = vadd.f32 %v6463_v26, %v1244_v61 }
 0x795   :  { %v8062_v63 = vpop.f32.mrf.mxu0 }
 0x79f   :  { %v6474_v49 = vpop.f32.mrf.mxu0 }
 0x7a0   :  { %v1649_v0 = vmul.f32 0.35355338, %v6474_v49 }
 0x7a1   :  { %v1629_v2 = vpop.f32.mrf.mxu0 }
 0x7a2   :  { %v1648_v4 = vmul.f32 0.35355338, %v1629_v2  ;;  %v1653_v25 = vadd.f32 %v1649_v0, %v7848_v37  ;;  %v411_v0 = vld [vmem:[%s7447_s24 + $0x8] sm:$0xff]  ;;  %v410_v2 = vld [vmem:[%s7447_s24] sm:$0xff]  ;;  %s9254_s24 = sld [smem:[#allocation24_spill]] }
 0x7a3   :  { %v6477_v5 = vpop.f32.mrf.mxu0 }
 0x7a4   :  { %v1651_v36 = vmul.f32 0.35355338, %v6477_v5  ;;  %v1659_v6 = vsel %vm421_vm5, %v1653_v25, -inf  ;;  %v1652_v8 = vadd.f32 %v1648_v4, %v7851_v42  ;;  %v1239_v5 = vadd.f32 %v8051_v58, %v7968_v53  ;;  %v5793_v53 = vld [vmem:[#allocation7] ss:$0 sm:$0xff] }
 0x7a5   :  { %1660 = vmax.xlane.f32.xlu0 %v1659_v6  ;;  %v1639_v45 = vpop.f32.mrf.mxu0 }
 0x7a6   :  { %v1650_v10 = vmul.f32 0.35355338, %v1639_v45  ;;  %v1656_v35 = vsel %vm421_vm5, %v1652_v8, -inf  ;;  %v1655_v16 = vadd.f32 %v1651_v36, %v7861_v57  ;;  %v1522_v45 = vadd.f32 %v8062_v63, %v1239_v5 }
 0x7a7   :  { %1657 = vmax.xlane.f32.xlu1 %v1656_v35 }
 0x7a8   :  { %v1665_v20 = vsel %vm421_vm5, %v1655_v16, -inf  ;;  %v1654_v23 = vadd.f32 %v1650_v10, %v7858_v52 }
 0x7a9   :  { %1666 = vmax.xlane.f32.xlu0 %v1665_v20 }
 0x7aa   :  { %v1662_v37 = vsel %vm421_vm5, %v1654_v23, -inf }
 0x7ab   :  { %1663 = vmax.xlane.f32.xlu1 %v1662_v37 }
 0x82e   :  { %v1661_v24 = vpop.xlane.xlu0 %1660 }
 0x82f   :  { %v1669_v21 = vsub.f32 %v1653_v25, %v1661_v24 }
 0x830   :  { %v1658_v29 = vpop.xlane.xlu1 %1657 }
 0x831   :  { %v1674_v42 = vmul.f32 1.442695, %v1669_v21  ;;  %v1668_v9 = vsub.f32 %v1652_v8, %v1658_v29 }
 0x832   :  { %v1667_v12 = vpop.xlane.xlu0 %1666 }
 0x833   :  { %6986 = vpow2.f32 %v1674_v42  ;;  %v1672_v30 = vmul.f32 1.442695, %v1668_v9  ;;  %v1671_v13 = vsub.f32 %v1655_v16, %v1667_v12 }
 0x834   :  { %v1664_v17 = vpop.xlane.xlu1 %1663 }
 0x835   :  { %6988 = vpow2.f32 %v1672_v30  ;;  %v1678_v57 = vmul.f32 1.442695, %v1671_v13  ;;  %v1670_v27 = vsub.f32 %v1654_v23, %v1664_v17 }
 0x837   :  { %6990 = vpow2.f32 %v1678_v57  ;;  %v1676_v52 = vmul.f32 1.442695, %v1670_v27 }
 0x839   :  { %6992 = vpow2.f32 %v1676_v52 }
 0x840   :  { %v6987_v28 = vpop.eup %6986 }
 0x841   :  { %v1683_v31 = vsel %vm421_vm5, %v6987_v28, 0.0 }
 0x842   :  { %v6989_v33 = vpop.eup %6988  ;;  %1684 = vadd.xlane.f32.xlu0 %v1683_v31 }
 0x843   :  { %v1680_v1 = vsel %vm421_vm5, %v6989_v33, 0.0 }
 0x844   :  { %v6991_v32 = vpop.eup %6990  ;;  %1681 = vadd.xlane.f32.xlu1 %v1680_v1 }
 0x845   :  { %v1689_v38 = vsel %vm421_vm5, %v6991_v32, 0.0 }
 0x846   :  { %v6993_v43 = vpop.eup %6992  ;;  %1690 = vadd.xlane.f32.xlu0 %v1689_v38 }
 0x847   :  { %v1686_v46 = vsel %vm421_vm5, %v6993_v43, 0.0 }
 0x848   :  { %1687 = vadd.xlane.f32.xlu1 %v1686_v46 }
 0x8cb   :  { %v1685_v55 = vpop.xlane.xlu0 %1684 }
 0x8cc   :  { %6994 = vrcp.f32 %v1685_v55 }
 0x8cd   :  { %v1682_v7 = vpop.xlane.xlu1 %1681 }
 0x8ce   :  { %6996 = vrcp.f32 %v1682_v7 }
 0x8cf   :  { %v1691_v11 = vpop.xlane.xlu0 %1690 }
 0x8d0   :  { %6998 = vrcp.f32 %v1691_v11 }
 0x8d1   :  { %v1688_v47 = vpop.xlane.xlu1 %1687 }
 0x8d2   :  { %7000 = vrcp.f32 %v1688_v47  ;;  %v1986_v47 = vld [vmem:[%s7467_s20 + $0x18] sm:$0xff] }
 0x8d3   :  { %6506 = vmatprep.subr.mxu0 %v1986_v47 }
 0x8d4   :  { %6507 = vmatpush3.msra.mxu0 %v1986_v47 }
 0x8d9   :  { %v6995_v51 = vpop.eup %6994 }
 0x8da   :  { %v1695_v39 = vmul.f32 %v6995_v51, %v6987_v28  ;;  %v1985_v51 = vld [vmem:[%s7467_s20 + $0x10] sm:$0xff] }
 0x8db   :  { %v6997_v44 = vpop.eup %6996  ;;  %6508 = vmatprep.subr.mxu0 %v1985_v51 }
 0x8dc   :  { %v1693_v19 = vmul.f32 %v6997_v44, %v6989_v33  ;;  %v1984_v44 = vld [vmem:[%s7467_s20 + $0x8] sm:$0xff]  ;;  %6509 = vmatpush3.msra.mxu0 %v1985_v51 }
 0x8dd   :  { %v6999_v59 = vpop.eup %6998  ;;  %6510 = vmatprep.subr.mxu0 %v1984_v44 }
 0x8de   :  { %6486 = vmatprep.mubr.msk.f32.mxu1 %vm421_vm5, %v1693_v19  ;;  %v1699_v49 = vmul.f32 %v6999_v59, %v6991_v32  ;;  %v1983_v19 = vld [vmem:[%s7467_s20] sm:$0xff]  ;;  %6511 = vmatpush3.msra.mxu0 %v1984_v44  ;;  %v1994_v59 = vld [vmem:[%s9247_s5 + $0x30] sm:$0xff]  ;;  %s9257_s20 = sld [smem:[#allocation29_spill]] }
 0x8df   :  { %v7001_v61 = vpop.eup %7000  ;;  %6487 = vmatmul.mubr.msk.f32.vlgmr.msra.gmra.mxu1 %vm421_vm5, %v1695_v39  ;;  %6512 = vmatprep.subr.mxu0 %v1983_v19  ;;  %v1995_v39 = vld [vmem:[%s9247_s5 + $0x38] sm:$0xff] }
 0x8e0   :  { %v1697_v26 = vmul.f32 %v7001_v61, %v6993_v43  ;;  %6493 = vmatpush3.msra.mxu1 %v413_v3  ;;  %6513 = vmatpush3.msra.mxu0 %v1983_v19  ;;  %v1992_v61 = vld [vmem:[%s9247_s5 + $0x20] sm:$0xff] }
 0x8e1   :  { %6494 = vmatprep.subr.mxu1 %v412_v22 }
 0x8e2   :  { %6489 = vmatprep.mubr.msk.f32.mxu1 %vm421_vm5, %v1697_v26  ;;  %6495 = vmatpush3.msra.mxu1 %v412_v22  ;;  %v1993_v22 = vld [vmem:[%s9247_s5 + $0x28] sm:$0xff] }
 0x8e3   :  { %6490 = vmatmul.mubr.msk.f32.gmra.mxu1 %vm421_vm5, %v1699_v49  ;;  %6496 = vmatprep.subr.mxu1 %v411_v0 }
 0x8e4   :  { %6497 = vmatpush3.msra.mxu1 %v411_v0 }
 0x8e5   :  { %6498 = vmatprep.subr.mxu1 %v410_v2 }
 0x8e6   :  { %6499 = vmatpush3.msra.mxu1 %v410_v2 }
 0x8e7   :  { %6520 = vmatprep.subr.mxu1 %v1995_v39 }
 0x99f   :  { %v6488_v4 = vpop.f32.mrf.mxu1 }
 0x9a0   :  { %v1798_v6 = vadd.f32 %v6488_v4, %v8055_v60 }
 0x9a1   :  { %v1778_v25 = vpop.f32.mrf.mxu1 }
 0x9a2   :  { %v1797_v36 = vadd.f32 %v1778_v25, %v8058_v54 }
 0x9a3   :  { %v6491_v8 = vpop.f32.mrf.mxu1 }
 0x9a4   :  { %6500 = vmatprep.mubr.msk.f32.mxu1 %vm421_vm5, %v1797_v36  ;;  %v1800_v16 = vadd.f32 %v6491_v8, %v8060_v62 }
 0x9a5   :  { %v1788_v10 = vpop.f32.mrf.mxu1  ;;  %6501 = vmatmul.mubr.msk.f32.vlgmr.msra.gmra.mxu1 %vm421_vm5, %v1798_v6 }
 0x9a6   :  { %v1799_v35 = vadd.f32 %v1788_v10, %v1522_v45  ;;  %6521 = vmatpush3.msra.mxu1 %v1995_v39 }
 0x9a7   :  { %6522 = vmatprep.subr.mxu1 %v1994_v59 }
 0x9a8   :  { %6503 = vmatprep.mubr.msk.f32.mxu1 %vm421_vm5, %v1799_v35  ;;  %6523 = vmatpush3.msra.mxu1 %v1994_v59 }
 0x9a9   :  { %6504 = vmatmul.mubr.msk.f32.gmra.mxu1 %vm421_vm5, %v1800_v16  ;;  %6524 = vmatprep.subr.mxu1 %v1993_v22 }
 0x9aa   :  { %6525 = vmatpush3.msra.mxu1 %v1993_v22 }
 0x9ab   :  { %6526 = vmatprep.subr.mxu1 %v1992_v61 }
 0x9ac   :  { %6527 = vmatpush3.msra.mxu1 %v1992_v61 }
 0xa65   :  { %v6502_v58 = vpop.f32.mrf.mxu1 }
 0xa66   :  { %v1891_v54 = vadd.f32 %v6502_v58, %v5793_v53 }
 0xa67   :  { %v1885_v20 = vpop.f32.mrf.mxu1 }
 0xa68   :  { %v1886_v60 = vadd.f32 %v5793_v53, %v1885_v20  ;;  %v1905_v23 = vadd.f32 %v1891_v54, %v7644_v41 }
 0xa69   :  { %v6505_v63 = vpop.f32.mrf.mxu1 }
 0xa6a   :  { %v1901_v37 = vadd.f32 %v6505_v63, %v5793_v53  ;;  %v1913_v24 = vsel %vm421_vm5, %v1905_v23, 0.0  ;;  %v1904_v21 = vadd.f32 %v1886_v60, %v7642_v40 }
 0xa6b   :  { %1914 = vadd.xlane.f32.xlu0 %v1913_v24  ;;  %v1895_v29 = vpop.f32.mrf.mxu1 }
 0xa6c   :  { %v1896_v62 = vadd.f32 %v5793_v53, %v1895_v29  ;;  %v1910_v42 = vsel %vm421_vm5, %v1904_v21, 0.0  ;;  %v1907_v9 = vadd.f32 %v1901_v37, %v7660_v50  ;;  %v5798_v53 = vld [vmem:[%s9248_s13] ss:$0 sm:$0xff] }
 0xa6d   :  { %1911 = vadd.xlane.f32.xlu1 %v1910_v42 }
 0xa6e   :  { %v1919_v12 = vsel %vm421_vm5, %v1907_v9, 0.0  ;;  %v1906_v30 = vadd.f32 %v1896_v62, %v7657_v48 }
 0xa6f   :  { %1920 = vadd.xlane.f32.xlu0 %v1919_v12 }
 0xa70   :  { %v1916_v41 = vsel %vm421_vm5, %v1906_v30, 0.0 }
 0xa71   :  { %1917 = vadd.xlane.f32.xlu1 %v1916_v41  ;;  %v1991_v41 = vld [vmem:[%s9247_s5 + $0x18] sm:$0xff] }
 0xa72   :  { %6528 = vmatprep.subr.mxu1 %v1991_v41 }
 0xa73   :  { %6529 = vmatpush3.msra.mxu1 %v1991_v41  ;;  %v2296_v41 = vld [vmem:[%s9252_s3 + $0x8] sm:$0xff] }
 0xaf4   :  { %v1915_v13 = vpop.xlane.xlu0 %1914 }
 0xaf5   :  { %v1924_v17 = vmul.f32 0.03125, %v1915_v13  ;;  %v1990_v13 = vld [vmem:[%s9247_s5 + $0x10] sm:$0xff] }
 0xaf6   :  { %v1912_v57 = vpop.xlane.xlu1 %1911  ;;  %6530 = vmatprep.subr.mxu1 %v1990_v13 }
 0xaf7   :  { %v1928_v40 = vsub.f32 %v1905_v23, %v1924_v17  ;;  %v1923_v27 = vmul.f32 0.03125, %v1912_v57  ;;  %v5799_v23 = vld [vmem:[%s9249_s17] ss:$0 sm:$0xff]  ;;  %6531 = vmatpush3.msra.mxu1 %v1990_v13  ;;  %v1989_v17 = vld [vmem:[%s9247_s5 + $0x8] sm:$0xff] }
 0xaf8   :  { %v1921_v52 = vpop.xlane.xlu0 %1920  ;;  %6532 = vmatprep.subr.mxu1 %v1989_v17  ;;  %v1988_v57 = vld [vmem:[%s9247_s5] sm:$0xff] }
 0xaf9   :  { %v1927_v28 = vsub.f32 %v1904_v21, %v1923_v27  ;;  %v1926_v31 = vmul.f32 0.03125, %v1921_v52  ;;  %v1932_v33 = vmul.f32 %v1928_v40, %v1928_v40  ;;  %6533 = vmatpush3.msra.mxu1 %v1989_v17  ;;  %v2285_v13 = vld [vmem:[%s9251_s29] sm:$0xff] }
 0xafa   :  { %v1918_v50 = vpop.xlane.xlu1 %1917  ;;  %6534 = vmatprep.subr.mxu1 %v1988_v57  ;;  %v2295_v17 = vld [vmem:[%s9252_s3] sm:$0xff] }
 0xafb   :  { %v8102_v1 = vsub.f32 %v1907_v9, %v1926_v31  ;;  %v1925_v32 = vmul.f32 0.03125, %v1918_v50  ;;  %v1938_v48 = vsel %vm421_vm5, %v1932_v33, 0.0  ;;  %v1931_v38 = vmul.f32 %v1927_v28, %v1927_v28  ;;  %6535 = vmatpush3.msra.mxu1 %v1988_v57  ;;  %v2293_v57 = vld [vmem:[%s9253_s14 + $0x18] sm:$0xff] }
 0xafc   :  { %1939 = vadd.xlane.f32.xlu0 %v1938_v48 }
 0xafd   :  { %v1929_v43 = vsub.f32 %v1906_v30, %v1925_v32  ;;  %v1935_v46 = vsel %vm421_vm5, %v1931_v38, 0.0  ;;  %v1934_v3 = vmul.f32 %v8102_v1, %v8102_v1 }
 0xafe   :  { %1936 = vadd.xlane.f32.xlu1 %v1935_v46 }
 0xaff   :  { %v1944_v55 = vsel %vm421_vm5, %v1934_v3, 0.0  ;;  %v1933_v7 = vmul.f32 %v1929_v43, %v1929_v43  ;;  %v5805_v3 = vld [vmem:[%s9250_s25] ss:$0 sm:$0xff] }
 0xb00   :  { %1945 = vadd.xlane.f32.xlu0 %v1944_v55 }
 0xb01   :  { %v1941_v11 = vsel %vm421_vm5, %v1933_v7, 0.0 }
 0xb02   :  { %1942 = vadd.xlane.f32.xlu1 %v1941_v11 }
 0xb85   :  { %v1940_v26 = vpop.xlane.xlu0 %1939 }
 0xb86   :  { %v1948_v49 = vmul.f32 0.03125, %v1940_v26 }
 0xb87   :  { %v1937_v0 = vpop.xlane.xlu1 %1936 }
 0xb88   :  { %v1952_v2 = vadd.f32 1e-05, %v1948_v49  ;;  %v1947_v4 = vmul.f32 0.03125, %v1937_v0 }
 0xb89   :  { %v1946_v25 = vpop.xlane.xlu0 %1945 }
 0xb8a   :  { %7002 = vrsqrt.f32 %v1952_v2  ;;  %v1951_v5 = vadd.f32 1e-05, %v1947_v4  ;;  %v1950_v36 = vmul.f32 0.03125, %v1946_v25 }
 0xb8b   :  { %v1943_v6 = vpop.xlane.xlu1 %1942 }
 0xb8c   :  { %7004 = vrsqrt.f32 %v1951_v5  ;;  %v1954_v8 = vadd.f32 1e-05, %v1950_v36  ;;  %v1949_v45 = vmul.f32 0.03125, %v1943_v6 }
 0xb8e   :  { %7006 = vrsqrt.f32 %v1954_v8  ;;  %v1953_v10 = vadd.f32 1e-05, %v1949_v45 }
 0xb90   :  { %7008 = vrsqrt.f32 %v1953_v10 }
 0xb97   :  { %v7003_v35 = vpop.eup %7002 }
 0xb98   :  { %v1960_v16 = vmul.f32 %v7003_v35, %v1928_v40  ;;  %v5800_v40 = vld [vmem:[#allocation8] ss:$0 sm:$0xff] }
 0xb99   :  { %v7005_v58 = vpop.eup %7004 }
 0xb9a   :  { %v1959_v54 = vmul.f32 %v7005_v58, %v1927_v28  ;;  %v1970_v60 = vmul.f32 %v5798_v53, %v1960_v16 }
 0xb9b   :  { %v7007_v20 = vpop.eup %7006 }
 0xb9c   :  { %v1969_v63 = vmul.f32 %v5798_v53, %v1959_v54  ;;  %v1962_v37 = vmul.f32 %v7007_v20, %v8102_v1  ;;  %v1980_v62 = vadd.f32 %v5799_v23, %v1970_v60 }
 0xb9d   :  { %v7009_v24 = vpop.eup %7008 }
 0xb9e   :  { %v1979_v21 = vadd.f32 %v5799_v23, %v1969_v63  ;;  %v1961_v29 = vmul.f32 %v7009_v24, %v1929_v43  ;;  %v1972_v42 = vmul.f32 %v5798_v53, %v1962_v37 }
 0xba0   :  { %6514 = vmatprep.mubr.msk.f32.mxu0 %vm421_vm5, %v1979_v21  ;;  %v1971_v9 = vmul.f32 %v5798_v53, %v1961_v29  ;;  %v1982_v30 = vadd.f32 %v5799_v23, %v1972_v42  ;;  %v2298_v42 = vld [vmem:[%s9252_s3 + $0x18] sm:$0xff] }
 0xba1   :  { %6515 = vmatmul.mubr.msk.f32.vlgmr.msra.gmra.mxu0 %vm421_vm5, %v1980_v62  ;;  %6570 = vmatprep.subr.mxu1 %v2298_v42 }
 0xba2   :  { %v1981_v12 = vadd.f32 %v5799_v23, %v1971_v9  ;;  %v2287_v9 = vld [vmem:[%s9251_s29 + $0x10] sm:$0xff] }
 0xba4   :  { %6517 = vmatprep.mubr.msk.f32.mxu0 %vm421_vm5, %v1981_v12 }
 0xba5   :  { %6518 = vmatmul.mubr.msk.f32.gmra.mxu0 %vm421_vm5, %v1982_v30 }
 0xc61   :  { %v6516_v27 = vpop.f32.mrf.mxu0 }
 0xc62   :  { %v2087_v52 = vadd.f32 %v6516_v27, %v5800_v40 }
 0xc63   :  { %v2081_v28 = vpop.f32.mrf.mxu0 }
 0xc64   :  { %v2082_v31 = vadd.f32 %v5800_v40, %v2081_v28  ;;  %v2101_v1 = vmax.f32 %v2087_v52, 0.0 }
 0xc65   :  { %v6519_v33 = vpop.f32.mrf.mxu0 }
 0xc66   :  { %v2100_v50 = vmax.f32 %v2082_v31, 0.0  ;;  %v2097_v32 = vadd.f32 %v6519_v33, %v5800_v40 }
 0xc67   :  { %v2091_v48 = vpop.f32.mrf.mxu0 }
 0xc68   :  { %v2092_v38 = vadd.f32 %v5800_v40, %v2091_v48  ;;  %6536 = vmatprep.mubr.msk.f32.mxu1 %vm285_vm0, %v2100_v50  ;;  %v2103_v46 = vmax.f32 %v2097_v32, 0.0 }
 0xc69   :  { %6537 = vmatmul.mubr.msk.f32.vlgmr.msra.gmra.mxu1 %vm285_vm0, %v2101_v1 }
 0xc6a   :  { %v2102_v43 = vmax.f32 %v2092_v38, 0.0  ;;  %6571 = vmatpush3.msra.mxu1 %v2298_v42 }
 0xc6c   :  { %6539 = vmatprep.mubr.msk.f32.mxu1 %vm285_vm0, %v2102_v43 }
 0xc6d   :  { %6540 = vmatmul.mubr.msk.f32.gmra.mxu1 %vm285_vm0, %v2103_v46 }
 0xd29   :  { %v6538_v55 = vpop.f32.mrf.mxu1 }
 0xd2a   :  { %v2194_v7 = vadd.f32 %v6538_v55, %v5805_v3  ;;  %v5810_v55 = vld [vmem:[%s9254_s24] ss:$0 sm:$0xff] }
 0xd2b   :  { %v2188_v11 = vpop.f32.mrf.mxu1 }
 0xd2c   :  { %v2189_v47 = vadd.f32 %v5805_v3, %v2188_v11  ;;  %v2208_v51 = vadd.f32 %v2194_v7, %v1980_v62  ;;  %v2288_v62 = vld [vmem:[%s9251_s29 + $0x18] sm:$0xff] }
 0xd2d   :  { %v6541_v44 = vpop.f32.mrf.mxu1  ;;  %6542 = vmatprep.subr.mxu0 %v2288_v62 }
 0xd2e   :  { %v2204_v19 = vadd.f32 %v6541_v44, %v5805_v3  ;;  %v2216_v39 = vsel %vm421_vm5, %v2208_v51, 0.0  ;;  %v2207_v59 = vadd.f32 %v2189_v47, %v1979_v21  ;;  %6543 = vmatpush3.msra.mxu0 %v2288_v62  ;;  %v5811_v44 = vld [vmem:[%s9255_s6] ss:$0 sm:$0xff] }
 0xd2f   :  { %2217 = vadd.xlane.f32.xlu0 %v2216_v39  ;;  %v2198_v22 = vpop.f32.mrf.mxu1  ;;  %6544 = vmatprep.subr.mxu0 %v2287_v9 }
 0xd30   :  { %v2199_v61 = vadd.f32 %v5805_v3, %v2198_v22  ;;  %v2213_v26 = vsel %vm421_vm5, %v2207_v59, 0.0  ;;  %v2210_v49 = vadd.f32 %v2204_v19, %v1982_v30  ;;  %v2286_v30 = vld [vmem:[%s9251_s29 + $0x8] sm:$0xff]  ;;  %6545 = vmatpush3.msra.mxu0 %v2287_v9 }
 0xd31   :  { %2214 = vadd.xlane.f32.xlu1 %v2213_v26  ;;  %6546 = vmatprep.subr.mxu0 %v2286_v30 }
 0xd32   :  { %v2222_v0 = vsel %vm421_vm5, %v2210_v49, 0.0  ;;  %v2209_v2 = vadd.f32 %v2199_v61, %v1981_v12  ;;  %v2297_v12 = vld [vmem:[%s9252_s3 + $0x10] sm:$0xff]  ;;  %6547 = vmatpush3.msra.mxu0 %v2286_v30 }
 0xd33   :  { %2223 = vadd.xlane.f32.xlu0 %v2222_v0  ;;  %6572 = vmatprep.subr.mxu1 %v2297_v12 }
 0xd34   :  { %v2219_v4 = vsel %vm421_vm5, %v2209_v2, 0.0  ;;  %6573 = vmatpush3.msra.mxu1 %v2297_v12  ;;  %6548 = vmatprep.subr.mxu0 %v2285_v13 }
 0xd35   :  { %2220 = vadd.xlane.f32.xlu1 %v2219_v4  ;;  %6574 = vmatprep.subr.mxu1 %v2296_v41 }
 0xd36   :  { %6575 = vmatpush3.msra.mxu1 %v2296_v41  ;;  %6549 = vmatpush3.msra.mxu0 %v2285_v13 }
 0xd37   :  { %6576 = vmatprep.subr.mxu1 %v2295_v17  ;;  %6556 = vmatprep.subr.mxu0 %v2293_v57 }
 0xd38   :  { %6577 = vmatpush3.msra.mxu1 %v2295_v17 }
 0xdb8   :  { %v2218_v25 = vpop.xlane.xlu0 %2217 }
 0xdb9   :  { %v2226_v5 = vmul.f32 0.03125, %v2218_v25  ;;  %v2291_v25 = vld [vmem:[%s9253_s14 + $0x8] sm:$0xff] }
 0xdba   :  { %v2215_v36 = vpop.xlane.xlu1 %2214 }
 0xdbb   :  { %v8138_v6 = vsub.f32 %v2208_v51, %v2226_v5  ;;  %v2225_v8 = vmul.f32 0.03125, %v2215_v36  ;;  %v2290_v36 = vld [vmem:[%s9253_s14] sm:$0xff] }
 0xdbc   :  { %v2224_v45 = vpop.xlane.xlu0 %2223 }
 0xdbd   :  { %v8140_v10 = vsub.f32 %v2207_v59, %v2225_v8  ;;  %v2228_v35 = vmul.f32 0.03125, %v2224_v45  ;;  %v2234_v16 = vmul.f32 %v8138_v6, %v8138_v6  ;;  %v5812_v8 = vld [vmem:[%s9256_s12] ss:$0 sm:$0xff] }
 0xdbe   :  { %v2221_v53 = vpop.xlane.xlu1 %2220 }
 0xdbf   :  { %v8144_v58 = vsub.f32 %v2210_v49, %v2228_v35  ;;  %v2227_v54 = vmul.f32 0.03125, %v2221_v53  ;;  %v2240_v20 = vsel %vm421_vm5, %v2234_v16, 0.0  ;;  %v2233_v60 = vmul.f32 %v8140_v10, %v8140_v10  ;;  %v2292_v49 = vld [vmem:[%s9253_s14 + $0x10] sm:$0xff] }
 0xdc0   :  { %2241 = vadd.xlane.f32.xlu0 %v2240_v20 }
 0xdc1   :  { %v8149_v23 = vsub.f32 %v2209_v2, %v2227_v54  ;;  %v2237_v63 = vsel %vm421_vm5, %v2233_v60, 0.0  ;;  %v2236_v37 = vmul.f32 %v8144_v58, %v8144_v58  ;;  %v5817_v60 = vld [vmem:[%s9257_s20] ss:$0 sm:$0xff] }
 0xdc2   :  { %2238 = vadd.xlane.f32.xlu1 %v2237_v63 }
 0xdc3   :  { %v2246_v24 = vsel %vm421_vm5, %v2236_v37, 0.0  ;;  %v2235_v21 = vmul.f32 %v8149_v23, %v8149_v23 }
 0xdc4   :  { %2247 = vadd.xlane.f32.xlu0 %v2246_v24 }
 0xdc5   :  { %v2243_v29 = vsel %vm421_vm5, %v2235_v21, 0.0 }
 0xdc6   :  { %2244 = vadd.xlane.f32.xlu1 %v2243_v29 }
 0xe49   :  { %v2242_v40 = vpop.xlane.xlu0 %2241 }
 0xe4a   :  { %v2250_v27 = vmul.f32 0.03125, %v2242_v40 }
 0xe4b   :  { %v2239_v52 = vpop.xlane.xlu1 %2238 }
 0xe4c   :  { %v2254_v28 = vadd.f32 1e-05, %v2250_v27  ;;  %v2249_v31 = vmul.f32 0.03125, %v2239_v52 }
 0xe4d   :  { %v2248_v33 = vpop.xlane.xlu0 %2247 }
 0xe4e   :  { %7010 = vrsqrt.f32 %v2254_v28  ;;  %v2253_v50 = vadd.f32 1e-05, %v2249_v31  ;;  %v2252_v1 = vmul.f32 0.03125, %v2248_v33  ;;  %v5822_v28 = vld [vmem:[%s9258_s23] ss:$0 sm:$0xff] }
 0xe4f   :  { %v2245_v32 = vpop.xlane.xlu1 %2244 }
 0xe50   :  { %7012 = vrsqrt.f32 %v2253_v50  ;;  %v2256_v48 = vadd.f32 1e-05, %v2252_v1  ;;  %v2251_v38 = vmul.f32 0.03125, %v2245_v32 }
 0xe52   :  { %7014 = vrsqrt.f32 %v2256_v48  ;;  %v2255_v43 = vadd.f32 1e-05, %v2251_v38 }
 0xe54   :  { %7016 = vrsqrt.f32 %v2255_v43 }
 0xe5b   :  { %v7011_v46 = vpop.eup %7010 }
 0xe5c   :  { %v2262_v3 = vmul.f32 %v7011_v46, %v8138_v6 }
 0xe5d   :  { %v7013_v7 = vpop.eup %7012 }
 0xe5e   :  { %v2261_v11 = vmul.f32 %v7013_v7, %v8140_v10  ;;  %v2272_v51 = vmul.f32 %v5810_v55, %v2262_v3 }
 0xe5f   :  { %v7015_v47 = vpop.eup %7014 }
 0xe60   :  { %v2271_v19 = vmul.f32 %v5810_v55, %v2261_v11  ;;  %v2264_v39 = vmul.f32 %v7015_v47, %v8144_v58  ;;  %v8175_v26 = vadd.f32 %v5811_v44, %v2272_v51 }
 0xe61   :  { %v7017_v59 = vpop.eup %7016 }
 0xe62   :  { %v8172_v22 = vadd.f32 %v5811_v44, %v2271_v19  ;;  %v2263_v61 = vmul.f32 %v7017_v59, %v8149_v23  ;;  %v2274_v2 = vmul.f32 %v5810_v55, %v2264_v39  ;;  %v8366_v39 = vld [vmem:[%s7412_s21 + $0x8] sm:$0xff] }
 0xe64   :  { %6550 = vmatprep.mubr.msk.f32.mxu0 %vm421_vm5, %v8172_v22  ;;  %6578 = vmatprep.mubr.msk.f32.mxu1 %vm421_vm5, %v8172_v22  ;;  %v2273_v0 = vmul.f32 %v5810_v55, %v2263_v61  ;;  %v8191_v5 = vadd.f32 %v5811_v44, %v2274_v2 }
 0xe65   :  { %6551 = vmatmul.mubr.msk.f32.vlgmr.msra.gmra.mxu0 %vm421_vm5, %v8175_v26  ;;  %6579 = vmatmul.mubr.msk.f32.vlgmr.msra.gmra.mxu1 %vm421_vm5, %v8175_v26 }
 0xe66   :  { %6557 = vmatpush3.msra.mxu0 %v2293_v57  ;;  %v8186_v4 = vadd.f32 %v5811_v44, %v2273_v0  ;;  %v8371_v0 = vld [vmem:[%s7412_s21] sm:$0xff] }
 0xe67   :  { %6558 = vmatprep.subr.mxu0 %v2292_v49 }
 0xe68   :  { %6559 = vmatpush3.msra.mxu0 %v2292_v49  ;;  %6553 = vmatprep.mubr.msk.f32.mxu0 %vm421_vm5, %v8186_v4 }
 0xe69   :  { %6560 = vmatprep.subr.mxu0 %v2291_v25  ;;  %6581 = vmatprep.mubr.msk.f32.mxu1 %vm421_vm5, %v8186_v4 }
 0xe6a   :  { %6554 = vmatmul.mubr.msk.f32.gmra.mxu0 %vm421_vm5, %v8191_v5  ;;  %6582 = vmatmul.mubr.msk.f32.gmra.mxu1 %vm421_vm5, %v8191_v5 }
 0xe6b   :  { %6561 = vmatpush3.msra.mxu0 %v2291_v25  ;;  %6564 = vmatprep.mubr.msk.f32.mxu0 %vm421_vm5, %v8172_v22 }
 0xe6c   :  { %6562 = vmatprep.subr.mxu0 %v2290_v36 }
 0xe6d   :  { %6563 = vmatpush3.msra.mxu0 %v2290_v36 }
 0xe6e   :  { %6565 = vmatmul.mubr.msk.f32.vlgmr.msra.gmra.mxu0 %vm421_vm5, %v8175_v26 }
 0xe6f   :  { %6567 = vmatprep.mubr.msk.f32.mxu0 %vm421_vm5, %v8186_v4 }
 0xe72   :  { %6568 = vmatmul.mubr.msk.f32.gmra.mxu0 %vm421_vm5, %v8191_v5 }
 0xf25   :  { %v6552_v6 = vpop.f32.mrf.mxu0  ;;  %v6580_v62 = vpop.f32.mrf.mxu1 }
 0xf26   :  { %v8266_v52 = vadd.f32 %v6552_v6, %v5812_v8  ;;  %v8313_v3 = vadd.f32 %v6580_v62, %v5822_v28 }
 0xf27   :  { %v2389_v45 = vpop.f32.mrf.mxu0  ;;  %v2571_v30 = vpop.f32.mrf.mxu1 }
 0xf28   :  { %v8209_v10 = vadd.f32 %v5812_v8, %v2389_v45  ;;  %v2591_v1 = vsel %vm702_vm8, %v8266_v52, 0.0  ;;  %v2764_v32 = vsel %vm7685_vm9, %v8266_v52, 0.0  ;;  %v8329_v11 = vadd.f32 %v5822_v28, %v2571_v30  ;;  %v8376_v45 = vld [vmem:[%s7412_s21 + $0x18] sm:$0xff] }
 0xf2a   :  { %v6555_v35 = vpop.f32.mrf.mxu0  ;;  %v2590_v16 = vsel %vm702_vm8, %v8209_v10, 0.0  ;;  %v2763_v53 = vsel %vm7685_vm9, %v8209_v10, 0.0  ;;  %v6583_v57 = vpop.f32.mrf.mxu1 }
 0xf2b   :  { %6592 = vmatprep.mubr.msk.f32.mxu0 %vm421_vm5, %v2590_v16  ;;  %6606 = vmatprep.mubr.msk.f32.mxu1 %vm421_vm5, %v2763_v53  ;;  %v8269_v31 = vadd.f32 %v6583_v57, %v5822_v28  ;;  %v8287_v48 = vadd.f32 %v6555_v35, %v5812_v8  ;;  %v8381_v53 = vld [vmem:[%s7412_s21 + $0x10] sm:$0xff]  ;;  %s9259_s21 = sld [smem:[#allocation32_spill]] }
 0xf2c   :  { %v2399_v58 = vpop.f32.mrf.mxu0  ;;  %v2581_v50 = vpop.f32.mrf.mxu1 }
 0xf2d   :  { %v8271_v33 = vadd.f32 %v5812_v8, %v2399_v58  ;;  %v8297_v46 = vadd.f32 %v5822_v28, %v2581_v50  ;;  %v2593_v55 = vsel %vm702_vm8, %v8287_v48, 0.0  ;;  %v2766_v7 = vsel %vm7685_vm9, %v8287_v48, 0.0 }
 0xf2e   :  { %v6566_v54 = vpop.f32.mrf.mxu0 }
 0xf2f   :  { %v8232_v42 = vadd.f32 %v6566_v54, %v5817_v60  ;;  %v2592_v38 = vsel %vm702_vm8, %v8271_v33, 0.0  ;;  %v2765_v43 = vsel %vm7685_vm9, %v8271_v33, 0.0 }
 0xf30   :  { %v2480_v20 = vpop.f32.mrf.mxu0 }
 0xf31   :  { %v8244_v41 = vadd.f32 %v5817_v60, %v2480_v20  ;;  %v2595_v13 = vsel %vm702_vm8, %v8232_v42, 0.0  ;;  %v2768_v17 = vsel %vm7685_vm9, %v8232_v42, 0.0 }
 0xf32   :  { %v6569_v23 = vpop.f32.mrf.mxu0 }
 0xf33   :  { %v8220_v63 = vadd.f32 %v6569_v23, %v5817_v60  ;;  %v2594_v40 = vsel %vm702_vm8, %v8244_v41, 0.0  ;;  %v2767_v27 = vsel %vm7685_vm9, %v8244_v41, 0.0 }
 0xf34   :  { %v2490_v37 = vpop.f32.mrf.mxu0 }
 0xf35   :  { %v8222_v24 = vadd.f32 %v5817_v60, %v2490_v37  ;;  %v2597_v21 = vsel %vm702_vm8, %v8220_v63, 0.0  ;;  %v2770_v29 = vsel %vm7685_vm9, %v8220_v63, 0.0  ;;  %v8358_v47 = vsel %vm7821_vm12, %v8220_v63, 0.0 }
 0xf36   :  { %6584 = vmatprep.subr.msk.mxu0 %vm421_vm5, %v2597_v21  ;;  %6598 = vmatprep.subr.msk.mxu1 %vm421_vm5, %v2770_v29 }
 0xf37   :  { %6585 = vmatpush3.xpose.msk.msra.mxu0 %vm421_vm5, %v2597_v21  ;;  %6599 = vmatpush3.xpose.msk.msra.mxu1 %vm421_vm5, %v2770_v29  ;;  %v2596_v9 = vsel %vm702_vm8, %v8222_v24, 0.0  ;;  %v2769_v12 = vsel %vm7685_vm9, %v8222_v24, 0.0 }
 0xf38   :  { %6586 = vmatprep.subr.msk.mxu0 %vm421_vm5, %v2596_v9  ;;  %6600 = vmatprep.subr.msk.mxu1 %vm421_vm5, %v2769_v12 }
 0xf3b   :  { %6587 = vmatpush3.xpose.msk.msra.mxu0 %vm421_vm5, %v2596_v9  ;;  %6601 = vmatpush3.xpose.msk.msra.mxu1 %vm421_vm5, %v2769_v12 }
 0xf3c   :  { %6588 = vmatprep.subr.msk.mxu0 %vm421_vm5, %v2595_v13  ;;  %6602 = vmatprep.subr.msk.mxu1 %vm421_vm5, %v2768_v17 }
 0xf3f   :  { %6589 = vmatpush3.xpose.msk.msra.mxu0 %vm421_vm5, %v2595_v13  ;;  %6603 = vmatpush3.xpose.msk.msra.mxu1 %vm421_vm5, %v2768_v17 }
 0xf40   :  { %6590 = vmatprep.subr.msk.mxu0 %vm421_vm5, %v2594_v40  ;;  %6604 = vmatprep.subr.msk.mxu1 %vm421_vm5, %v2767_v27 }
 0xf43   :  { %6591 = vmatpush3.xpose.msk.msra.mxu0 %vm421_vm5, %v2594_v40  ;;  %6605 = vmatpush3.xpose.msk.msra.mxu1 %vm421_vm5, %v2767_v27 }
 0xf44   :  { %6612 = vmatprep.subr.msk.mxu0 %vm7685_vm9, %v8269_v31  ;;  %6626 = vmatprep.subr.msk.mxu1 %vm702_vm8, %v8269_v31 }
 0xf46   :  { %6593 = vmatmul.mubr.msk.f32.vlgmr.msra.gmra.mxu0 %vm421_vm5, %v2591_v1  ;;  %6607 = vmatmul.mubr.msk.f32.vlgmr.msra.gmra.mxu1 %vm421_vm5, %v2764_v32 }
 0xf47   :  { %6595 = vmatprep.mubr.msk.f32.mxu0 %vm421_vm5, %v2592_v38  ;;  %6609 = vmatprep.mubr.msk.f32.mxu1 %vm421_vm5, %v2765_v43 }
 0xf48   :  { %6613 = vmatpush3.msk.msra.mxu0 %vm7685_vm9, %v8269_v31  ;;  %6627 = vmatpush3.msk.msra.mxu1 %vm702_vm8, %v8269_v31 }
 0xf49   :  { %6614 = vmatprep.subr.msk.mxu0 %vm7685_vm9, %v8297_v46  ;;  %6628 = vmatprep.subr.msk.mxu1 %vm702_vm8, %v8297_v46 }
 0xf4a   :  { %6615 = vmatpush3.msk.msra.mxu0 %vm7685_vm9, %v8297_v46  ;;  %6629 = vmatpush3.msk.msra.mxu1 %vm702_vm8, %v8297_v46 }
 0xf4b   :  { %6596 = vmatmul.mubr.msk.f32.gmra.mxu0 %vm421_vm5, %v2593_v55  ;;  %6610 = vmatmul.mubr.msk.f32.gmra.mxu1 %vm421_vm5, %v2766_v7 }
 0xf4c   :  { %6616 = vmatprep.subr.msk.mxu0 %vm7685_vm9, %v8313_v3  ;;  %6630 = vmatprep.subr.msk.mxu1 %vm702_vm8, %v8313_v3 }
 0xf4d   :  { %6617 = vmatpush3.msk.msra.mxu0 %vm7685_vm9, %v8313_v3  ;;  %6631 = vmatpush3.msk.msra.mxu1 %vm702_vm8, %v8313_v3 }
 0xf4e   :  { %6618 = vmatprep.subr.msk.mxu0 %vm7685_vm9, %v8329_v11  ;;  %6632 = vmatprep.subr.msk.mxu1 %vm702_vm8, %v8329_v11 }
 0xf4f   :  { %6619 = vmatpush3.msk.msra.mxu0 %vm7685_vm9, %v8329_v11  ;;  %6633 = vmatpush3.msk.msra.mxu1 %vm702_vm8, %v8329_v11 }
 0xf50   :  { %6640 = vmatprep.subr.msk.mxu0 %vm421_vm5, %v8358_v47  ;;  %6654 = vmatprep.subr.msk.mxu1 %vm7821_vm12, %v8269_v31 }
0x1006   :  { %v6608_v51 = vpop.f32.mrf.mxu1  ;;  %v6594_v57 = vpop.f32.mrf.mxu0 }
0x1007   :  { %v2885_v56 = vmul.f32 0.35355338, %v6608_v51  ;;  %v2712_v32 = vmul.f32 0.35355338, %v6594_v57  ;;  %v3131_v57 = vsel %vm7821_vm12, %v8266_v52, 0.0 }
0x1008   :  { %v2865_v44 = vpop.f32.mrf.mxu1  ;;  %v2692_v40 = vpop.f32.mrf.mxu0 }
0x1009   :  { %v2884_v19 = vmul.f32 0.35355338, %v2865_v44  ;;  %v2889_v59 = vadd.f32 %v8366_v39, %v2885_v56  ;;  %v2711_v43 = vmul.f32 0.35355338, %v2692_v40  ;;  %v8389_v44 = vadd.f32 %v8366_v39, %v2712_v32 }
0x100a   :  { %v3132_v40 = vsel %vm7821_vm12, %v8271_v33, 0.0 }
0x100b   :  { %v6611_v61 = vpop.f32.mrf.mxu1  ;;  %v2895_v49 = vsel %vm421_vm5, %v2889_v59, -inf  ;;  %v2888_v2 = vadd.f32 %v8371_v0, %v2884_v19  ;;  %v6597_v28 = vpop.f32.mrf.mxu0 }
0x100c   :  { %v2887_v25 = vmul.f32 0.35355338, %v6611_v61  ;;  %2896 = vmax.xlane.f32.xlu0 %v2895_v49  ;;  %v2714_v51 = vmul.f32 0.35355338, %v6597_v28  ;;  %v8393_v49 = vadd.f32 %v8371_v0, %v2711_v43 }
0x100d   :  { %v2875_v36 = vpop.f32.mrf.mxu1  ;;  %v2892_v6 = vsel %vm421_vm5, %v2888_v2, -inf  ;;  %v2702_v7 = vpop.f32.mrf.mxu0 }
0x100e   :  { %v2886_v8 = vmul.f32 0.35355338, %v2875_v36  ;;  %2893 = vmax.xlane.f32.xlu1 %v2892_v6  ;;  %v2891_v35 = vadd.f32 %v8376_v45, %v2887_v25  ;;  %v8398_v25 = vadd.f32 %v8376_v45, %v2714_v51  ;;  %v2719_v36 = vsel %vm421_vm5, %v8393_v49, -inf }
0x1010   :  { %v2901_v16 = vsel %vm421_vm5, %v2891_v35, -inf  ;;  %v2890_v58 = vadd.f32 %v8381_v53, %v2886_v8  ;;  %v2728_v8 = vsel %vm421_vm5, %v8398_v25, -inf }
0x1011   :  { %2902 = vmax.xlane.f32.xlu0 %v2901_v16 }
0x1012   :  { %v2898_v54 = vsel %vm421_vm5, %v2890_v58, -inf }
0x1013   :  { %2899 = vmax.xlane.f32.xlu1 %v2898_v54 }
0x1095   :  { %v2897_v20 = vpop.xlane.xlu0 %2896 }
0x1096   :  { %v2905_v60 = vsub.f32 %v2889_v59, %v2897_v20  ;;  %v2713_v59 = vmul.f32 0.35355338, %v2702_v7 }
0x1097   :  { %v2894_v23 = vpop.xlane.xlu1 %2893 }
0x1098   :  { %v2910_v37 = vmul.f32 1.442695, %v2905_v60  ;;  %v2904_v21 = vsub.f32 %v2888_v2, %v2894_v23  ;;  %v2722_v2 = vsel %vm421_vm5, %v8389_v44, -inf  ;;  %v8403_v6 = vadd.f32 %v8381_v53, %v2713_v59 }
0x109a   :  { %7018 = vpow2.f32 %v2910_v37  ;;  %v2908_v29 = vmul.f32 1.442695, %v2904_v21  ;;  %v2903_v62 = vpop.xlane.xlu0 %2902 }
0x109b   :  { %v2907_v9 = vsub.f32 %v2891_v35, %v2903_v62  ;;  %v2725_v35 = vsel %vm421_vm5, %v8403_v6, -inf }
0x109c   :  { %7020 = vpow2.f32 %v2908_v29  ;;  %v2900_v12 = vpop.xlane.xlu1 %2899 }
0x109d   :  { %v2914_v30 = vmul.f32 1.442695, %v2907_v9  ;;  %v2906_v13 = vsub.f32 %v2890_v58, %v2900_v12  ;;  %v3136_v9 = vsel %vm7821_vm12, %v8222_v24, 0.0 }
0x109f   :  { %7022 = vpow2.f32 %v2914_v30  ;;  %v2912_v17 = vmul.f32 1.442695, %v2906_v13  ;;  %v3130_v13 = vsel %vm7821_vm12, %v8209_v10, 0.0 }
0x10a1   :  { %7024 = vpow2.f32 %v2912_v17  ;;  %v3134_v17 = vsel %vm7821_vm12, %v8244_v41, 0.0 }
0x10a7   :  { %v7019_v27 = vpop.eup %7018 }
0x10a8   :  { %v2919_v50 = vsel %vm421_vm5, %v7019_v27, 0.0 }
0x10a9   :  { %v7021_v1 = vpop.eup %7020  ;;  %2920 = vadd.xlane.f32.xlu0 %v2919_v50 }
0x10aa   :  { %v2916_v38 = vsel %vm421_vm5, %v7021_v1, 0.0 }
0x10ab   :  { %2917 = vadd.xlane.f32.xlu1 %v2916_v38 }
0x10ac   :  { %v7023_v55 = vpop.eup %7022 }
0x10ad   :  { %v2925_v56 = vsel %vm421_vm5, %v7023_v55, 0.0 }
0x10ae   :  { %v7025_v19 = vpop.eup %7024  ;;  %2926 = vadd.xlane.f32.xlu0 %v2925_v56 }
0x10af   :  { %v2922_v61 = vsel %vm421_vm5, %v7025_v19, 0.0 }
0x10b0   :  { %2923 = vadd.xlane.f32.xlu1 %v2922_v61 }
0x10b2   :  { %2723 = vmax.xlane.f32.xlu0 %v2722_v2 }
0x10b4   :  { %2720 = vmax.xlane.f32.xlu1 %v2719_v36 }
0x10b6   :  { %2729 = vmax.xlane.f32.xlu0 %v2728_v8 }
0x10b8   :  { %2726 = vmax.xlane.f32.xlu1 %v2725_v35 }
0x1132   :  { %v2921_v16 = vpop.xlane.xlu0 %2920 }
0x1133   :  { %7026 = vrcp.f32 %v2921_v16 }
0x1134   :  { %v2918_v58 = vpop.xlane.xlu1 %2917 }
0x1135   :  { %7028 = vrcp.f32 %v2918_v58 }
0x1137   :  { %v2927_v54 = vpop.xlane.xlu0 %2926 }
0x1138   :  { %7030 = vrcp.f32 %v2927_v54 }
0x1139   :  { %v2924_v20 = vpop.xlane.xlu1 %2923 }
0x113a   :  { %7032 = vrcp.f32 %v2924_v20 }
0x113b   :  { %v2724_v28 = vpop.xlane.xlu0 %2723 }
0x113c   :  { %v2732_v32 = vsub.f32 %v8389_v44, %v2724_v28 }
0x113d   :  { %v2721_v50 = vpop.xlane.xlu1 %2720 }
0x113e   :  { %v2737_v51 = vmul.f32 1.442695, %v2732_v32 }
0x113f   :  { %v2730_v38 = vpop.xlane.xlu0 %2729 }
0x1140   :  { %v7027_v60 = vpop.eup %7026  ;;  %v2734_v56 = vsub.f32 %v8398_v25, %v2730_v38  ;;  %7034 = vpow2.f32 %v2737_v51 }
0x1141   :  { %v2931_v21 = vmul.f32 %v7027_v60, %v7019_v27  ;;  %v3133_v27 = vsel %vm7821_vm12, %v8287_v48, 0.0  ;;  %v2727_v7 = vpop.xlane.xlu1 %2726 }
0x1142   :  { %v7029_v23 = vpop.eup %7028  ;;  %v2733_v61 = vsub.f32 %v8403_v6, %v2727_v7  ;;  %v2741_v2 = vmul.f32 1.442695, %v2734_v56 }
0x1143   :  { %v2929_v37 = vmul.f32 %v7029_v23, %v7021_v1 }
0x1144   :  { %v2739_v44 = vmul.f32 1.442695, %v2733_v61 }
0x1145   :  { %6620 = vmatprep.mubr.msk.f32.mxu0 %vm421_vm5, %v2929_v37  ;;  %v7031_v29 = vpop.eup %7030 }
0x1146   :  { %6621 = vmatmul.mubr.msk.f32.vlgmr.msra.gmra.mxu0 %vm421_vm5, %v2931_v21  ;;  %v2935_v30 = vmul.f32 %v7031_v29, %v7023_v55  ;;  %v2731_v55 = vsub.f32 %v8393_v49, %v2721_v50 }
0x1147   :  { %v7033_v62 = vpop.eup %7032  ;;  %6641 = vmatpush3.xpose.msk.msra.mxu0 %vm421_vm5, %v8358_v47  ;;  %v3135_v47 = vsel %vm7821_vm12, %v8232_v42, 0.0 }
0x1148   :  { %6642 = vmatprep.subr.msk.mxu0 %vm421_vm5, %v3136_v9  ;;  %v2933_v12 = vmul.f32 %v7033_v62, %v7025_v19  ;;  %v2735_v59 = vmul.f32 1.442695, %v2731_v55 }
0x114a   :  { %6623 = vmatprep.mubr.msk.f32.mxu0 %vm421_vm5, %v2933_v12  ;;  %7036 = vpow2.f32 %v2735_v59 }
0x114b   :  { %6624 = vmatmul.mubr.msk.f32.gmra.mxu0 %vm421_vm5, %v2935_v30  ;;  %7038 = vpow2.f32 %v2741_v2 }
0x114c   :  { %6643 = vmatpush3.xpose.msk.msra.mxu0 %vm421_vm5, %v3136_v9  ;;  %6648 = vmatprep.mubr.msk.f32.mxu0 %vm421_vm5, %v3130_v13  ;;  %7040 = vpow2.f32 %v2739_v44 }
0x114d   :  { %6644 = vmatprep.subr.msk.mxu0 %vm421_vm5, %v3135_v47  ;;  %v7035_v9 = vpop.eup %7034 }
0x114e   :  { %v2746_v13 = vsel %vm421_vm5, %v7035_v9, 0.0 }
0x1150   :  { %6645 = vmatpush3.xpose.msk.msra.mxu0 %vm421_vm5, %v3135_v47 }
0x1151   :  { %6646 = vmatprep.subr.msk.mxu0 %vm421_vm5, %v3134_v17 }
0x1154   :  { %6647 = vmatpush3.xpose.msk.msra.mxu0 %vm421_vm5, %v3134_v17 }
0x1155   :  { %6682 = vmatprep.subr.msk.mxu0 %vm7918_vm15, %v8269_v31 }
0x1157   :  { %6649 = vmatmul.mubr.msk.f32.vlgmr.msra.gmra.mxu0 %vm421_vm5, %v3131_v57  ;;  %v7037_v30 = vpop.eup %7036 }
0x1158   :  { %6651 = vmatprep.mubr.msk.f32.mxu0 %vm421_vm5, %v3132_v40  ;;  %6683 = vmatpush3.msk.msra.mxu0 %vm7918_vm15, %v8269_v31  ;;  %v7039_v47 = vpop.eup %7038  ;;  %v2743_v17 = vsel %vm421_vm5, %v7037_v30, 0.0 }
0x1159   :  { %6684 = vmatprep.subr.msk.mxu0 %vm7918_vm15, %v8297_v46  ;;  %v7041_v57 = vpop.eup %7040  ;;  %v2752_v40 = vsel %vm421_vm5, %v7039_v47, 0.0 }
0x115a   :  { %6685 = vmatpush3.msk.msra.mxu0 %vm7918_vm15, %v8297_v46 }
0x115b   :  { %6652 = vmatmul.mubr.msk.f32.gmra.mxu0 %vm421_vm5, %v3133_v27  ;;  %6686 = vmatprep.subr.msk.mxu0 %vm7918_vm15, %v8313_v3  ;;  %v2749_v27 = vsel %vm421_vm5, %v7041_v57, 0.0 }
0x115c   :  { %6687 = vmatpush3.msk.msra.mxu0 %vm7918_vm15, %v8313_v3 }
0x115d   :  { %6688 = vmatprep.subr.msk.mxu0 %vm7918_vm15, %v8329_v11 }
0x115e   :  { %6689 = vmatpush3.msk.msra.mxu0 %vm7918_vm15, %v8329_v11 }
0x1206   :  { %v8470_v1 = vpop.f32.mrf.mxu0 }
0x1208   :  { %v8473_v43 = vpop.f32.mrf.mxu0 }
0x120b   :  { %v8477_v19 = vpop.f32.mrf.mxu0 }
0x120d   :  { %v8480_v36 = vpop.f32.mrf.mxu0 }
0x1217   :  { %v6650_v8 = vpop.f32.mrf.mxu0 }
0x1218   :  { %v3252_v35 = vmul.f32 0.35355338, %v6650_v8 }
0x1219   :  { %v3232_v16 = vpop.f32.mrf.mxu0 }
0x121a   :  { %v3251_v49 = vmul.f32 0.35355338, %v3232_v16  ;;  %v3256_v58 = vadd.f32 %v8366_v39, %v3252_v35 }
0x121b   :  { %v6653_v25 = vpop.f32.mrf.mxu0 }
0x121c   :  { %v3254_v54 = vmul.f32 0.35355338, %v6653_v25  ;;  %v3262_v20 = vsel %vm421_vm5, %v3256_v58, -inf  ;;  %v3255_v6 = vadd.f32 %v8371_v0, %v3251_v49 }
0x121d   :  { %3263 = vmax.xlane.f32.xlu0 %v3262_v20  ;;  %v3242_v60 = vpop.f32.mrf.mxu0 }
0x121e   :  { %v3253_v23 = vmul.f32 0.35355338, %v3242_v60  ;;  %v3259_v37 = vsel %vm421_vm5, %v3255_v6, -inf  ;;  %v3258_v21 = vadd.f32 %v8376_v45, %v3254_v54 }
0x121f   :  { %3260 = vmax.xlane.f32.xlu1 %v3259_v37 }
0x1220   :  { %v3268_v29 = vsel %vm421_vm5, %v3258_v21, -inf  ;;  %v3257_v62 = vadd.f32 %v8381_v53, %v3253_v23 }
0x1221   :  { %3269 = vmax.xlane.f32.xlu0 %v3268_v29 }
0x1222   :  { %v3265_v12 = vsel %vm421_vm5, %v3257_v62, -inf }
0x1223   :  { %3266 = vmax.xlane.f32.xlu1 %v3265_v12 }
0x1225   :  { %2747 = vadd.xlane.f32.xlu0 %v2746_v13 }
0x1227   :  { %2744 = vadd.xlane.f32.xlu1 %v2743_v17 }
0x1229   :  { %2753 = vadd.xlane.f32.xlu0 %v2752_v40 }
0x122b   :  { %2750 = vadd.xlane.f32.xlu1 %v2749_v27 }
0x12a6   :  { %v3264_v28 = vpop.xlane.xlu0 %3263 }
0x12a7   :  { %v3272_v50 = vsub.f32 %v3256_v58, %v3264_v28 }
0x12a8   :  { %v3261_v32 = vpop.xlane.xlu1 %3260 }
0x12a9   :  { %v3277_v38 = vmul.f32 1.442695, %v3272_v50  ;;  %v3271_v55 = vsub.f32 %v3255_v6, %v3261_v32 }
0x12aa   :  { %v3270_v7 = vpop.xlane.xlu0 %3269 }
0x12ab   :  { %7042 = vpow2.f32 %v3277_v38  ;;  %v3275_v51 = vmul.f32 1.442695, %v3271_v55  ;;  %v3274_v56 = vsub.f32 %v3258_v21, %v3270_v7  ;;  %v3404_v55 = vsel %vm7918_vm15, %v8209_v10, 0.0 }
0x12ac   :  { %v3267_v59 = vpop.xlane.xlu1 %3266  ;;  %v3409_v7 = vsel %vm7918_vm15, %v8232_v42, 0.0  ;;  %v3405_v10 = vsel %vm7918_vm15, %v8266_v52, 0.0  ;;  %v3406_v42 = vsel %vm7918_vm15, %v8271_v33, 0.0 }
0x12ad   :  { %7044 = vpow2.f32 %v3275_v51  ;;  %v3281_v61 = vmul.f32 1.442695, %v3274_v56  ;;  %v3273_v2 = vsub.f32 %v3257_v62, %v3267_v59 }
0x12ae   :  { %v2748_v44 = vpop.xlane.xlu0 %2747 }
0x12af   :  { %7046 = vpow2.f32 %v3281_v61  ;;  %v3279_v8 = vmul.f32 1.442695, %v3273_v2 }
0x12b0   :  { %7048 = vrcp.f32 %v2748_v44  ;;  %v2745_v35 = vpop.xlane.xlu1 %2744 }
0x12b1   :  { %7050 = vpow2.f32 %v3279_v8 }
0x12b2   :  { %7052 = vrcp.f32 %v2745_v35  ;;  %v2754_v16 = vpop.xlane.xlu0 %2753 }
0x12b3   :  { %7054 = vrcp.f32 %v2754_v16 }
0x12b4   :  { %v2751_v49 = vpop.xlane.xlu1 %2750 }
0x12b5   :  { %7056 = vrcp.f32 %v2751_v49 }
0x12b8   :  { %v7043_v58 = vpop.eup %7042 }
0x12b9   :  { %v3286_v25 = vsel %vm421_vm5, %v7043_v58, 0.0 }
0x12ba   :  { %v7045_v54 = vpop.eup %7044  ;;  %3287 = vadd.xlane.f32.xlu0 %v3286_v25 }
0x12bb   :  { %v3283_v20 = vsel %vm421_vm5, %v7045_v54, 0.0 }
0x12bc   :  { %v7047_v6 = vpop.eup %7046  ;;  %3284 = vadd.xlane.f32.xlu1 %v3283_v20 }
0x12bd   :  { %v7049_v60 = vpop.eup %7048  ;;  %v3292_v23 = vsel %vm421_vm5, %v7047_v6, 0.0 }
0x12be   :  { %v7051_v37 = vpop.eup %7050  ;;  %3293 = vadd.xlane.f32.xlu0 %v3292_v23  ;;  %v2758_v13 = vmul.f32 %v7049_v60, %v7035_v9 }
0x12bf   :  { %v7053_v21 = vpop.eup %7052  ;;  %v3289_v29 = vsel %vm421_vm5, %v7051_v37, 0.0 }
0x12c0   :  { %3290 = vadd.xlane.f32.xlu1 %v3289_v29  ;;  %v2756_v62 = vmul.f32 %v7053_v21, %v7037_v30  ;;  %v7055_v12 = vpop.eup %7054 }
0x12c1   :  { %v2762_v27 = vmul.f32 %v7055_v12, %v7039_v47 }
0x12c2   :  { %v7057_v17 = vpop.eup %7056  ;;  %6634 = vmatprep.mubr.msk.f32.mxu1 %vm421_vm5, %v2756_v62 }
0x12c3   :  { %6635 = vmatmul.mubr.msk.f32.vlgmr.msra.gmra.mxu1 %vm421_vm5, %v2758_v13  ;;  %v2760_v40 = vmul.f32 %v7057_v17, %v7041_v57 }
0x12c4   :  { %6655 = vmatpush3.msk.msra.mxu1 %vm7821_vm12, %v8269_v31  ;;  %v3411_v31 = vsel %vm7918_vm15, %v8220_v63, 0.0  ;;  %v3410_v63 = vsel %vm7918_vm15, %v8222_v24, 0.0  ;;  %v3408_v24 = vsel %vm7918_vm15, %v8244_v41, 0.0  ;;  %v3407_v41 = vsel %vm7918_vm15, %v8287_v48, 0.0 }
0x12c5   :  { %6656 = vmatprep.subr.msk.mxu1 %vm7821_vm12, %v8297_v46  ;;  %6637 = vmatprep.mubr.msk.f32.mxu1 %vm421_vm5, %v2760_v40 }
0x12c6   :  { %6657 = vmatpush3.msk.msra.mxu1 %vm7821_vm12, %v8297_v46 }
0x12c7   :  { %6658 = vmatprep.subr.msk.mxu1 %vm7821_vm12, %v8313_v3  ;;  %6638 = vmatmul.mubr.msk.f32.gmra.mxu1 %vm421_vm5, %v2762_v27 }
0x12c8   :  { %6659 = vmatpush3.msk.msra.mxu1 %vm7821_vm12, %v8313_v3 }
0x12c9   :  { %6660 = vmatprep.subr.msk.mxu1 %vm7821_vm12, %v8329_v11 }
0x12ca   :  { %6661 = vmatpush3.msk.msra.mxu1 %vm7821_vm12, %v8329_v11 }
0x12cb   :  { %6668 = vmatprep.subr.msk.mxu1 %vm421_vm5, %v3411_v31 }
0x1343   :  { %v3288_v46 = vpop.xlane.xlu0 %3287 }
0x1344   :  { %7058 = vrcp.f32 %v3288_v46 }
0x1345   :  { %v3285_v9 = vpop.xlane.xlu1 %3284 }
0x1346   :  { %7060 = vrcp.f32 %v3285_v9 }
0x1347   :  { %v3294_v30 = vpop.xlane.xlu0 %3293 }
0x1348   :  { %7062 = vrcp.f32 %v3294_v30 }
0x1349   :  { %v3291_v3 = vpop.xlane.xlu1 %3290 }
0x134a   :  { %7064 = vrcp.f32 %v3291_v3 }
0x1351   :  { %v7059_v47 = vpop.eup %7058 }
0x1352   :  { %v3298_v50 = vmul.f32 %v7059_v47, %v7043_v58 }
0x1353   :  { %v7061_v57 = vpop.eup %7060 }
0x1354   :  { %v3296_v28 = vmul.f32 %v7061_v57, %v7045_v54 }
0x1355   :  { %v7063_v34 = vpop.eup %7062 }
0x1356   :  { %6662 = vmatprep.mubr.msk.f32.mxu1 %vm421_vm5, %v3296_v28  ;;  %v3302_v38 = vmul.f32 %v7063_v34, %v7047_v6 }
0x1357   :  { %v7065_v11 = vpop.eup %7064  ;;  %6663 = vmatmul.mubr.msk.f32.vlgmr.msra.gmra.mxu1 %vm421_vm5, %v3298_v50 }
0x1358   :  { %6669 = vmatpush3.xpose.msk.msra.mxu1 %vm421_vm5, %v3411_v31  ;;  %v3300_v32 = vmul.f32 %v7065_v11, %v7051_v37 }
0x1359   :  { %6670 = vmatprep.subr.msk.mxu1 %vm421_vm5, %v3410_v63 }
0x135a   :  { %6665 = vmatprep.mubr.msk.f32.mxu1 %vm421_vm5, %v3300_v32 }
0x135b   :  { %6666 = vmatmul.mubr.msk.f32.gmra.mxu1 %vm421_vm5, %v3302_v38  ;;  %v2303_v38 = vld [vmem:[%s9259_s21 + $0x18] sm:$0xff] }
0x135c   :  { %6671 = vmatpush3.xpose.msk.msra.mxu1 %vm421_vm5, %v3410_v63  ;;  %6676 = vmatprep.mubr.msk.f32.mxu1 %vm421_vm5, %v3404_v55 }
0x135d   :  { %6672 = vmatprep.subr.msk.mxu1 %vm421_vm5, %v3409_v7  ;;  %6696 = vmatprep.subr.mxu0 %v2303_v38 }
0x1360   :  { %6673 = vmatpush3.xpose.msk.msra.mxu1 %vm421_vm5, %v3409_v7 }
0x1361   :  { %6674 = vmatprep.subr.msk.mxu1 %vm421_vm5, %v3408_v24 }
0x1364   :  { %6675 = vmatpush3.xpose.msk.msra.mxu1 %vm421_vm5, %v3408_v24 }
0x1367   :  { %6677 = vmatmul.mubr.msk.f32.vlgmr.msra.gmra.mxu1 %vm421_vm5, %v3405_v10 }
0x1368   :  { %6679 = vmatprep.mubr.msk.f32.mxu1 %vm421_vm5, %v3406_v42 }
0x136b   :  { %6680 = vmatmul.mubr.msk.f32.gmra.mxu1 %vm421_vm5, %v3407_v41 }
0x1383   :  { %v6636_v51 = vpop.f32.mrf.mxu1 }
0x1384   :  { %v3117_v52 = vadd.f32 %v6636_v51, %v8470_v1 }
0x1385   :  { %v3111_v56 = vpop.f32.mrf.mxu1 }
0x1386   :  { %v3112_v44 = vadd.f32 %v3111_v56, %v8473_v43 }
0x1387   :  { %v6639_v59 = vpop.f32.mrf.mxu1 }
0x1388   :  { %v3127_v35 = vadd.f32 %v6639_v59, %v8477_v19 }
0x1389   :  { %v8563_v61 = vpop.f32.mrf.mxu1 }
0x1417   :  { %v6664_v2 = vpop.f32.mrf.mxu1 }
0x1418   :  { %v8567_v8 = vadd.f32 %v6664_v2, %v3117_v52  ;;  %v2302_v52 = vld [vmem:[%s9259_s21 + $0x10] sm:$0xff] }
0x1419   :  { %v3381_v33 = vpop.f32.mrf.mxu1 }
0x141a   :  { %v8570_v16 = vadd.f32 %v3381_v33, %v3112_v44 }
0x141b   :  { %v6667_v14 = vpop.f32.mrf.mxu1 }
0x141c   :  { %v8572_v48 = vadd.f32 %v6667_v14, %v3127_v35  ;;  %v2301_v35 = vld [vmem:[%s9259_s21 + $0x8] sm:$0xff]  ;;  %v2300_v14 = vld [vmem:[%s9259_s21] sm:$0xff] }
0x141d   :  { %v8574_v49 = vpop.f32.mrf.mxu1 }
0x1427   :  { %v6678_v58 = vpop.f32.mrf.mxu1 }
0x1428   :  { %v3526_v25 = vmul.f32 0.35355338, %v6678_v58 }
0x1429   :  { %v3506_v54 = vpop.f32.mrf.mxu1 }
0x142a   :  { %v3525_v20 = vmul.f32 0.35355338, %v3506_v54  ;;  %v3530_v1 = vadd.f32 %v8366_v39, %v3526_v25  ;;  %v3122_v54 = vadd.f32 %v8563_v61, %v8480_v36  ;;  %v5891_v36 = vld [vmem:[%s9260_s26] ss:$0 sm:$0xff] }
0x142b   :  { %v6681_v6 = vpop.f32.mrf.mxu1 }
0x142c   :  { %v3528_v43 = vmul.f32 0.35355338, %v6681_v6  ;;  %v3536_v60 = vsel %vm421_vm5, %v3530_v1, -inf  ;;  %v3529_v23 = vadd.f32 %v8371_v0, %v3525_v20 }
0x142d   :  { %3537 = vmax.xlane.f32.xlu0 %v3536_v60  ;;  %v3516_v19 = vpop.f32.mrf.mxu1 }
0x142e   :  { %v3527_v37 = vmul.f32 0.35355338, %v3516_v19  ;;  %v3533_v21 = vsel %vm421_vm5, %v3529_v23, -inf  ;;  %v3532_v29 = vadd.f32 %v8376_v45, %v3528_v43  ;;  %v3402_v43 = vadd.f32 %v8574_v49, %v3122_v54 }
0x142f   :  { %3534 = vmax.xlane.f32.xlu1 %v3533_v21 }
0x1430   :  { %v3542_v62 = vsel %vm421_vm5, %v3532_v29, -inf  ;;  %v3531_v12 = vadd.f32 %v8381_v53, %v3527_v37 }
0x1431   :  { %3543 = vmax.xlane.f32.xlu0 %v3542_v62 }
0x1432   :  { %v3539_v39 = vsel %vm421_vm5, %v3531_v12, -inf }
0x1433   :  { %3540 = vmax.xlane.f32.xlu1 %v3539_v39 }
0x14b6   :  { %v3538_v13 = vpop.xlane.xlu0 %3537 }
0x14b7   :  { %v3546_v17 = vsub.f32 %v3530_v1, %v3538_v13 }
0x14b8   :  { %v3535_v40 = vpop.xlane.xlu1 %3534 }
0x14b9   :  { %v3551_v0 = vmul.f32 1.442695, %v3546_v17  ;;  %v3545_v27 = vsub.f32 %v3529_v23, %v3535_v40 }
0x14ba   :  { %v3544_v31 = vpop.xlane.xlu0 %3543 }
0x14bb   :  { %7066 = vpow2.f32 %v3551_v0  ;;  %v3549_v46 = vmul.f32 1.442695, %v3545_v27  ;;  %v3548_v9 = vsub.f32 %v3532_v29, %v3544_v31 }
0x14bc   :  { %v3541_v30 = vpop.xlane.xlu1 %3540 }
0x14bd   :  { %7068 = vpow2.f32 %v3549_v46  ;;  %v3555_v45 = vmul.f32 1.442695, %v3548_v9  ;;  %v3547_v3 = vsub.f32 %v3531_v12, %v3541_v30 }
0x14bf   :  { %7070 = vpow2.f32 %v3555_v45  ;;  %v3553_v53 = vmul.f32 1.442695, %v3547_v3 }
0x14c1   :  { %7072 = vpow2.f32 %v3553_v53 }
0x14c8   :  { %v7067_v47 = vpop.eup %7066 }
0x14c9   :  { %v3560_v57 = vsel %vm421_vm5, %v7067_v47, 0.0 }
0x14ca   :  { %v7069_v28 = vpop.eup %7068  ;;  %3561 = vadd.xlane.f32.xlu0 %v3560_v57 }
0x14cb   :  { %v3557_v50 = vsel %vm421_vm5, %v7069_v28, 0.0 }
0x14cc   :  { %v7071_v34 = vpop.eup %7070  ;;  %3558 = vadd.xlane.f32.xlu1 %v3557_v50 }
0x14cd   :  { %v3566_v11 = vsel %vm421_vm5, %v7071_v34, 0.0 }
0x14ce   :  { %v7073_v63 = vpop.eup %7072  ;;  %3567 = vadd.xlane.f32.xlu0 %v3566_v11 }
0x14cf   :  { %v3563_v32 = vsel %vm421_vm5, %v7073_v63, 0.0 }
0x14d0   :  { %3564 = vadd.xlane.f32.xlu1 %v3563_v32 }
0x1553   :  { %v3562_v55 = vpop.xlane.xlu0 %3561 }
0x1554   :  { %7074 = vrcp.f32 %v3562_v55  ;;  %v4004_v55 = vld [vmem:[%s9261_s28 + $0x18] sm:$0xff] }
0x1555   :  { %v3559_v7 = vpop.xlane.xlu1 %3558 }
0x1556   :  { %7076 = vrcp.f32 %v3559_v7  ;;  %v3862_v7 = vld [vmem:[%s9262_s1 + $0x18] sm:$0xff] }
0x1557   :  { %v3568_v24 = vpop.xlane.xlu0 %3567  ;;  %6710 = vmatprep.subr.mxu1 %v3862_v7 }
0x1558   :  { %7078 = vrcp.f32 %v3568_v24  ;;  %6711 = vmatpush3.msra.mxu1 %v3862_v7  ;;  %v4003_v24 = vld [vmem:[%s9261_s28 + $0x10] sm:$0xff] }
0x1559   :  { %v3565_v10 = vpop.xlane.xlu1 %3564 }
0x155a   :  { %7080 = vrcp.f32 %v3565_v10  ;;  %v3861_v10 = vld [vmem:[%s9262_s1 + $0x10] sm:$0xff] }
0x155b   :  { %6712 = vmatprep.subr.mxu1 %v3861_v10 }
0x155c   :  { %6713 = vmatpush3.msra.mxu1 %v3861_v10 }
0x1561   :  { %v7075_v42 = vpop.eup %7074 }
0x1562   :  { %v3572_v56 = vmul.f32 %v7075_v42, %v7067_v47  ;;  %v4002_v42 = vld [vmem:[%s9261_s28 + $0x8] sm:$0xff] }
0x1563   :  { %v7077_v41 = vpop.eup %7076 }
0x1564   :  { %v3570_v51 = vmul.f32 %v7077_v41, %v7069_v28  ;;  %v3860_v41 = vld [vmem:[%s9262_s1 + $0x8] sm:$0xff] }
0x1565   :  { %v7079_v59 = vpop.eup %7078  ;;  %6714 = vmatprep.subr.mxu1 %v3860_v41 }
0x1566   :  { %6690 = vmatprep.mubr.msk.f32.mxu0 %vm421_vm5, %v3570_v51  ;;  %v3576_v33 = vmul.f32 %v7079_v59, %v7071_v34  ;;  %6715 = vmatpush3.msra.mxu1 %v3860_v41  ;;  %v4001_v51 = vld [vmem:[%s9261_s28] sm:$0xff]  ;;  %v5916_v59 = vld [vmem:[%s9261_s28 + $0x38] sm:$0xff] }
0x1567   :  { %v7081_v2 = vpop.eup %7080  ;;  %6691 = vmatmul.mubr.msk.f32.vlgmr.msra.gmra.mxu0 %vm421_vm5, %v3572_v56  ;;  %v3859_v56 = vld [vmem:[%s9262_s1] sm:$0xff] }
0x1568   :  { %v3574_v44 = vmul.f32 %v7081_v2, %v7073_v63  ;;  %6697 = vmatpush3.msra.mxu0 %v2303_v38  ;;  %6716 = vmatprep.subr.mxu1 %v3859_v56 }
0x1569   :  { %6698 = vmatprep.subr.mxu0 %v2302_v52  ;;  %6717 = vmatpush3.msra.mxu1 %v3859_v56 }
0x156a   :  { %6693 = vmatprep.mubr.msk.f32.mxu0 %vm421_vm5, %v3574_v44  ;;  %6699 = vmatpush3.msra.mxu0 %v2302_v52 }
0x156b   :  { %6694 = vmatmul.mubr.msk.f32.gmra.mxu0 %vm421_vm5, %v3576_v33  ;;  %6700 = vmatprep.subr.mxu0 %v2301_v35 }
0x156c   :  { %6701 = vmatpush3.msra.mxu0 %v2301_v35 }
0x156d   :  { %6702 = vmatprep.subr.mxu0 %v2300_v14 }
0x156e   :  { %6703 = vmatpush3.msra.mxu0 %v2300_v14 }
0x156f   :  { %6724 = vmatprep.subr.mxu0 %v4004_v55 }
0x1627   :  { %v6692_v58 = vpop.f32.mrf.mxu0 }
0x1628   :  { %v3675_v1 = vadd.f32 %v6692_v58, %v8567_v8 }
0x1629   :  { %v3655_v25 = vpop.f32.mrf.mxu0 }
0x162a   :  { %v3674_v20 = vadd.f32 %v3655_v25, %v8570_v16 }
0x162b   :  { %v6695_v6 = vpop.f32.mrf.mxu0 }
0x162c   :  { %6704 = vmatprep.mubr.msk.f32.mxu0 %vm421_vm5, %v3674_v20  ;;  %v3677_v19 = vadd.f32 %v6695_v6, %v8572_v48 }
0x162d   :  { %v3665_v60 = vpop.f32.mrf.mxu0  ;;  %6705 = vmatmul.mubr.msk.f32.vlgmr.msra.gmra.mxu0 %vm421_vm5, %v3675_v1 }
0x162e   :  { %v3676_v23 = vadd.f32 %v3665_v60, %v3402_v43  ;;  %6725 = vmatpush3.msra.mxu0 %v4004_v55  ;;  %v5896_v60 = vld [vmem:[%s9263_s2] ss:$0 sm:$0xff] }
0x162f   :  { %6726 = vmatprep.subr.mxu0 %v4003_v24 }
0x1630   :  { %6707 = vmatprep.mubr.msk.f32.mxu0 %vm421_vm5, %v3676_v23  ;;  %6727 = vmatpush3.msra.mxu0 %v4003_v24 }
0x1631   :  { %6708 = vmatmul.mubr.msk.f32.gmra.mxu0 %vm421_vm5, %v3677_v19  ;;  %6728 = vmatprep.subr.mxu0 %v4002_v42 }
0x1632   :  { %6729 = vmatpush3.msra.mxu0 %v4002_v42 }
0x1633   :  { %6730 = vmatprep.subr.mxu0 %v4001_v51 }
0x1634   :  { %6731 = vmatpush3.msra.mxu0 %v4001_v51 }
0x1635   :  { %6760 = vmatprep.subr.mxu0 %v5916_v59 }
0x16ed   :  { %v6706_v61 = vpop.f32.mrf.mxu0 }
0x16ee   :  { %v3768_v16 = vadd.f32 %v6706_v61, %v5891_v36 }
0x16ef   :  { %v3762_v37 = vpop.f32.mrf.mxu0 }
0x16f0   :  { %v3763_v8 = vadd.f32 %v5891_v36, %v3762_v37  ;;  %v3782_v21 = vadd.f32 %v3768_v16, %v8175_v26 }
0x16f1   :  { %v6709_v49 = vpop.f32.mrf.mxu0 }
0x16f2   :  { %v3778_v29 = vadd.f32 %v6709_v49, %v5891_v36  ;;  %v3790_v62 = vsel %vm421_vm5, %v3782_v21, 0.0  ;;  %v3781_v12 = vadd.f32 %v3763_v8, %v8172_v22 }
0x16f3   :  { %3791 = vadd.xlane.f32.xlu0 %v3790_v62  ;;  %v3772_v39 = vpop.f32.mrf.mxu0 }
0x16f4   :  { %v3773_v48 = vadd.f32 %v5891_v36, %v3772_v39  ;;  %v3787_v13 = vsel %vm421_vm5, %v3781_v12, 0.0  ;;  %v3784_v17 = vadd.f32 %v3778_v29, %v8191_v5 }
0x16f5   :  { %3788 = vadd.xlane.f32.xlu1 %v3787_v13  ;;  %v5915_v13 = vld [vmem:[%s9261_s28 + $0x30] sm:$0xff] }
0x16f6   :  { %v3796_v40 = vsel %vm421_vm5, %v3784_v17, 0.0  ;;  %v3783_v0 = vadd.f32 %v3773_v48, %v8186_v4 }
0x16f7   :  { %3797 = vadd.xlane.f32.xlu0 %v3796_v40  ;;  %v5914_v40 = vld [vmem:[%s9261_s28 + $0x28] sm:$0xff] }
0x16f8   :  { %v3793_v26 = vsel %vm421_vm5, %v3783_v0, 0.0 }
0x16f9   :  { %3794 = vadd.xlane.f32.xlu1 %v3793_v26  ;;  %v5913_v26 = vld [vmem:[%s9261_s28 + $0x20] sm:$0xff] }
0x177c   :  { %v3792_v27 = vpop.xlane.xlu0 %3791 }
0x177d   :  { %v3800_v31 = vmul.f32 0.03125, %v3792_v27  ;;  %v4212_v27 = vld [vmem:[%s9265_s19 + $0x38] sm:$0xff] }
0x177e   :  { %v3789_v46 = vpop.xlane.xlu1 %3788  ;;  %6738 = vmatprep.subr.mxu1 %v4212_v27 }
0x177f   :  { %v8615_v22 = vsub.f32 %v3782_v21, %v3800_v31  ;;  %v3799_v9 = vmul.f32 0.03125, %v3789_v46  ;;  %v5897_v21 = vld [vmem:[%s9264_s7] ss:$0 sm:$0xff]  ;;  %v4211_v31 = vld [vmem:[%s9265_s19 + $0x30] sm:$0xff]  ;;  %v4210_v46 = vld [vmem:[%s9265_s19 + $0x28] sm:$0xff] }
0x1780   :  { %v3798_v30 = vpop.xlane.xlu0 %3797 }
0x1781   :  { %v8617_v45 = vsub.f32 %v3781_v12, %v3799_v9  ;;  %v3802_v3 = vmul.f32 0.03125, %v3798_v30  ;;  %v3808_v5 = vmul.f32 %v8615_v22, %v8615_v22  ;;  %v5930_v9 = vld [vmem:[%s9265_s19 + $0x78] sm:$0xff] }
0x1782   :  { %v3795_v53 = vpop.xlane.xlu1 %3794  ;;  %v4208_v30 = vld [vmem:[%s9265_s19 + $0x18] sm:$0xff] }
0x1783   :  { %v8621_v4 = vsub.f32 %v3784_v17, %v3802_v3  ;;  %v3801_v47 = vmul.f32 0.03125, %v3795_v53  ;;  %v3814_v57 = vsel %vm421_vm5, %v3808_v5, 0.0  ;;  %v3807_v28 = vmul.f32 %v8617_v45, %v8617_v45  ;;  %v4207_v3 = vld [vmem:[%s9265_s19 + $0x10] sm:$0xff]  ;;  %v5928_v5 = vld [vmem:[%s9265_s19 + $0x68] sm:$0xff] }
0x1784   :  { %3815 = vadd.xlane.f32.xlu0 %v3814_v57  ;;  %v4206_v53 = vld [vmem:[%s9265_s19 + $0x8] sm:$0xff]  ;;  %v5926_v57 = vld [vmem:[%s9265_s19 + $0x58] sm:$0xff] }
0x1785   :  { %v3805_v50 = vsub.f32 %v3783_v0, %v3801_v47  ;;  %v3811_v34 = vsel %vm421_vm5, %v3807_v28, 0.0  ;;  %v3810_v11 = vmul.f32 %v8621_v4, %v8621_v4  ;;  %v4205_v47 = vld [vmem:[%s9265_s19] sm:$0xff]  ;;  %v8694_v28 = vld [vmem:[%s9261_s28 + $0x58] sm:$0xff] }
0x1786   :  { %3812 = vadd.xlane.f32.xlu1 %v3811_v34  ;;  %v5924_v34 = vld [vmem:[%s9265_s19 + $0x48] sm:$0xff] }
0x1787   :  { %v3820_v63 = vsel %vm421_vm5, %v3810_v11, 0.0  ;;  %v3809_v32 = vmul.f32 %v3805_v50, %v3805_v50  ;;  %v5923_v11 = vld [vmem:[%s9265_s19 + $0x40] sm:$0xff] }
0x1788   :  { %3821 = vadd.xlane.f32.xlu0 %v3820_v63  ;;  %v8701_v63 = vld [vmem:[%s9261_s28 + $0x78] sm:$0xff] }
0x1789   :  { %v3817_v38 = vsel %vm421_vm5, %v3809_v32, 0.0  ;;  %v5898_v32 = vld [vmem:[%s9266_s10] ss:$0 sm:$0xff] }
0x178a   :  { %3818 = vadd.xlane.f32.xlu1 %v3817_v38  ;;  %v5903_v38 = vld [vmem:[%s9267_s27] ss:$0 sm:$0xff] }
0x180d   :  { %v3816_v52 = vpop.xlane.xlu0 %3815 }
0x180e   :  { %v3824_v2 = vmul.f32 0.03125, %v3816_v52 }
0x180f   :  { %v3813_v44 = vpop.xlane.xlu1 %3812 }
0x1810   :  { %v3828_v33 = vadd.f32 1e-05, %v3824_v2  ;;  %v3823_v35 = vmul.f32 0.03125, %v3813_v44 }
0x1811   :  { %v3822_v14 = vpop.xlane.xlu0 %3821 }
0x1812   :  { %7082 = vrsqrt.f32 %v3828_v33  ;;  %v3827_v58 = vadd.f32 1e-05, %v3823_v35  ;;  %v3826_v25 = vmul.f32 0.03125, %v3822_v14 }
0x1813   :  { %v3819_v54 = vpop.xlane.xlu1 %3818 }
0x1814   :  { %7084 = vrsqrt.f32 %v3827_v58  ;;  %v3830_v20 = vadd.f32 1e-05, %v3826_v25  ;;  %v3825_v1 = vmul.f32 0.03125, %v3819_v54 }
0x1816   :  { %7086 = vrsqrt.f32 %v3830_v20  ;;  %v3829_v6 = vadd.f32 1e-05, %v3825_v1 }
0x1818   :  { %7088 = vrsqrt.f32 %v3829_v6 }
0x181f   :  { %v7083_v43 = vpop.eup %7082 }
0x1820   :  { %v3836_v23 = vmul.f32 %v7083_v43, %v8615_v22  ;;  %v4209_v22 = vld [vmem:[%s9265_s19 + $0x20] sm:$0xff] }
0x1821   :  { %v7085_v19 = vpop.eup %7084 }
0x1822   :  { %v3835_v36 = vmul.f32 %v7085_v19, %v8617_v45  ;;  %v3846_v16 = vmul.f32 %v5896_v60, %v3836_v23  ;;  %v5929_v45 = vld [vmem:[%s9265_s19 + $0x70] sm:$0xff] }
0x1823   :  { %v7087_v61 = vpop.eup %7086 }
0x1824   :  { %v3845_v37 = vmul.f32 %v5896_v60, %v3835_v36  ;;  %v3838_v8 = vmul.f32 %v7087_v61, %v8621_v4  ;;  %v8647_v12 = vadd.f32 %v5897_v21, %v3846_v16  ;;  %v5927_v4 = vld [vmem:[%s9265_s19 + $0x60] sm:$0xff] }
0x1825   :  { %v7089_v49 = vpop.eup %7088 }
0x1826   :  { %v3837_v29 = vmul.f32 %v7089_v49, %v3805_v50  ;;  %v8645_v62 = vadd.f32 %v5897_v21, %v3845_v37  ;;  %v3848_v39 = vmul.f32 %v5896_v60, %v3838_v8  ;;  %v5925_v50 = vld [vmem:[%s9265_s19 + $0x50] sm:$0xff]  ;;  %v5918_v37 = vld [vmem:[%s9267_s27 + $0x1] ss:$0 sm:$0xff] }
0x1828   :  { %v3847_v48 = vmul.f32 %v5896_v60, %v3837_v29  ;;  %6718 = vmatprep.mubr.msk.f32.mxu1 %vm421_vm5, %v8645_v62  ;;  %6732 = vmatprep.mubr.msk.f32.mxu0 %vm421_vm5, %v8645_v62  ;;  %v8663_v0 = vadd.f32 %v5897_v21, %v3848_v39 }
0x1829   :  { %6719 = vmatmul.mubr.msk.f32.vlgmr.msra.gmra.mxu1 %vm421_vm5, %v8647_v12  ;;  %6733 = vmatmul.mubr.msk.f32.vlgmr.msra.gmra.mxu0 %vm421_vm5, %v8647_v12 }
0x182a   :  { %6761 = vmatpush3.msra.mxu0 %v5916_v59  ;;  %v8658_v17 = vadd.f32 %v5897_v21, %v3847_v48  ;;  %6739 = vmatpush3.msra.mxu1 %v4212_v27 }
0x182b   :  { %6762 = vmatprep.subr.mxu0 %v5915_v13  ;;  %6740 = vmatprep.subr.mxu1 %v4211_v31 }
0x182c   :  { %6763 = vmatpush3.msra.mxu0 %v5915_v13  ;;  %6721 = vmatprep.mubr.msk.f32.mxu1 %vm421_vm5, %v8658_v17 }
0x182d   :  { %6735 = vmatprep.mubr.msk.f32.mxu0 %vm421_vm5, %v8658_v17  ;;  %6764 = vmatprep.subr.mxu0 %v5914_v40 }
0x182e   :  { %6722 = vmatmul.mubr.msk.f32.gmra.mxu1 %vm421_vm5, %v8663_v0  ;;  %6736 = vmatmul.mubr.msk.f32.gmra.mxu0 %vm421_vm5, %v8663_v0 }
0x182f   :  { %6765 = vmatpush3.msra.mxu0 %v5914_v40  ;;  %6768 = vmatprep.mubr.msk.f32.mxu0 %vm421_vm5, %v8645_v62 }
0x1830   :  { %6766 = vmatprep.subr.mxu0 %v5913_v26  ;;  %6741 = vmatpush3.msra.mxu1 %v4211_v31 }
0x1831   :  { %6767 = vmatpush3.msra.mxu0 %v5913_v26  ;;  %6742 = vmatprep.subr.mxu1 %v4210_v46 }
0x1832   :  { %6769 = vmatmul.mubr.msk.f32.vlgmr.msra.gmra.mxu0 %vm421_vm5, %v8647_v12  ;;  %6743 = vmatpush3.msra.mxu1 %v4210_v46 }
0x1833   :  { %6771 = vmatprep.mubr.msk.f32.mxu0 %vm421_vm5, %v8658_v17  ;;  %6744 = vmatprep.subr.mxu1 %v4209_v22 }
0x1834   :  { %6745 = vmatpush3.msra.mxu1 %v4209_v22  ;;  %6774 = vmatprep.subr.mxu0 %v5930_v9 }
0x1835   :  { %6746 = vmatprep.subr.mxu1 %v4208_v30  ;;  %6775 = vmatpush3.msra.mxu0 %v5930_v9 }
0x1836   :  { %6772 = vmatmul.mubr.msk.f32.gmra.mxu0 %vm421_vm5, %v8663_v0  ;;  %6747 = vmatpush3.msra.mxu1 %v4208_v30 }
0x1837   :  { %6776 = vmatprep.subr.mxu0 %v5929_v45  ;;  %6748 = vmatprep.subr.mxu1 %v4207_v3 }
0x1838   :  { %6777 = vmatpush3.msra.mxu0 %v5929_v45  ;;  %6749 = vmatpush3.msra.mxu1 %v4207_v3 }
0x1839   :  { %6778 = vmatprep.subr.mxu0 %v5928_v5  ;;  %6750 = vmatprep.subr.mxu1 %v4206_v53 }
0x183a   :  { %6779 = vmatpush3.msra.mxu0 %v5928_v5  ;;  %6751 = vmatpush3.msra.mxu1 %v4206_v53 }
0x183b   :  { %6780 = vmatprep.subr.mxu0 %v5927_v4  ;;  %6752 = vmatprep.subr.mxu1 %v4205_v47 }
0x183c   :  { %6781 = vmatpush3.msra.mxu0 %v5927_v4  ;;  %6753 = vmatpush3.msra.mxu1 %v4205_v47 }
0x183d   :  { %6782 = vmatprep.subr.mxu0 %v5926_v57  ;;  %6796 = vmatprep.subr.mxu1 %v8694_v28 }
0x183e   :  { %6783 = vmatpush3.msra.mxu0 %v5926_v57 }
0x183f   :  { %6784 = vmatprep.subr.mxu0 %v5925_v50 }
0x1840   :  { %6785 = vmatpush3.msra.mxu0 %v5925_v50 }
0x1841   :  { %6786 = vmatprep.subr.mxu0 %v5924_v34 }
0x1842   :  { %6787 = vmatpush3.msra.mxu0 %v5924_v34 }
0x1843   :  { %6788 = vmatprep.subr.mxu0 %v5923_v11 }
0x1844   :  { %6789 = vmatpush3.msra.mxu0 %v5923_v11 }
0x1845   :  { %6832 = vmatprep.subr.mxu0 %v8701_v63 }
0x18e9   :  { %v6720_v55 = vpop.f32.mrf.mxu1  ;;  %v6734_v7 = vpop.f32.mrf.mxu0 }
0x18ea   :  { %v8706_v24 = vadd.f32 %v6720_v55, %v5898_v32  ;;  %v8708_v10 = vadd.f32 %v6734_v7, %v5903_v38 }
0x18eb   :  { %v3948_v42 = vpop.f32.mrf.mxu1  ;;  %v4078_v41 = vpop.f32.mrf.mxu0 }
0x18ec   :  { %v8711_v51 = vmul.f32 0.70710677, %v8708_v10  ;;  %v8713_v56 = vadd.f32 %v5898_v32, %v3948_v42  ;;  %v8715_v59 = vadd.f32 %v5903_v38, %v4078_v41  ;;  %v3971_v52 = vsel %vm3967_vm1, %v8706_v24, -inf }
0x18ed   :  { %3972 = vmax.xlane.f32.xlu0 %v3971_v52 }
0x18ee   :  { %v4106_v2 = vand.u32 2147483647, %v8711_v51  ;;  %v8721_v44 = vmul.f32 0.70710677, %v8715_v59  ;;  %v6737_v33 = vpop.f32.mrf.mxu0  ;;  %v6723_v35 = vpop.f32.mrf.mxu1  ;;  %v3968_v58 = vsel %vm3967_vm1, %v8713_v56, -inf  ;;  %vm4186_vm2 = vcmp.lt.f32.partialorder %v8711_v51, 0.0 }
0x18ef   :  { %v8723_v14 = vadd.f32 %v6737_v33, %v5903_v38  ;;  %3969 = vmax.xlane.f32.xlu1 %v3968_v58  ;;  %v8733_v23 = vadd.f32 %v6723_v35, %v5898_v32 }
0x18f0   :  { %v4110_v25 = vmul.f32 0.3275911, %v4106_v2  ;;  %v4105_v54 = vand.u32 2147483647, %v8721_v44  ;;  %v4088_v20 = vpop.f32.mrf.mxu0  ;;  %v3958_v61 = vpop.f32.mrf.mxu1  ;;  %v4162_v31 = vmul.f32 %v4106_v2, %v4106_v2  ;;  %vm4185_vm3 = vcmp.lt.f32.partialorder %v8721_v44, 0.0 }
0x18f1   :  { %v8729_v1 = vmul.f32 0.70710677, %v8723_v14  ;;  %v8731_v6 = vadd.f32 %v5903_v38, %v4088_v20  ;;  %v8741_v39 = vadd.f32 %v5898_v32, %v3958_v61  ;;  %v3977_v13 = vsel %vm3967_vm1, %v8733_v23, -inf }
0x18f2   :  { %v4114_v43 = vadd.f32 1.0, %v4110_v25  ;;  %v4109_v60 = vmul.f32 0.3275911, %v4105_v54  ;;  %v6770_v19 = vpop.f32.mrf.mxu0  ;;  %3978 = vmax.xlane.f32.xlu0 %v3977_v13  ;;  %v4166_v4 = vsub.f32 0.0, %v4162_v31  ;;  %v4161_v57 = vmul.f32 %v4105_v54, %v4105_v54 }
0x18f3   :  { %v4108_v36 = vand.u32 2147483647, %v8729_v1  ;;  %v8737_v16 = vmul.f32 0.70710677, %v8731_v6  ;;  %v8743_v48 = vadd.f32 %v6770_v19, %v5918_v37  ;;  %v3974_v45 = vsel %vm3967_vm1, %v8741_v39, -inf }
0x18f4   :  { %7090 = vrcp.f32 %v4114_v43  ;;  %v4113_v8 = vadd.f32 1.0, %v4109_v60  ;;  %v4416_v21 = vpop.f32.mrf.mxu0  ;;  %3975 = vmax.xlane.f32.xlu1 %v3974_v45  ;;  %v4171_v42 = vmul.f32 1.442695, %v4166_v4  ;;  %v4165_v2 = vsub.f32 0.0, %v4161_v57 }
0x18f5   :  { %v4112_v49 = vmul.f32 0.3275911, %v4108_v36  ;;  %v4107_v29 = vand.u32 2147483647, %v8737_v16  ;;  %v8748_v46 = vmul.f32 0.70710677, %v8743_v48  ;;  %v8750_v9 = vadd.f32 %v5918_v37, %v4416_v21 }
0x18f6   :  { %7092 = vrcp.f32 %v4113_v8  ;;  %v6773_v27 = vpop.f32.mrf.mxu0  ;;  %v4164_v38 = vmul.f32 %v4108_v36, %v4108_v36  ;;  %v4169_v8 = vmul.f32 1.442695, %v4165_v2  ;;  %vm4188_vm4 = vcmp.lt.f32.partialorder %v8729_v1, 0.0 }
0x18f7   :  { %v4116_v40 = vadd.f32 1.0, %v4112_v49  ;;  %v4111_v26 = vmul.f32 0.3275911, %v4107_v29  ;;  %v4444_v30 = vand.u32 2147483647, %v8748_v46  ;;  %v8758_v5 = vadd.f32 %v6773_v27, %v5918_v37 }
0x18f8   :  { %v8756_v3 = vmul.f32 0.70710677, %v8750_v9  ;;  %v4426_v53 = vpop.f32.mrf.mxu0  ;;  %v4163_v33 = vmul.f32 %v4107_v29, %v4107_v29  ;;  %v4168_v20 = vsub.f32 0.0, %v4164_v38  ;;  %vm4187_vm6 = vcmp.lt.f32.partialorder %v8737_v16, 0.0 }
0x18f9   :  { %7094 = vrcp.f32 %v4116_v40  ;;  %v4115_v22 = vadd.f32 1.0, %v4111_v26  ;;  %v4448_v47 = vmul.f32 0.3275911, %v4444_v30  ;;  %v8762_v34 = vmul.f32 0.70710677, %v8758_v5 }
0x18fa   :  { %v4443_v50 = vand.u32 2147483647, %v8756_v3  ;;  %v8764_v32 = vadd.f32 %v5918_v37, %v4426_v53  ;;  %v4500_v36 = vmul.f32 %v4444_v30, %v4444_v30  ;;  %v4167_v21 = vsub.f32 0.0, %v4163_v33 }
0x18fb   :  { %7096 = vrcp.f32 %v4115_v22  ;;  %v4452_v11 = vadd.f32 1.0, %v4448_v47  ;;  %v4446_v7 = vand.u32 2147483647, %v8762_v34  ;;  %v4175_v31 = vmul.f32 1.442695, %v4168_v20 }
0x18fc   :  { %v4447_v55 = vmul.f32 0.3275911, %v4443_v50  ;;  %v8768_v41 = vmul.f32 0.70710677, %v8764_v32  ;;  %v4499_v13 = vmul.f32 %v4443_v50, %v4443_v50  ;;  %v4504_v30 = vsub.f32 0.0, %v4500_v36 }
0x18fd   :  { %7098 = vrcp.f32 %v4452_v11  ;;  %v4450_v58 = vmul.f32 0.3275911, %v4446_v7  ;;  %v4502_v22 = vmul.f32 %v4446_v7, %v4446_v7  ;;  %v4173_v57 = vmul.f32 1.442695, %v4167_v21 }
0x18fe   :  { %v4451_v35 = vadd.f32 1.0, %v4447_v55  ;;  %v4445_v54 = vand.u32 2147483647, %v8768_v41  ;;  %v4503_v38 = vsub.f32 0.0, %v4499_v13  ;;  %vm4524_vm7 = vcmp.lt.f32.partialorder %v8748_v46, 0.0  ;;  %v5937_v46 = vld [vmem:[%s9261_s28 + $0x40] sm:$0xff] }
0x18ff   :  { %v4454_v43 = vadd.f32 1.0, %v4450_v58  ;;  %v4506_v7 = vsub.f32 0.0, %v4502_v22  ;;  %vm4523_vm8 = vcmp.lt.f32.partialorder %v8756_v3, 0.0  ;;  %vm4526_vm9 = vcmp.lt.f32.partialorder %v8762_v34, 0.0 }
0x1900   :  { %7100 = vrcp.f32 %v4451_v35  ;;  %v4449_v61 = vmul.f32 0.3275911, %v4445_v54  ;;  %v4509_v35 = vmul.f32 1.442695, %v4504_v30  ;;  %vm4525_vm10 = vcmp.lt.f32.partialorder %v8768_v41, 0.0 }
0x1901   :  { %v8770_v52 = vpop.eup %7090  ;;  %7102 = vpow2.f32 %v4171_v42  ;;  %v4513_v13 = vmul.f32 1.442695, %v4506_v7 }
0x1902   :  { %v4126_v25 = vmul.f32 1.0614054, %v8770_v52  ;;  %7104 = vrcp.f32 %v4454_v43  ;;  %v4453_v40 = vadd.f32 1.0, %v4449_v61  ;;  %v4501_v43 = vmul.f32 %v4445_v54, %v4445_v54 }
0x1903   :  { %v8774_v60 = vpop.eup %7092 }
0x1904   :  { %v4130_v19 = vadd.f32 -1.4531521, %v4126_v25  ;;  %v4125_v37 = vmul.f32 1.0614054, %v8774_v60  ;;  %7106 = vrcp.f32 %v4453_v40  ;;  %v4505_v30 = vsub.f32 0.0, %v4501_v43 }
0x1905   :  { %7108 = vpow2.f32 %v4169_v8  ;;  %v8794_v8 = vmul.f32 0.5, %v8715_v59 }
0x1906   :  { %v8777_v49 = vpop.eup %7094  ;;  %v4134_v29 = vmul.f32 %v8770_v52, %v4130_v19  ;;  %v4129_v26 = vadd.f32 -1.4531521, %v4125_v37  ;;  %7110 = vpow2.f32 %v4175_v31  ;;  %v4507_v37 = vmul.f32 1.442695, %v4503_v38 }
0x1907   :  { %v4128_v27 = vmul.f32 1.0614054, %v8777_v49  ;;  %7112 = vpow2.f32 %v4173_v57  ;;  %v4511_v43 = vmul.f32 1.442695, %v4505_v30 }
0x1908   :  { %v4138_v45 = vadd.f32 1.4214138, %v4134_v29  ;;  %v8781_v53 = vpop.eup %7096  ;;  %v4133_v4 = vmul.f32 %v8774_v60, %v4129_v26  ;;  %7114 = vpow2.f32 %v4509_v35 }
0x1909   :  { %v4132_v47 = vadd.f32 -1.4531521, %v4128_v27  ;;  %v4127_v50 = vmul.f32 1.0614054, %v8781_v53  ;;  %7116 = vpow2.f32 %v4507_v37 }
0x190a   :  { %v4142_v11 = vmul.f32 %v8770_v52, %v4138_v45  ;;  %v4137_v55 = vadd.f32 1.4214138, %v4133_v4  ;;  %v8787_v58 = vpop.eup %7098  ;;  %7118 = vpow2.f32 %v4513_v13 }
0x190b   :  { %v4136_v42 = vmul.f32 %v8777_v49, %v4132_v47  ;;  %v4131_v33 = vadd.f32 -1.4531521, %v4127_v50  ;;  %v4464_v61 = vmul.f32 1.0614054, %v8787_v58  ;;  %7120 = vpow2.f32 %v4511_v43 }
0x190c   :  { %v4146_v2 = vadd.f32 -0.28449672, %v4142_v11  ;;  %v4141_v25 = vmul.f32 %v8774_v60, %v4137_v55 }
0x190d   :  { %v4140_v20 = vadd.f32 1.4214138, %v4136_v42  ;;  %v4135_v36 = vmul.f32 %v8781_v53, %v4131_v33  ;;  %v8797_v40 = vpop.eup %7100  ;;  %v4468_v31 = vadd.f32 -1.4531521, %v4464_v61 }
0x190e   :  { %v4150_v19 = vmul.f32 %v8770_v52, %v4146_v2  ;;  %v4145_v21 = vadd.f32 -0.28449672, %v4141_v25  ;;  %v4463_v45 = vmul.f32 1.0614054, %v8797_v40  ;;  %v7103_v59 = vpop.eup %7102 }
0x190f   :  { %v4144_v29 = vmul.f32 %v8777_v49, %v4140_v20  ;;  %v4139_v27 = vadd.f32 1.4214138, %v4135_v36  ;;  %v4472_v57 = vmul.f32 %v8787_v58, %v4468_v31  ;;  %v8805_v11 = vpop.eup %7104 }
0x1910   :  { %v4154_v26 = vadd.f32 0.2548296, %v4150_v19  ;;  %v4149_v54 = vmul.f32 %v8774_v60, %v4145_v21  ;;  %v4467_v55 = vadd.f32 -1.4531521, %v4463_v45  ;;  %v4466_v33 = vmul.f32 1.0614054, %v8805_v11 }
0x1911   :  { %v4148_v22 = vadd.f32 -0.28449672, %v4144_v29  ;;  %v4143_v47 = vmul.f32 %v8781_v53, %v4139_v27  ;;  %v4476_v2 = vadd.f32 1.4214138, %v4472_v57 }
0x1912   :  { %v4158_v4 = vmul.f32 %v8770_v52, %v4154_v26  ;;  %v4153_v50 = vadd.f32 0.2548296, %v4149_v54  ;;  %v8810_v52 = vpop.eup %7106  ;;  %v4471_v20 = vmul.f32 %v8797_v40, %v4467_v55  ;;  %v4470_v21 = vadd.f32 -1.4531521, %v4466_v33 }
0x1913   :  { %v4152_v38 = vmul.f32 %v8777_v49, %v4148_v22  ;;  %v4147_v7 = vadd.f32 -0.28449672, %v4143_v47  ;;  %v7109_v19 = vpop.eup %7108  ;;  %v4480_v37 = vmul.f32 %v8787_v58, %v4476_v2  ;;  %v4465_v27 = vmul.f32 1.0614054, %v8810_v52 }
0x1914   :  { %v4178_v42 = vmul.f32 %v7103_v59, %v4158_v4  ;;  %v4157_v35 = vmul.f32 %v8774_v60, %v4153_v50  ;;  %v4475_v26 = vadd.f32 1.4214138, %v4471_v20  ;;  %v7111_v60 = vpop.eup %7110  ;;  %v4474_v45 = vmul.f32 %v8805_v11, %v4470_v21 }
0x1915   :  { %v4156_v25 = vadd.f32 0.2548296, %v4152_v38  ;;  %v4151_v61 = vmul.f32 %v8781_v53, %v4147_v7  ;;  %v4484_v22 = vadd.f32 -0.28449672, %v4480_v37  ;;  %v4469_v47 = vadd.f32 -1.4531521, %v4465_v27  ;;  %v7113_v57 = vpop.eup %7112 }
0x1916   :  { %v4182_v36 = vsub.f32 1.0, %v4178_v42  ;;  %v4177_v29 = vmul.f32 %v7109_v19, %v4157_v35  ;;  %v4479_v4 = vmul.f32 %v8797_v40, %v4475_v26  ;;  %v4478_v55 = vadd.f32 1.4214138, %v4474_v45  ;;  %v7115_v19 = vpop.eup %7114 }
0x1917   :  { %v4160_v13 = vmul.f32 %v8777_v49, %v4156_v25  ;;  %v4155_v54 = vadd.f32 0.2548296, %v4151_v61  ;;  %v4488_v38 = vmul.f32 %v8787_v58, %v4484_v22  ;;  %v4473_v20 = vmul.f32 %v8810_v52, %v4469_v47  ;;  %v7117_v43 = vpop.eup %7116 }
0x1918   :  { %v4190_v31 = vsub.f32 0.0, %v4182_v36  ;;  %v4181_v30 = vsub.f32 1.0, %v4177_v29  ;;  %v4483_v2 = vadd.f32 -0.28449672, %v4479_v4  ;;  %v4482_v25 = vmul.f32 %v8805_v11, %v4478_v55 }
0x1919   :  { %v4180_v59 = vmul.f32 %v7111_v60, %v4160_v13  ;;  %v4159_v49 = vmul.f32 %v8781_v53, %v4155_v54  ;;  %v4492_v35 = vadd.f32 0.2548296, %v4488_v38  ;;  %v4098_v26 = vmul.f32 0.5, %v8708_v10  ;;  %v7119_v54 = vpop.eup %7118 }
0x191a   :  { %v4194_v50 = vsel %vm4186_vm2, %v4190_v31, %v4182_v36  ;;  %v4189_v42 = vsub.f32 0.0, %v4181_v30  ;;  %v4487_v53 = vmul.f32 %v8797_v40, %v4483_v2  ;;  %v4486_v13 = vadd.f32 -0.28449672, %v4482_v25 }
0x191b   :  { %v4184_v7 = vsub.f32 1.0, %v4180_v59  ;;  %v4179_v33 = vmul.f32 %v7113_v57, %v4159_v49  ;;  %v4198_v61 = vadd.f32 1.0, %v4194_v50  ;;  %v4496_v29 = vmul.f32 %v8787_v58, %v4492_v35 }
0x191c   :  { %v4193_v51 = vsel %vm4185_vm3, %v4189_v42, %v4181_v30  ;;  %v4491_v60 = vadd.f32 0.2548296, %v4487_v53  ;;  %v4477_v31 = vadd.f32 1.4214138, %v4473_v20  ;;  %v4490_v59 = vmul.f32 %v8805_v11, %v4486_v13 }
0x191d   :  { %v4192_v36 = vsub.f32 0.0, %v4184_v7  ;;  %v4197_v37 = vadd.f32 1.0, %v4193_v51  ;;  %v4183_v21 = vsub.f32 1.0, %v4179_v33  ;;  %v4516_v45 = vmul.f32 %v7115_v19, %v4496_v29 }
0x191e   :  { %v4202_v30 = vmul.f32 %v4198_v61, %v4098_v26  ;;  %v4495_v58 = vmul.f32 %v8797_v40, %v4491_v60  ;;  %v4481_v10 = vmul.f32 %v8810_v52, %v4477_v31  ;;  %v4099_v4 = vmul.f32 0.5, %v8731_v6  ;;  %v5938_v6 = vld [vmem:[%s9261_s28 + $0x48] sm:$0xff]  ;;  %v7121_v61 = vpop.eup %7120 }
0x191f   :  { %v4196_v27 = vsel %vm4188_vm4, %v4192_v36, %v4184_v7  ;;  %v4201_v44 = vmul.f32 %v4197_v37, %v8794_v8  ;;  %v4191_v22 = vsub.f32 0.0, %v4183_v21  ;;  %v4520_v57 = vsub.f32 1.0, %v4516_v45  ;;  %v5939_v8 = vld [vmem:[%s9261_s28 + $0x50] sm:$0xff] }
0x1920   :  { %v4200_v1 = vadd.f32 1.0, %v4196_v27  ;;  %v4515_v16 = vmul.f32 %v7117_v43, %v4495_v58  ;;  %v4494_v49 = vadd.f32 0.2548296, %v4490_v59  ;;  %v4485_v38 = vadd.f32 -0.28449672, %v4481_v10  ;;  %v5962_v27 = vld [vmem:[%s9261_s28 + $0x68] sm:$0xff] }
0x1921   :  { %v4195_v47 = vsel %vm4187_vm6, %v4191_v22, %v4183_v21  ;;  %6754 = vmatprep.mubr.msk.f32.mxu1 %vm285_vm0, %v4201_v44  ;;  %v4100_v40 = vmul.f32 0.5, %v8723_v14  ;;  %v4528_v55 = vsub.f32 0.0, %v4520_v57  ;;  %v4435_v53 = vmul.f32 0.5, %v8750_v9  ;;  %v5961_v44 = vld [vmem:[%s9261_s28 + $0x60] sm:$0xff] }
0x1922   :  { %v4199_v50 = vadd.f32 1.0, %v4195_v47  ;;  %6755 = vmatmul.mubr.msk.f32.vlgmr.msra.gmra.mxu1 %vm285_vm0, %v4202_v30  ;;  %v4519_v7 = vsub.f32 1.0, %v4515_v16  ;;  %v4498_v2 = vmul.f32 %v8805_v11, %v4494_v49  ;;  %v4489_v33 = vmul.f32 %v8810_v52, %v4485_v38  ;;  %v5951_v16 = vld [vmem:[%s9265_s19 + $0xa0] sm:$0xff]  ;;  %v5978_v49 = vld [vmem:[%s9265_s19 + $0xf8] sm:$0xff]  ;;  %v5949_v38 = vld [vmem:[%s9265_s19 + $0x90] sm:$0xff] }
0x1923   :  { %6797 = vmatpush3.msra.mxu1 %v8694_v28  ;;  %v4204_v35 = vmul.f32 %v4200_v1, %v4100_v40  ;;  %v4532_v25 = vsel %vm4524_vm7, %v4528_v55, %v4520_v57  ;;  %v4436_v21 = vmul.f32 0.5, %v8743_v48  ;;  %v5963_v48 = vld [vmem:[%s9261_s28 + $0x70] sm:$0xff]  ;;  %v4437_v31 = vmul.f32 0.5, %v8764_v32  ;;  %v5948_v55 = vld [vmem:[%s9265_s19 + $0x88] sm:$0xff] }
0x1924   :  { %v4203_v42 = vmul.f32 %v4199_v50, %v4099_v4  ;;  %6798 = vmatprep.subr.mxu1 %v5939_v8  ;;  %v4527_v20 = vsub.f32 0.0, %v4519_v7  ;;  %v4518_v19 = vmul.f32 %v7119_v54, %v4498_v2  ;;  %v4493_v14 = vadd.f32 0.2548296, %v4489_v33  ;;  %v5953_v50 = vld [vmem:[%s9265_s19 + $0xb0] sm:$0xff]  ;;  %v5974_v2 = vld [vmem:[%s9265_s19 + $0xd8] sm:$0xff] }
0x1925   :  { %6799 = vmatpush3.msra.mxu1 %v5939_v8  ;;  %v4536_v28 = vadd.f32 1.0, %v4532_v25  ;;  %v4438_v22 = vmul.f32 0.5, %v8758_v5  ;;  %v5954_v8 = vld [vmem:[%s9265_s19 + $0xb8] sm:$0xff]  ;;  %v5977_v40 = vld [vmem:[%s9265_s19 + $0xf0] sm:$0xff]  ;;  %v5971_v25 = vld [vmem:[%s9265_s19 + $0xc0] sm:$0xff] }
0x1926   :  { %6757 = vmatprep.mubr.msk.f32.mxu1 %vm285_vm0, %v4203_v42  ;;  %6800 = vmatprep.subr.mxu1 %v5938_v6  ;;  %v4531_v11 = vsel %vm4523_vm8, %v4527_v20, %v4519_v7  ;;  %v4522_v51 = vsub.f32 1.0, %v4518_v19  ;;  %v4497_v36 = vmul.f32 %v8810_v52, %v4493_v14  ;;  %v5947_v42 = vld [vmem:[%s9265_s19 + $0x80] sm:$0xff]  ;;  %v5973_v33 = vld [vmem:[%s9265_s19 + $0xd0] sm:$0xff] }
0x1927   :  { %6758 = vmatmul.mubr.msk.f32.gmra.mxu1 %vm285_vm0, %v4204_v35  ;;  %v4535_v37 = vadd.f32 1.0, %v4531_v11  ;;  %v4540_v52 = vmul.f32 %v4536_v28, %v4436_v21  ;;  %v5975_v7 = vld [vmem:[%s9265_s19 + $0xe0] sm:$0xff]  ;;  %v5972_v35 = vld [vmem:[%s9265_s19 + $0xc8] sm:$0xff] }
0x1928   :  { %6801 = vmatpush3.msra.mxu1 %v5938_v6  ;;  %6804 = vmatprep.mubr.msk.f32.mxu1 %vm421_vm5, %v8645_v62  ;;  %v4530_v29 = vsub.f32 0.0, %v4522_v51  ;;  %v4517_v3 = vmul.f32 %v7121_v61, %v4497_v36  ;;  %v5976_v6 = vld [vmem:[%s9265_s19 + $0xe8] sm:$0xff]  ;;  %v5942_v61 = vld [vmem:[%s9267_s27 + $0x2] ss:$0 sm:$0xff] }
0x1929   :  { %6802 = vmatprep.subr.mxu1 %v5937_v46  ;;  %v4539_v13 = vmul.f32 %v4535_v37, %v4435_v53 }
0x192a   :  { %6803 = vmatpush3.msra.mxu1 %v5937_v46  ;;  %v4521_v43 = vsub.f32 1.0, %v4517_v3  ;;  %v4534_v9 = vsel %vm4526_vm9, %v4530_v29, %v4522_v51 }
0x192b   :  { %6805 = vmatmul.mubr.msk.f32.vlgmr.msra.gmra.mxu1 %vm421_vm5, %v8647_v12  ;;  %6790 = vmatprep.mubr.msk.f32.mxu0 %vm285_vm0, %v4539_v13  ;;  %v4538_v34 = vadd.f32 1.0, %v4534_v9 }
0x192c   :  { %6807 = vmatprep.mubr.msk.f32.mxu1 %vm421_vm5, %v8658_v17  ;;  %v4529_v26 = vsub.f32 0.0, %v4521_v43  ;;  %6791 = vmatmul.mubr.msk.f32.vlgmr.msra.gmra.mxu0 %vm285_vm0, %v4540_v52 }
0x192d   :  { %6833 = vmatpush3.msra.mxu0 %v8701_v63  ;;  %v4542_v41 = vmul.f32 %v4538_v34, %v4438_v22  ;;  %v3980_v63 = vcvt.s32.f32 %v7618_v15  ;;  %6810 = vmatprep.subr.mxu1 %v5954_v8 }
0x192e   :  { %v4533_v60 = vsel %vm4525_vm10, %v4529_v26, %v4521_v43  ;;  %6834 = vmatprep.subr.mxu0 %v5963_v48  ;;  %6811 = vmatpush3.msra.mxu1 %v5954_v8 }
0x192f   :  { %6808 = vmatmul.mubr.msk.f32.gmra.mxu1 %vm421_vm5, %v8663_v0  ;;  %v4537_v54 = vadd.f32 1.0, %v4533_v60  ;;  %6835 = vmatpush3.msra.mxu0 %v5963_v48 }
0x1930   :  { %6836 = vmatprep.subr.mxu0 %v5962_v27  ;;  %6812 = vmatprep.subr.mxu1 %v5953_v50 }
0x1931   :  { %v4541_v45 = vmul.f32 %v4537_v54, %v4437_v31  ;;  %6837 = vmatpush3.msra.mxu0 %v5962_v27  ;;  %6813 = vmatpush3.msra.mxu1 %v5953_v50 }
0x1932   :  { %6838 = vmatprep.subr.mxu0 %v5961_v44 }
0x1933   :  { %6793 = vmatprep.mubr.msk.f32.mxu0 %vm285_vm0, %v4541_v45  ;;  %6839 = vmatpush3.msra.mxu0 %v5961_v44 }
0x1934   :  { %6794 = vmatmul.mubr.msk.f32.gmra.mxu0 %vm285_vm0, %v4542_v41  ;;  %6846 = vmatprep.subr.mxu0 %v5978_v49 }
0x1935   :  { %6840 = vmatprep.mubr.msk.f32.mxu0 %vm421_vm5, %v8645_v62 }
0x1938   :  { %6841 = vmatmul.mubr.msk.f32.vlgmr.msra.gmra.mxu0 %vm421_vm5, %v8647_v12 }
0x1939   :  { %6843 = vmatprep.mubr.msk.f32.mxu0 %vm421_vm5, %v8658_v17  ;;  %6847 = vmatpush3.msra.mxu0 %v5978_v49 }
0x193a   :  { %6848 = vmatprep.subr.mxu0 %v5977_v40 }
0x193b   :  { %6849 = vmatpush3.msra.mxu0 %v5977_v40 }
0x193c   :  { %6844 = vmatmul.mubr.msk.f32.gmra.mxu0 %vm421_vm5, %v8663_v0  ;;  %6850 = vmatprep.subr.mxu0 %v5976_v6 }
0x193d   :  { %6851 = vmatpush3.msra.mxu0 %v5976_v6 }
0x193e   :  { %6852 = vmatprep.subr.mxu0 %v5975_v7 }
0x193f   :  { %6853 = vmatpush3.msra.mxu0 %v5975_v7 }
0x1940   :  { %6854 = vmatprep.subr.mxu0 %v5974_v2 }
0x1941   :  { %6855 = vmatpush3.msra.mxu0 %v5974_v2 }
0x1942   :  { %6856 = vmatprep.subr.mxu0 %v5973_v33 }
0x1943   :  { %6857 = vmatpush3.msra.mxu0 %v5973_v33 }
0x1944   :  { %6858 = vmatprep.subr.mxu0 %v5972_v35 }
0x1945   :  { %6859 = vmatpush3.msra.mxu0 %v5972_v35 }
0x1946   :  { %6860 = vmatprep.subr.mxu0 %v5971_v25 }
0x1947   :  { %6861 = vmatpush3.msra.mxu0 %v5971_v25 }
0x1976   :  { %v3973_v5 = vpop.xlane.xlu0 %3972 }
0x1977   :  { %vm3982_vm11 = vcmp.ge.f32.partialorder %v8706_v24, %v3973_v5 }
0x1978   :  { %v3986_v32 = vsel %vm3982_vm11, %v3980_v63, 4.0  ;;  %v3970_v30 = vpop.xlane.xlu1 %3969 }
0x1979   :  { %vm3981_vm12 = vcmp.ge.f32.partialorder %v8713_v56, %v3970_v30  ;;  %v3992_v58 = vsel %vm3967_vm1, %v3986_v32, inf  ;;  %v5966_v30 = vld [vmem:[%s9267_s27 + $0x3] ss:$0 sm:$0xff] }
0x197a   :  { %3993 = vmin.xlane.f32.xlu0 %v3992_v58  ;;  %v3985_v59 = vsel %vm3981_vm12, %v3980_v63, 4.0 }
0x197b   :  { %v3989_v10 = vsel %vm3967_vm1, %v3985_v59, inf  ;;  %v3979_v1 = vpop.xlane.xlu0 %3978  ;;  %v5908_v59 = vld [vmem:[%s9268_s11] ss:$0 sm:$0xff] }
0x197c   :  { %3990 = vmin.xlane.f32.xlu1 %v3989_v10  ;;  %vm3984_vm13 = vcmp.ge.f32.partialorder %v8733_v23, %v3979_v1  ;;  %v5952_v23 = vld [vmem:[%s9265_s19 + $0xa8] sm:$0xff] }
0x197d   :  { %v3988_v4 = vsel %vm3984_vm13, %v3980_v63, 4.0  ;;  %v3976_v47 = vpop.xlane.xlu1 %3975  ;;  %6814 = vmatprep.subr.mxu1 %v5952_v23 }
0x197e   :  { %v3998_v24 = vsel %vm3967_vm1, %v3988_v4, inf  ;;  %vm3983_vm14 = vcmp.ge.f32.partialorder %v8741_v39, %v3976_v47  ;;  %6815 = vmatpush3.msra.mxu1 %v5952_v23  ;;  %v5950_v39 = vld [vmem:[%s9265_s19 + $0x98] sm:$0xff]  ;;  %v8944_v23 = vld [vmem:[%s9268_s11 + $0x1] ss:$0 sm:$0xff] }
0x197f   :  { %3999 = vmin.xlane.f32.xlu0 %v3998_v24  ;;  %v3987_v56 = vsel %vm3983_vm14, %v3980_v63, 4.0  ;;  %6816 = vmatprep.subr.mxu1 %v5951_v16 }
0x1980   :  { %v3995_v57 = vsel %vm3967_vm1, %v3987_v56, inf  ;;  %6817 = vmatpush3.msra.mxu1 %v5951_v16 }
0x1981   :  { %3996 = vmin.xlane.f32.xlu1 %v3995_v57  ;;  %6818 = vmatprep.subr.mxu1 %v5950_v39 }
0x1982   :  { %6819 = vmatpush3.msra.mxu1 %v5950_v39 }
0x1983   :  { %6820 = vmatprep.subr.mxu1 %v5949_v38 }
0x1984   :  { %6821 = vmatpush3.msra.mxu1 %v5949_v38 }
0x1985   :  { %6822 = vmatprep.subr.mxu1 %v5948_v55 }
0x1986   :  { %6823 = vmatpush3.msra.mxu1 %v5948_v55 }
0x1987   :  { %6824 = vmatprep.subr.mxu1 %v5947_v42 }
0x1988   :  { %6825 = vmatpush3.msra.mxu1 %v5947_v42 }
0x19e2   :  { %v6756_v20 = vpop.f32.mrf.mxu1 }
0x19e3   :  { %v8941_v50 = vadd.f32 %v6756_v20, %v5908_v59 }
0x19e4   :  { %v4298_v19 = vpop.f32.mrf.mxu1 }
0x19e5   :  { %v8951_v38 = vadd.f32 %v5908_v59, %v4298_v19 }
0x19e7   :  { %v6759_v14 = vpop.f32.mrf.mxu1 }
0x19e8   :  { %v8953_v42 = vadd.f32 %v6759_v14, %v5908_v59 }
0x19e9   :  { %v4308_v46 = vpop.f32.mrf.mxu1 }
0x19ea   :  { %v8955_v7 = vadd.f32 %v5908_v59, %v4308_v46 }
0x19eb   :  { %v6806_v28 = vpop.f32.mrf.mxu1 }
0x19ec   :  { %v4762_v11 = vadd.f32 %v6806_v28, %v5942_v61  ;;  %v6792_v36 = vpop.f32.mrf.mxu0 }
0x19ed   :  { %v4756_v51 = vpop.f32.mrf.mxu1  ;;  %v8962_v35 = vadd.f32 %v6792_v36, %v8944_v23 }
0x19ee   :  { %v8910_v53 = vmul.f32 0.70710677, %v4762_v11  ;;  %v8912_v37 = vadd.f32 %v5942_v61, %v4756_v51  ;;  %v8920_v9 = vpop.f32.mrf.mxu0  ;;  %v8964_v25 = vmul.f32 0.5, %v4762_v11 }
0x19ef   :  { %v6809_v21 = vpop.f32.mrf.mxu1 }
0x19f0   :  { %v4784_v29 = vand.u32 2147483647, %v8910_v53  ;;  %v8916_v3 = vmul.f32 0.70710677, %v8912_v37  ;;  %v8918_v13 = vadd.f32 %v6809_v21, %v5942_v61  ;;  %vm4864_vm4 = vcmp.lt.f32.partialorder %v8910_v53, 0.0 }
0x19f1   :  { %v4766_v52 = vpop.f32.mrf.mxu1 }
0x19f2   :  { %v4788_v43 = vmul.f32 0.3275911, %v4784_v29  ;;  %v4783_v48 = vand.u32 2147483647, %v8916_v3  ;;  %v8924_v26 = vmul.f32 0.70710677, %v8918_v13  ;;  %v8926_v27 = vadd.f32 %v5942_v61, %v4766_v52 }
0x19f3   :  { %v4840_v44 = vmul.f32 %v4784_v29, %v4784_v29  ;;  %vm4863_vm7 = vcmp.lt.f32.partialorder %v8916_v3, 0.0 }
0x19f4   :  { %v4792_v34 = vadd.f32 1.0, %v4788_v43  ;;  %v4787_v60 = vmul.f32 0.3275911, %v4783_v48  ;;  %v4786_v31 = vand.u32 2147483647, %v8924_v26  ;;  %v8932_v45 = vpop.f32.mrf.mxu0  ;;  %v4839_v5 = vmul.f32 %v4783_v48, %v4783_v48 }
0x19f5   :  { %v8930_v54 = vmul.f32 0.70710677, %v8926_v27  ;;  %v4844_v10 = vsub.f32 0.0, %v4840_v44  ;;  %vm4866_vm9 = vcmp.lt.f32.partialorder %v8924_v26, 0.0 }
0x19f6   :  { %7122 = vrcp.f32 %v4792_v34  ;;  %v4791_v22 = vadd.f32 1.0, %v4787_v60  ;;  %v4790_v41 = vmul.f32 0.3275911, %v4786_v31  ;;  %v8935_v32 = vpop.f32.mrf.mxu0  ;;  %v4842_v1 = vmul.f32 %v4786_v31, %v4786_v31 }
0x19f7   :  { %v4785_v63 = vand.u32 2147483647, %v8930_v54  ;;  %v4843_v56 = vsub.f32 0.0, %v4839_v5  ;;  %v4849_v40 = vmul.f32 1.442695, %v4844_v10  ;;  %v8978_v31 = vmul.f32 0.5, %v8912_v37 }
0x19f8   :  { %7124 = vrcp.f32 %v4791_v22  ;;  %v4794_v58 = vadd.f32 1.0, %v4790_v41  ;;  %v6842_v24 = vpop.f32.mrf.mxu0  ;;  %v4846_v55 = vsub.f32 0.0, %v4842_v1  ;;  %v8988_v1 = vadd.f32 %v8944_v23, %v8920_v9 }
0x19f9   :  { %v4789_v4 = vmul.f32 0.3275911, %v4785_v63  ;;  %v8939_v47 = vadd.f32 %v6842_v24, %v5966_v30  ;;  %v4841_v16 = vmul.f32 %v4785_v63, %v4785_v63  ;;  %v4847_v20 = vmul.f32 1.442695, %v4843_v56 }
0x19fa   :  { %7126 = vrcp.f32 %v4794_v58  ;;  %v5096_v8 = vpop.f32.mrf.mxu0  ;;  %v4853_v21 = vmul.f32 1.442695, %v4846_v55  ;;  %v8997_v9 = vmul.f32 0.5, %v8926_v27  ;;  %vm4865_vm10 = vcmp.lt.f32.partialorder %v8930_v54, 0.0 }
0x19fb   :  { %v4793_v57 = vadd.f32 1.0, %v4789_v4  ;;  %v8947_v39 = vmul.f32 0.70710677, %v8939_v47  ;;  %v8949_v49 = vadd.f32 %v5966_v30, %v5096_v8  ;;  %v4845_v28 = vsub.f32 0.0, %v4841_v16 }
0x19fc   :  { %v6845_v6 = vpop.f32.mrf.mxu0 }
0x19fd   :  { %7128 = vrcp.f32 %v4793_v57  ;;  %v5124_v2 = vand.u32 2147483647, %v8947_v39  ;;  %v8959_v33 = vmul.f32 0.70710677, %v8949_v49  ;;  %v8966_v19 = vadd.f32 %v6845_v6, %v5966_v30 }
0x19fe   :  { %v5106_v61 = vpop.f32.mrf.mxu0  ;;  %7130 = vpow2.f32 %v4849_v40  ;;  %v4851_v22 = vmul.f32 1.442695, %v4845_v28  ;;  %vm5204_vm13 = vcmp.lt.f32.partialorder %v8947_v39, 0.0  ;;  %v5116_v39 = vmul.f32 0.5, %v8939_v47 }
0x19ff   :  { %v5128_v51 = vmul.f32 0.3275911, %v5124_v2  ;;  %v5180_v14 = vmul.f32 %v5124_v2, %v5124_v2  ;;  %v5123_v46 = vand.u32 2147483647, %v8959_v33  ;;  %v8970_v29 = vmul.f32 0.70710677, %v8966_v19 }
0x1a00   :  { %v8972_v52 = vadd.f32 %v5966_v30, %v5106_v61  ;;  %7132 = vpow2.f32 %v4847_v20  ;;  %vm5203_vm14 = vcmp.lt.f32.partialorder %v8959_v33, 0.0 }
0x1a01   :  { %v5132_v11 = vadd.f32 1.0, %v5128_v51  ;;  %v5184_v43 = vsub.f32 0.0, %v5180_v14  ;;  %v5127_v48 = vmul.f32 0.3275911, %v5123_v46  ;;  %v5179_v34 = vmul.f32 %v5123_v46, %v5123_v46 }
0x1a02   :  { %v5126_v44 = vand.u32 2147483647, %v8970_v29  ;;  %v8984_v10 = vmul.f32 0.70710677, %v8972_v52  ;;  %v5117_v47 = vmul.f32 0.5, %v8972_v52 }
0x1a03   :  { %v8974_v36 = vpop.eup %7122  ;;  %7134 = vrcp.f32 %v5132_v11  ;;  %v5131_v41 = vadd.f32 1.0, %v5127_v48  ;;  %v5183_v63 = vsub.f32 0.0, %v5179_v34  ;;  %v5189_v4 = vmul.f32 1.442695, %v5184_v43  ;;  %v9002_v46 = vpop.xlane.xlu0 %3993 }
0x1a04   :  { %v4804_v60 = vmul.f32 1.0614054, %v8974_v36  ;;  %v5130_v58 = vmul.f32 0.3275911, %v5126_v44  ;;  %v5182_v59 = vmul.f32 %v5126_v44, %v5126_v44  ;;  %7136 = vpow2.f32 %v4853_v21 }
0x1a05   :  { %v8981_v5 = vpop.eup %7124  ;;  %7138 = vrcp.f32 %v5131_v41  ;;  %v5125_v55 = vand.u32 2147483647, %v8984_v10  ;;  %v5187_v2 = vmul.f32 1.442695, %v5183_v63  ;;  %v9011_v63 = vpop.xlane.xlu1 %3990  ;;  %vm4318_vm15 = vcmp.eq.f32.partialorder %v9002_v46, 0.0 }
0x1a06   :  { %v4808_v30 = vadd.f32 -1.4531521, %v4804_v60  ;;  %v4803_v37 = vmul.f32 1.0614054, %v8981_v5  ;;  %v5134_v57 = vadd.f32 1.0, %v5130_v58  ;;  %v5186_v8 = vsub.f32 0.0, %v5182_v59 }
0x1a07   :  { %v8991_v24 = vpop.eup %7126  ;;  %7140 = vpow2.f32 %v4851_v22  ;;  %v5129_v51 = vmul.f32 0.3275911, %v5125_v55  ;;  %v5181_v14 = vmul.f32 %v5125_v55, %v5125_v55  ;;  %v9009_v22 = vadd.f32 %v8932_v45, %v8944_v23 }
0x1a08   :  { %v4812_v56 = vmul.f32 %v8974_v36, %v4808_v30  ;;  %v4807_v16 = vadd.f32 -1.4531521, %v4803_v37  ;;  %v4806_v40 = vmul.f32 1.0614054, %v8991_v24  ;;  %7142 = vrcp.f32 %v5134_v57 }
0x1a09   :  { %7144 = vpow2.f32 %v5189_v4  ;;  %v5193_v43 = vmul.f32 1.442695, %v5186_v8  ;;  %v5133_v34 = vadd.f32 1.0, %v5129_v51  ;;  %v5185_v60 = vsub.f32 0.0, %v5181_v14 }
0x1a0a   :  { %v4816_v6 = vadd.f32 1.4214138, %v4812_v56  ;;  %v8999_v20 = vpop.eup %7128  ;;  %v4811_v61 = vmul.f32 %v8981_v5, %v4807_v16  ;;  %v4810_v28 = vadd.f32 -1.4531521, %v4806_v40  ;;  %7146 = vpow2.f32 %v5187_v2  ;;  %v9020_v16 = vpop.xlane.xlu0 %3999 }
0x1a0b   :  { %v4805_v11 = vmul.f32 1.0614054, %v8999_v20  ;;  %v7131_v30 = vpop.eup %7130  ;;  %7148 = vrcp.f32 %v5133_v34  ;;  %vm4658_vm1 = vcmp.eq.f32.partialorder %v9002_v46, 1.0  ;;  %v5191_v8 = vmul.f32 1.442695, %v5185_v60 }
0x1a0c   :  { %v4820_v21 = vmul.f32 %v8974_v36, %v4816_v6  ;;  %v4815_v48 = vadd.f32 1.4214138, %v4811_v61  ;;  %v4814_v27 = vmul.f32 %v8991_v24, %v4810_v28  ;;  %7150 = vpow2.f32 %v5193_v43 }
0x1a0d   :  { %v4809_v41 = vadd.f32 -1.4531521, %v4805_v11  ;;  %v7133_v45 = vpop.eup %7132  ;;  %vm4317_vm2 = vcmp.eq.f32.partialorder %v9011_v63, 0.0  ;;  %vm4657_vm3 = vcmp.eq.f32.partialorder %v9011_v63, 1.0  ;;  %v4330_v2 = vsel %vm4318_vm15, %v8941_v50, 0.0 }
0x1a0e   :  { %v4824_v44 = vadd.f32 -0.28449672, %v4820_v21  ;;  %v4819_v58 = vmul.f32 %v8981_v5, %v4815_v48  ;;  %v4818_v59 = vadd.f32 1.4214138, %v4814_v27  ;;  %v4670_v14 = vsel %vm4658_vm1, %v8962_v35, 0.0 }
0x1a0f   :  { %v4813_v4 = vmul.f32 %v8999_v20, %v4809_v41  ;;  %vm4320_vm6 = vcmp.eq.f32.partialorder %v9020_v16, 0.0  ;;  %v9035_v48 = vadd.f32 %v4670_v14, %v4330_v2  ;;  %vm4660_vm8 = vcmp.eq.f32.partialorder %v9020_v16, 1.0 }
0x1a10   :  { %v4828_v37 = vmul.f32 %v8974_v36, %v4824_v44  ;;  %v4823_v56 = vadd.f32 -0.28449672, %v4819_v58  ;;  %v4822_v57 = vmul.f32 %v8991_v24, %v4818_v59  ;;  %v9022_v40 = vpop.eup %7134  ;;  %v4329_v44 = vsel %vm4317_vm2, %v8951_v38, 0.0 }
0x1a11   :  { %v4817_v6 = vadd.f32 1.4214138, %v4813_v4  ;;  %v5144_v51 = vmul.f32 1.0614054, %v9022_v40  ;;  %v7137_v21 = vpop.eup %7136  ;;  %v4669_v59 = vsel %vm4657_vm3, %v8988_v1, 0.0  ;;  %7152 = vpow2.f32 %v5191_v8 }
0x1a12   :  { %v4832_v55 = vadd.f32 0.2548296, %v4828_v37  ;;  %v4827_v61 = vmul.f32 %v8981_v5, %v4823_v56  ;;  %v4826_v28 = vadd.f32 -0.28449672, %v4822_v57  ;;  %v9037_v50 = vpop.eup %7138  ;;  %v9053_v57 = vadd.f32 %v4669_v59, %v4329_v44 }
0x1a13   :  { %v4821_v43 = vmul.f32 %v8999_v20, %v4817_v6  ;;  %v5148_v60 = vadd.f32 -1.4531521, %v5144_v51  ;;  %v5143_v58 = vmul.f32 1.0614054, %v9037_v50  ;;  %v4672_v3 = vsel %vm4660_vm8, %v9009_v22, 0.0 }
0x1a14   :  { %v4836_v11 = vmul.f32 %v8974_v36, %v4832_v55  ;;  %v4831_v27 = vadd.f32 0.2548296, %v4827_v61  ;;  %v4830_v34 = vmul.f32 %v8991_v24, %v4826_v28  ;;  %v7141_v35 = vpop.eup %7140  ;;  %v9058_v61 = vpop.xlane.xlu1 %3996  ;;  %vm5206_vm15 = vcmp.lt.f32.partialorder %v8970_v29, 0.0 }
0x1a15   :  { %v4825_v36 = vadd.f32 -0.28449672, %v4821_v43  ;;  %v9049_v37 = vpop.eup %7142  ;;  %v5152_v38 = vmul.f32 %v9022_v40, %v5148_v60  ;;  %v5147_v6 = vadd.f32 -1.4531521, %v5143_v58  ;;  %vm4319_vm11 = vcmp.eq.f32.partialorder %v9058_v61, 0.0 }
0x1a16   :  { %v4856_v41 = vmul.f32 %v7131_v30, %v4836_v11  ;;  %v4835_v4 = vmul.f32 %v8981_v5, %v4831_v27  ;;  %v4834_v56 = vadd.f32 0.2548296, %v4830_v34  ;;  %v5146_v2 = vmul.f32 1.0614054, %v9049_v37  ;;  %v7145_v1 = vpop.eup %7144 }
0x1a17   :  { %v4829_v55 = vmul.f32 %v8999_v20, %v4825_v36  ;;  %v5156_v5 = vadd.f32 1.4214138, %v5152_v38  ;;  %v5151_v43 = vmul.f32 %v9037_v50, %v5147_v6  ;;  %v7147_v34 = vpop.eup %7146  ;;  %vm4659_vm12 = vcmp.eq.f32.partialorder %v9058_v61, 1.0 }
0x1a18   :  { %v4860_v30 = vsub.f32 1.0, %v4856_v41  ;;  %v4855_v28 = vmul.f32 %v7133_v45, %v4835_v4  ;;  %v4838_v51 = vmul.f32 %v8991_v24, %v4834_v56  ;;  %v5150_v27 = vadd.f32 -1.4531521, %v5146_v2  ;;  %v9066_v45 = vpop.eup %7148 }
0x1a19   :  { %v4833_v11 = vadd.f32 0.2548296, %v4829_v55  ;;  %v5160_v41 = vmul.f32 %v9022_v40, %v5156_v5  ;;  %v5155_v36 = vadd.f32 1.4214138, %v5151_v43  ;;  %v7151_v59 = vpop.eup %7150  ;;  %v4331_v54 = vsel %vm4319_vm11, %v8955_v7, 0.0 }
0x1a1a   :  { %v4868_v14 = vsub.f32 0.0, %v4860_v30  ;;  %v4859_v60 = vsub.f32 1.0, %v4855_v28  ;;  %v4858_v44 = vmul.f32 %v7137_v21, %v4838_v51  ;;  %v5154_v58 = vmul.f32 %v9049_v37, %v5150_v27 }
0x1a1b   :  { %v4837_v8 = vmul.f32 %v8999_v20, %v4833_v11  ;;  %v5164_v38 = vadd.f32 -0.28449672, %v5160_v41  ;;  %v5159_v6 = vmul.f32 %v9037_v50, %v5155_v36  ;;  %v5145_v28 = vmul.f32 1.0614054, %v9066_v45 }
0x1a1c   :  { %v4872_v24 = vsel %vm4864_vm4, %v4868_v14, %v4860_v30  ;;  %v4867_v4 = vsub.f32 0.0, %v4859_v60  ;;  %v4862_v56 = vsub.f32 1.0, %v4858_v44  ;;  %v5158_v2 = vadd.f32 1.4214138, %v5154_v58 }
0x1a1d   :  { %v4876_v21 = vadd.f32 1.0, %v4872_v24  ;;  %v4857_v55 = vmul.f32 %v7141_v35, %v4837_v8  ;;  %v5168_v20 = vmul.f32 %v9022_v40, %v5164_v38  ;;  %v4332_v51 = vsel %vm4320_vm6, %v8953_v42, 0.0 }
0x1a1e   :  { %v4871_v53 = vsel %vm4863_vm7, %v4867_v4, %v4859_v60  ;;  %v4870_v30 = vsub.f32 0.0, %v4862_v56  ;;  %v5163_v11 = vadd.f32 -0.28449672, %v5159_v6  ;;  %v5162_v35 = vmul.f32 %v9049_v37, %v5158_v2 }
0x1a1f   :  { %v4875_v5 = vadd.f32 1.0, %v4871_v53  ;;  %v4861_v14 = vsub.f32 1.0, %v4857_v55  ;;  %v5172_v27 = vadd.f32 0.2548296, %v5168_v20  ;;  %v5149_v44 = vadd.f32 -1.4531521, %v5145_v28  ;;  %v7153_v55 = vpop.eup %7152 }
0x1a20   :  { %v4874_v43 = vsel %vm4866_vm9, %v4870_v30, %v4862_v56  ;;  %v4880_v60 = vmul.f32 %v4876_v21, %v8964_v25  ;;  %v5167_v42 = vmul.f32 %v9037_v50, %v5163_v11  ;;  %v5166_v36 = vadd.f32 -0.28449672, %v5162_v35 }
0x1a21   :  { %v4879_v41 = vmul.f32 %v4875_v5, %v8978_v31  ;;  %v4869_v24 = vsub.f32 0.0, %v4861_v14  ;;  %v5176_v8 = vmul.f32 %v9022_v40, %v5172_v27  ;;  %v5153_v58 = vmul.f32 %v9066_v45, %v5149_v44 }
0x1a22   :  { %v9091_v26 = vadd.f32 %v4672_v3, %v4332_v51  ;;  %v4878_v4 = vadd.f32 1.0, %v4874_v43  ;;  %v4649_v56 = vadd.f32 %v8944_v23, %v8935_v32  ;;  %v5171_v25 = vadd.f32 0.2548296, %v5167_v42 }
0x1a23   :  { %v4873_v22 = vsel %vm4865_vm10, %v4869_v24, %v4861_v14  ;;  %6826 = vmatprep.mubr.msk.f32.mxu1 %vm285_vm0, %v4879_v41  ;;  %v5196_v21 = vmul.f32 %v7145_v1, %v5176_v8  ;;  %v5170_v38 = vmul.f32 %v9049_v37, %v5166_v36  ;;  %v5157_v40 = vadd.f32 1.4214138, %v5153_v58 }
0x1a24   :  { %v4877_v31 = vadd.f32 1.0, %v4873_v22  ;;  %6827 = vmatmul.mubr.msk.f32.vlgmr.msra.gmra.mxu1 %vm285_vm0, %v4880_v60  ;;  %v4778_v6 = vmul.f32 0.5, %v8918_v13  ;;  %v5175_v2 = vmul.f32 %v9037_v50, %v5171_v25  ;;  %v4671_v32 = vsel %vm4659_vm12, %v4649_v56, 0.0  ;;  %v5956_v25 = vld [vmem:[%s9268_s11 + $0x2] ss:$0 sm:$0xff] }
0x1a25   :  { %v5200_v1 = vsub.f32 1.0, %v5196_v21  ;;  %v5174_v28 = vadd.f32 0.2548296, %v5170_v38  ;;  %v5161_v53 = vmul.f32 %v9066_v45, %v5157_v40  ;;  %v9109_v51 = vadd.f32 %v4671_v32, %v4331_v54 }
0x1a26   :  { %v4881_v23 = vmul.f32 %v4877_v31, %v8997_v9  ;;  %v4882_v30 = vmul.f32 %v4878_v4, %v4778_v6  ;;  %v5195_v20 = vmul.f32 %v7147_v34, %v5175_v2  ;;  %vm5205_vm1 = vcmp.lt.f32.partialorder %v8984_v10, 0.0  ;;  %v5980_v10 = vld [vmem:[%s9268_s11 + $0x3] ss:$0 sm:$0xff] }
0x1a27   :  { %v5208_v13 = vsub.f32 0.0, %v5200_v1  ;;  %v5178_v50 = vmul.f32 %v9049_v37, %v5174_v28  ;;  %v5165_v5 = vadd.f32 -0.28449672, %v5161_v53  ;;  %v5115_v37 = vmul.f32 0.5, %v8949_v49 }
0x1a28   :  { %6829 = vmatprep.mubr.msk.f32.mxu1 %vm285_vm0, %v4881_v23  ;;  %v5199_v7 = vsub.f32 1.0, %v5195_v20  ;;  %v5118_v4 = vmul.f32 0.5, %v8966_v19  ;;  %vm4998_vm2 = vcmp.eq.f32.partialorder %v9002_v46, 2.0  ;;  %vm4997_vm3 = vcmp.eq.f32.partialorder %v9011_v63, 2.0 }
0x1a29   :  { %6830 = vmatmul.mubr.msk.f32.gmra.mxu1 %vm285_vm0, %v4882_v30  ;;  %v5212_v9 = vsel %vm5204_vm13, %v5208_v13, %v5200_v1  ;;  %v5198_v14 = vmul.f32 %v7151_v59, %v5178_v50  ;;  %v5169_v11 = vmul.f32 %v9066_v45, %v5165_v5  ;;  %vm5338_vm4 = vcmp.eq.f32.partialorder %v9002_v46, 3.0 }
0x1a2a   :  { %v5207_v35 = vsub.f32 0.0, %v5199_v7  ;;  %v5216_v27 = vadd.f32 1.0, %v5212_v9  ;;  %vm5337_vm6 = vcmp.eq.f32.partialorder %v9011_v63, 3.0  ;;  %vm5000_vm7 = vcmp.eq.f32.partialorder %v9020_v16, 2.0 }
0x1a2b   :  { %v5202_v34 = vsub.f32 1.0, %v5198_v14  ;;  %v5173_v43 = vadd.f32 0.2548296, %v5169_v11  ;;  %vm4999_vm8 = vcmp.eq.f32.partialorder %v9058_v61, 2.0  ;;  %vm5340_vm9 = vcmp.eq.f32.partialorder %v9020_v16, 3.0 }
0x1a2c   :  { %v5211_v44 = vsel %vm5203_vm14, %v5207_v35, %v5199_v7  ;;  %v5220_v59 = vmul.f32 %v5216_v27, %v5116_v39  ;;  %vm5339_vm10 = vcmp.eq.f32.partialorder %v9058_v61, 3.0  ;;  %vm5645_vm14 = vcmask 0  }
0x1a2d   :  { %v5215_v3 = vadd.f32 1.0, %v5211_v44  ;;  %v5177_v60 = vmul.f32 %v9066_v45, %v5173_v43  ;;  %v5210_v41 = vsub.f32 0.0, %v5202_v34 }
0x1a2f   :  { %v5219_v24 = vmul.f32 %v5215_v3, %v5115_v37  ;;  %v5197_v42 = vmul.f32 %v7153_v55, %v5177_v60  ;;  %v5214_v33 = vsel %vm5206_vm15, %v5210_v41, %v5202_v34 }
0x1a30   :  { %v5218_v49 = vadd.f32 1.0, %v5214_v33 }
0x1a31   :  { %v5201_v8 = vsub.f32 1.0, %v5197_v42  ;;  %6862 = vmatprep.mubr.msk.f32.mxu0 %vm285_vm0, %v5219_v24 }
0x1a32   :  { %6863 = vmatmul.mubr.msk.f32.vlgmr.msra.gmra.mxu0 %vm285_vm0, %v5220_v59  ;;  %v5222_v29 = vmul.f32 %v5218_v49, %v5118_v4 }
0x1a33   :  { %v5209_v36 = vsub.f32 0.0, %v5201_v8 }
0x1a35   :  { %v5213_v45 = vsel %vm5205_vm1, %v5209_v36, %v5201_v8 }
0x1a36   :  { %v5217_v58 = vadd.f32 1.0, %v5213_v45 }
0x1a38   :  { %v5221_v56 = vmul.f32 %v5217_v58, %v5117_v47 }
0x1a3a   :  { %6865 = vmatprep.mubr.msk.f32.mxu0 %vm285_vm0, %v5221_v56 }
0x1a3b   :  { %6866 = vmatmul.mubr.msk.f32.gmra.mxu0 %vm285_vm0, %v5222_v29 }
0x1ae4   :  { %v6828_v22 = vpop.f32.mrf.mxu1 }
0x1ae5   :  { %v4984_v21 = vadd.f32 %v6828_v22, %v5956_v25  ;;  %v5438_v22 = vld [vmem:[#allocation10 + $0x18] sm:$0xff] }
0x1ae6   :  { %v4978_v31 = vpop.f32.mrf.mxu1  ;;  %6868 = vmatprep.subr.mxu1 %v5438_v22 }
0x1ae7   :  { %v4979_v38 = vadd.f32 %v5956_v25, %v4978_v31  ;;  %v5010_v40 = vsel %vm4998_vm2, %v4984_v21, 0.0  ;;  %6869 = vmatpush3.msra.mxu1 %v5438_v22  ;;  %v5436_v31 = vld [vmem:[#allocation10 + $0x8] sm:$0xff]  ;;  %v5435_v21 = vld [vmem:[#allocation10] sm:$0xff] }
0x1ae8   :  { %v5014_v2 = vadd.f32 %v5010_v40, %v9035_v48 }
0x1ae9   :  { %v6831_v55 = vpop.f32.mrf.mxu1  ;;  %v5009_v19 = vsel %vm4997_vm3, %v4979_v38, 0.0 }
0x1aea   :  { %v5013_v28 = vadd.f32 %v5009_v19, %v9053_v57  ;;  %v4994_v53 = vadd.f32 %v6831_v55, %v5956_v25 }
0x1aeb   :  { %v4988_v32 = vpop.f32.mrf.mxu1 }
0x1aec   :  { %v4989_v13 = vadd.f32 %v5956_v25, %v4988_v32  ;;  %v5012_v48 = vsel %vm5000_vm7, %v4994_v53, 0.0  ;;  %v5437_v25 = vld [vmem:[#allocation10 + $0x10] sm:$0xff] }
0x1aed   :  { %v5016_v11 = vadd.f32 %v5012_v48, %v9091_v26  ;;  %6870 = vmatprep.subr.mxu1 %v5437_v25 }
0x1aee   :  { %v5011_v57 = vsel %vm4999_vm8, %v4989_v13, 0.0  ;;  %6871 = vmatpush3.msra.mxu1 %v5437_v25 }
0x1aef   :  { %v5015_v43 = vadd.f32 %v5011_v57, %v9109_v51  ;;  %6872 = vmatprep.subr.mxu1 %v5436_v31 }
0x1af0   :  { %6873 = vmatpush3.msra.mxu1 %v5436_v31 }
0x1af1   :  { %6874 = vmatprep.subr.mxu1 %v5435_v21 }
0x1af2   :  { %v6864_v52 = vpop.f32.mrf.mxu0  ;;  %6875 = vmatpush3.msra.mxu1 %v5435_v21 }
0x1af3   :  { %v5324_v6 = vadd.f32 %v6864_v52, %v5980_v10 }
0x1af4   :  { %v5318_v54 = vpop.f32.mrf.mxu0 }
0x1af5   :  { %v5350_v23 = vsel %vm5338_vm4, %v5324_v6, 0.0  ;;  %v5319_v1 = vadd.f32 %v5980_v10, %v5318_v54 }
0x1af6   :  { %v5354_v30 = vadd.f32 %v5350_v23, %v5014_v2 }
0x1af7   :  { %v5349_v20 = vsel %vm5337_vm6, %v5319_v1, 0.0 }
0x1af8   :  { %v5353_v50 = vadd.f32 %v5349_v20, %v5013_v28  ;;  %v5358_v5 = vadd.f32 %v5354_v30, %v8647_v12  ;;  %v5985_v30 = vld [vmem:[%s9269_s15] ss:$0 sm:$0xff] }
0x1afa   :  { %v5366_v46 = vsel %vm421_vm5, %v5358_v5, 0.0  ;;  %v5357_v7 = vadd.f32 %v5353_v50, %v8645_v62 }
0x1afb   :  { %v6867_v9 = vpop.f32.mrf.mxu0  ;;  %5367 = vadd.xlane.f32.xlu0 %v5366_v46 }
0x1afc   :  { %v5334_v14 = vadd.f32 %v6867_v9, %v5980_v10  ;;  %v5363_v63 = vsel %vm421_vm5, %v5357_v7, 0.0 }
0x1afd   :  { %v5328_v12 = vpop.f32.mrf.mxu0  ;;  %5364 = vadd.xlane.f32.xlu1 %v5363_v63 }
0x1afe   :  { %v5352_v35 = vsel %vm5340_vm9, %v5334_v14, 0.0  ;;  %v5329_v34 = vadd.f32 %v5980_v10, %v5328_v12 }
0x1aff   :  { %v5356_v27 = vadd.f32 %v5352_v35, %v5016_v11 }
0x1b00   :  { %v5351_v62 = vsel %vm5339_vm10, %v5329_v34, 0.0 }
0x1b01   :  { %v5355_v44 = vadd.f32 %v5351_v62, %v5015_v43  ;;  %v5360_v37 = vadd.f32 %v5356_v27, %v8663_v0  ;;  %v5987_v43 = vld [vmem:[#allocation11] ss:$0 sm:$0xff] }
0x1b03   :  { %v5372_v3 = vsel %vm421_vm5, %v5360_v37, 0.0  ;;  %v5359_v60 = vadd.f32 %v5355_v44, %v8658_v17 }
0x1b04   :  { %5373 = vadd.xlane.f32.xlu0 %v5372_v3 }
0x1b05   :  { %v5369_v16 = vsel %vm421_vm5, %v5359_v60, 0.0 }
0x1b06   :  { %5370 = vadd.xlane.f32.xlu1 %v5369_v16 }
0x1b84   :  { %v5368_v26 = vpop.xlane.xlu0 %5367 }
0x1b85   :  { %v5376_v39 = vmul.f32 0.03125, %v5368_v26 }
0x1b86   :  { %v5365_v41 = vpop.xlane.xlu1 %5364 }
0x1b87   :  { %v5380_v24 = vsub.f32 %v5358_v5, %v5376_v39  ;;  %v5375_v51 = vmul.f32 0.03125, %v5365_v41  ;;  %v5986_v5 = vld [vmem:[%s7582_s9] ss:$0 sm:$0xff]  ;;  %s9270_s9 = sld [smem:[#allocation19_spill]] }
0x1b89   :  { %v5379_v42 = vsub.f32 %v5357_v7, %v5375_v51  ;;  %v5384_v59 = vmul.f32 %v5380_v24, %v5380_v24 }
0x1b8b   :  { %v5390_v61 = vsel %vm421_vm5, %v5384_v59, 0.0  ;;  %v5383_v8 = vmul.f32 %v5379_v42, %v5379_v42 }
0x1b8c   :  { %5391 = vadd.xlane.f32.xlu0 %v5390_v61 }
0x1b8d   :  { %v5374_v0 = vpop.xlane.xlu0 %5373  ;;  %v5387_v33 = vsel %vm421_vm5, %v5383_v8, 0.0  ;;  %v5597_v25 = vld [vmem:[%s9270_s9 + $0x10] sm:$0xff]  ;;  %v5596_v21 = vld [vmem:[%s9270_s9 + $0x8] sm:$0xff] }
0x1b8e   :  { %v5378_v36 = vmul.f32 0.03125, %v5374_v0  ;;  %5388 = vadd.xlane.f32.xlu1 %v5387_v33 }
0x1b8f   :  { %v5371_v17 = vpop.xlane.xlu1 %5370 }
0x1b90   :  { %v5382_v49 = vsub.f32 %v5360_v37, %v5378_v36  ;;  %v5377_v45 = vmul.f32 0.03125, %v5371_v17 }
0x1b92   :  { %v5381_v47 = vsub.f32 %v5359_v60, %v5377_v45  ;;  %v5386_v58 = vmul.f32 %v5382_v49, %v5382_v49 }
0x1b94   :  { %v5396_v4 = vsel %vm421_vm5, %v5386_v58, 0.0  ;;  %v5385_v56 = vmul.f32 %v5381_v47, %v5381_v47 }
0x1b95   :  { %5397 = vadd.xlane.f32.xlu0 %v5396_v4 }
0x1b96   :  { %v5393_v29 = vsel %vm421_vm5, %v5385_v56, 0.0 }
0x1b97   :  { %5394 = vadd.xlane.f32.xlu1 %v5393_v29 }
0x1c15   :  { %v5392_v38 = vpop.xlane.xlu0 %5391 }
0x1c16   :  { %v5400_v10 = vmul.f32 0.03125, %v5392_v38 }
0x1c17   :  { %v5389_v40 = vpop.xlane.xlu1 %5388 }
0x1c18   :  { %v5404_v55 = vadd.f32 1e-05, %v5400_v10  ;;  %v5399_v52 = vmul.f32 0.03125, %v5389_v40 }
0x1c1a   :  { %7154 = vrsqrt.f32 %v5404_v55  ;;  %v5403_v19 = vadd.f32 1e-05, %v5399_v52  ;;  %v5598_v52 = vld [vmem:[%s9270_s9 + $0x18] sm:$0xff] }
0x1c1c   :  { %7156 = vrsqrt.f32 %v5403_v19 }
0x1c1e   :  { %v5398_v6 = vpop.xlane.xlu0 %5397 }
0x1c1f   :  { %v5402_v2 = vmul.f32 0.03125, %v5398_v6 }
0x1c20   :  { %v5395_v54 = vpop.xlane.xlu1 %5394 }
0x1c21   :  { %v5406_v32 = vadd.f32 1e-05, %v5402_v2  ;;  %v5401_v23 = vmul.f32 0.03125, %v5395_v54 }
0x1c23   :  { %7158 = vrsqrt.f32 %v5406_v32  ;;  %v5405_v1 = vadd.f32 1e-05, %v5401_v23 }
0x1c25   :  { %7160 = vrsqrt.f32 %v5405_v1 }
0x1c27   :  { %v7155_v28 = vpop.eup %7154 }
0x1c28   :  { %v5412_v53 = vmul.f32 %v7155_v28, %v5380_v24 }
0x1c29   :  { %v7157_v20 = vpop.eup %7156 }
0x1c2a   :  { %v5411_v13 = vmul.f32 %v7157_v20, %v5379_v42  ;;  %v5422_v50 = vmul.f32 %v5985_v30, %v5412_v53  ;;  %v5595_v42 = vld [vmem:[%s9270_s9] sm:$0xff] }
0x1c2c   :  { %v5421_v48 = vmul.f32 %v5985_v30, %v5411_v13  ;;  %v5432_v7 = vadd.f32 %v5986_v5, %v5422_v50 }
0x1c2e   :  { %v5431_v46 = vadd.f32 %v5986_v5, %v5421_v48 }
0x1c30   :  { %v7159_v9 = vpop.eup %7158  ;;  %6876 = vmatprep.mubr.msk.f32.mxu1 %vm421_vm5, %v5431_v46 }
0x1c31   :  { %6877 = vmatmul.mubr.msk.f32.vlgmr.msra.gmra.mxu1 %vm421_vm5, %v5432_v7  ;;  %v5414_v57 = vmul.f32 %v7159_v9, %v5382_v49 }
0x1c32   :  { %v7161_v14 = vpop.eup %7160 }
0x1c33   :  { %v5413_v63 = vmul.f32 %v7161_v14, %v5381_v47  ;;  %v5424_v11 = vmul.f32 %v5985_v30, %v5414_v57 }
0x1c35   :  { %v5423_v12 = vmul.f32 %v5985_v30, %v5413_v63  ;;  %v5434_v34 = vadd.f32 %v5986_v5, %v5424_v11 }
0x1c37   :  { %v5433_v35 = vadd.f32 %v5986_v5, %v5423_v12 }
0x1c39   :  { %6879 = vmatprep.mubr.msk.f32.mxu1 %vm421_vm5, %v5433_v35 }
0x1c3a   :  { %6880 = vmatmul.mubr.msk.f32.gmra.mxu1 %vm421_vm5, %v5434_v34 }
0x1cf1   :  { %v6878_v27 = vpop.f32.mrf.mxu1 }
0x1cf2   :  { %v9160_v62 = vadd.f32 %v6878_v27, %v5987_v43 }
0x1cf3   :  { %v5524_v44 = vpop.f32.mrf.mxu1 }
0x1cf4   :  { %v9162_v37 = vadd.f32 %v5987_v43, %v5524_v44  ;;  %v5546_v3 = vsel %vm285_vm0, %v9160_v62, -inf }
0x1cf5   :  { %5547 = vmax.xlane.f32.xlu0 %v5546_v3 }
0x1cf6   :  { %v5543_v60 = vsel %vm285_vm0, %v9162_v37, -inf }
0x1cf7   :  { %5544 = vmax.xlane.f32.xlu1 %v5543_v60 }
0x1cfa   :  { %v6881_v16 = vpop.f32.mrf.mxu1 }
0x1cfb   :  { %v9168_v26 = vadd.f32 %v6881_v16, %v5987_v43 }
0x1cfc   :  { %v5534_v39 = vpop.f32.mrf.mxu1 }
0x1cfd   :  { %v9170_v41 = vadd.f32 %v5987_v43, %v5534_v39  ;;  %v5552_v24 = vsel %vm285_vm0, %v9168_v26, -inf }
0x1cfe   :  { %5553 = vmax.xlane.f32.xlu0 %v5552_v24 }
0x1cff   :  { %v5549_v51 = vsel %vm285_vm0, %v9170_v41, -inf }
0x1d00   :  { %5550 = vmax.xlane.f32.xlu1 %v5549_v51 }
0x1d11   :  { %5600 = vperm.xlu1 %6937, %v5595_v42  }
0x1d7e   :  { %v5548_v59 = vpop.xlane.xlu0 %5547 }
0x1d7f   :  { %v5556_v61 = vsub.f32 %v9160_v62, %v5548_v59 }
0x1d80   :  { %v5545_v8 = vpop.xlane.xlu1 %5544 }
0x1d81   :  { %v5561_v0 = vmul.f32 1.442695, %v5556_v61  ;;  %v5555_v33 = vsub.f32 %v9162_v37, %v5545_v8 }
0x1d83   :  { %7162 = vpow2.f32 %v5561_v0  ;;  %v5559_v36 = vmul.f32 1.442695, %v5555_v33 }
0x1d85   :  { %7164 = vpow2.f32 %v5559_v36 }
0x1d87   :  { %v5554_v17 = vpop.xlane.xlu0 %5553 }
0x1d88   :  { %v5558_v49 = vsub.f32 %v9168_v26, %v5554_v17 }
0x1d89   :  { %v5551_v31 = vpop.xlane.xlu1 %5550 }
0x1d8a   :  { %v5565_v45 = vmul.f32 1.442695, %v5558_v49  ;;  %v5557_v38 = vsub.f32 %v9170_v41, %v5551_v31 }
0x1d8c   :  { %7166 = vpow2.f32 %v5565_v45  ;;  %v5563_v10 = vmul.f32 1.442695, %v5557_v38 }
0x1d8d   :  { %v5601_v19 = vpop.permute.xlu1 %5600 }
0x1d8e   :  { %7168 = vpow2.f32 %v5563_v10  ;;  %vm5611_vm5 = vcmp.eq.s32.totalorder %v7618_v15, %v5601_v19 }
0x1d8f   :  { %v5992_v14 = vsel %vm5611_vm5, 1.0, %v7382_v18 }
0x1d90   :  { %v7163_v47 = vpop.eup %7162 }
0x1d91   :  { %v5570_v58 = vsel %vm285_vm0, %v7163_v47, 0.0 }
0x1d92   :  { %v7165_v4 = vpop.eup %7164  ;;  %5571 = vadd.xlane.f32.xlu0 %v5570_v58 }
0x1d93   :  { %v5567_v56 = vsel %vm285_vm0, %v7165_v4, 0.0 }
0x1d94   :  { %5568 = vadd.xlane.f32.xlu1 %v5567_v56 }
0x1d99   :  { %v7167_v29 = vpop.eup %7166 }
0x1d9a   :  { %v5576_v22 = vsel %vm285_vm0, %v7167_v29, 0.0 }
0x1d9b   :  { %5577 = vadd.xlane.f32.xlu0 %v5576_v22  ;;  %v7169_v40 = vpop.eup %7168 }
0x1d9c   :  { %v5573_v55 = vsel %vm285_vm0, %v7169_v40, 0.0 }
0x1da5   :  { %5606 = vperm.xlu1 %6937, %v5597_v25  }
0x1db1   :  { %5603 = vperm.xlu0 %6936, %v5596_v21  }
0x1dc9   :  { %5574 = vadd.xlane.f32.xlu1 %v5573_v55 }
0x1dda   :  { %5609 = vperm.xlu1 %6937, %v5598_v52  }
0x1e1b   :  { %v5572_v2 = vpop.xlane.xlu0 %5571 }
0x1e1d   :  { %v5569_v6 = vpop.xlane.xlu1 %5568 }
0x1e1e   :  { %7170 = vlog2.f32 %v5569_v6 }
0x1e1f   :  { %7172 = vlog2.f32 %v5572_v2 }
0x1e21   :  { %v5607_v32 = vpop.permute.xlu1 %5606 }
0x1e22   :  { %vm5613_vm13 = vcmp.eq.s32.totalorder %v7618_v15, %v5607_v32 }
0x1e23   :  { %v5994_v3 = vsel %vm5613_vm13, 1.0, %v7382_v18 }
0x1e24   :  { %v5578_v54 = vpop.xlane.xlu0 %5577 }
0x1e25   :  { %7174 = vlog2.f32 %v5578_v54 }
0x1e2b   :  { %v7171_v23 = vpop.eup %7170 }
0x1e2c   :  { %v7173_v28 = vpop.eup %7172  ;;  %v5580_v53 = vmul.f32 0.6931472, %v7171_v23  ;;  %v5604_v5 = vpop.permute.xlu0 %5603 }
0x1e2d   :  { %v5582_v30 = vmul.f32 0.6931472, %v7173_v28  ;;  %vm5612_vm11 = vcmp.eq.s32.totalorder %v7618_v15, %v5604_v5 }
0x1e2e   :  { %v5587_v20 = vadd.f32 %v5580_v53, %v5545_v8  ;;  %v5993_v35 = vsel %vm5612_vm11, 1.0, %v7382_v18 }
0x1e2f   :  { %v5588_v50 = vadd.f32 %v5582_v30, %v5548_v59 }
0x1e30   :  { %v5591_v48 = vsub.f32 %v9162_v37, %v5587_v20 }
0x1e31   :  { %v5592_v9 = vsub.f32 %v9160_v62, %v5588_v50 }
0x1e32   :  { %v7175_v13 = vpop.eup %7174  ;;  %v5623_v11 = vmul.f32 %v5992_v14, %v5591_v48 }
0x1e33   :  { %v5586_v46 = vmul.f32 0.6931472, %v7175_v13  ;;  %v5624_v34 = vmul.f32 %v5993_v35, %v5592_v9 }
0x1e34   :  { %v5627_v62 = vsel %vm285_vm0, %v5623_v11, 0.0 }
0x1e35   :  { %v5590_v63 = vadd.f32 %v5586_v46, %v5554_v17  ;;  %v5628_v60 = vsel %vm285_vm0, %v5624_v34, 0.0 }
0x1e36   :  { %v5629_v24 = vadd.f32 %v5628_v60, %v5627_v62 }
0x1e37   :  { %v5594_v37 = vsub.f32 %v9168_v26, %v5590_v63 }
0x1e52   :  { %v5575_v1 = vpop.xlane.xlu1 %5574 }
0x1e53   :  { %7176 = vlog2.f32 %v5575_v1 }
0x1e56   :  { %v5610_v7 = vpop.permute.xlu1 %5609 }
0x1e57   :  { %vm5614_vm12 = vcmp.eq.s32.totalorder %v7618_v15, %v5610_v7 }
0x1e58   :  { %v5995_v27 = vsel %vm5614_vm12, 1.0, %v7382_v18 }
0x1e59   :  { %v5626_v16 = vmul.f32 %v5995_v27, %v5594_v37 }
0x1e5b   :  { %v5632_v42 = vsel %vm285_vm0, %v5626_v16, 0.0 }
0x1e60   :  { %v7177_v57 = vpop.eup %7176 }
0x1e61   :  { %v5584_v12 = vmul.f32 0.6931472, %v7177_v57 }
0x1e63   :  { %v5589_v43 = vadd.f32 %v5584_v12, %v5551_v31 }
0x1e65   :  { %v5593_v44 = vsub.f32 %v9170_v41, %v5589_v43 }
0x1e67   :  { %v5625_v39 = vmul.f32 %v5994_v3, %v5593_v44 }
0x1e69   :  { %v5630_v51 = vsel %vm285_vm0, %v5625_v39, 0.0 }
0x1e6a   :  { %v5631_v15 = vadd.f32 %v5630_v51, %v5629_v24 }
0x1e6c   :  { %v5633_v59 = vadd.f32 %v5632_v42, %v5631_v15 }
0x1e6e   :  { %5634 = vadd.xlane.f32.xlu0 %v5633_v59 }
0x1ef7   :  { %v5635_v61 = vpop.xlane.xlu0 %5634 }
0x1ef8   :  { %v5636_v8 = vrot.slane %v5635_v61, 4 }
0x1efa   :  { %v5637_v0 = vadd.f32 %v5636_v8, %v5635_v61 }
0x1efc   :  { %v5638_v41 = vrot.slane %v5637_v0, 2 }
0x1efe   :  { %v5639_v33 = vadd.f32 %v5638_v41, %v5637_v0 }
0x1f00   :  { %v5640_v26 = vrot.slane %v5639_v33, 1 }
0x1f02   :  { %v5641_v36 = vadd.f32 %v5640_v26, %v5639_v33 }
0x1f04   :  { %6882 = vpush %v5641_v36 }
0x1f35   :  { %s6883_s18 = spop %6882 }
0x1f36   :  { %v5643_v18 = vstv %s6883_s18 }
0x1f37   :  { %v5644_v17 = vsub.f32 0.0, %v5643_v18 }
0x1f39   :  { %5646 = vst.msk [vmem:[#allocation13] sm:$0x1] %vm5645_vm14, %v5644_v17 }
0x1f3a   :  { %7313 = shalt.err (!%p7310_p6)
}
0x1f3b   :  { %5656 = dma.vmem_to_hbm [thread:$0]  %s5654_s16, 16, %s7597_s4, [#allocation4]  }
0x1f3c   :  { %7330 = dma.done.wait [#allocation4], 16  }
0x1f3d   :  { %7331 = vsyncadd [#allocation4], 4294967280 }
0x1f3e   :  { %5660 = vsyncpa [#allocation3], 1 }
0x1f3f   :  { %5661 = vsyncpa [#allocation6], 1 }
0x1f40   :  { %5662 = vsyncpa [#allocation9], 1 }
0x1f41   :  { %5663 = vsyncpa [#allocation12], 1 }
0x1f42   :  { %5664 = vsyncpa [#allocation4], 1 }

</bundles_post_ra>
